<compile_context>
chip_gen: v7x
topology: tpu7x:2x2x1
jax: 0.10.0
libtpu: 0.0.40
codegen_flags: <defaults>
</compile_context>

<pallas_src>
import jax
import jax.numpy as jnp
from jax.experimental import pallas as pl
from jax.experimental.pallas import tpu as pltpu

_LANES = 128


def _pick_chunk(ks):
    """Largest chunk (in sublane rows) <= 256 that divides ks."""
    for c in (256, 128, 64, 32, 16, 8, 4, 2, 1):
        if ks % c == 0:
            return c
    return 1


def _flatten_linear_kernel(x_ref, w_ref, b_ref, o_ref):
    """out = x_flat @ W.T + b, for tiny (B, N) and K packed as [Ks, 128].

    x_ref: [B, Ks, 128]   (K dense across sublanes + lanes)
    w_ref: [N, Ks, 128]   (PyTorch Linear weight layout, K packed the same way)
    b_ref: [1, N]
    o_ref: [B, N]
    """
    B, ks, lanes = x_ref.shape
    N = w_ref.shape[0]
    ch = _pick_chunk(ks)
    n_chunks = ks // ch

    # M = N = 2 -> MXU would use 2/256 columns; contract on the VPU (multiply)
    # + XLU (reductions).  Everything stays 2-D for robust lowering, and the
    # static chunking keeps live vector temporaries small.
    cols = []
    for n in range(N):                          # static unroll (N == 2)
        rows = []
        for bi in range(B):                     # static unroll (B == 2)
            acc = jnp.zeros((1, lanes), jnp.float32)
            for c in range(n_chunks):           # static unroll
                lo, hi = c * ch, (c + 1) * ch
                xc = x_ref[bi, lo:hi, :]        # [ch, 128]
                wc = w_ref[n, lo:hi, :]         # [ch, 128]
                acc = acc + jnp.sum(xc * wc, axis=0, keepdims=True)   # [1, 128]
            rows.append(jnp.sum(acc, axis=1, keepdims=True))          # [1, 1]
        cols.append(jnp.concatenate(rows, axis=0))                    # [B, 1]
    out = jnp.concatenate(cols, axis=1)                               # [B, N]
    o_ref[...] = (out + b_ref[...]).astype(o_ref.dtype)


def linear_pallas(x2d, w, b):
    """x2d: [B, K] f32, w: [N, K] f32 (PyTorch layout), b: [N] -> [B, N]."""
    B, K = x2d.shape
    N, K2 = w.shape
    assert K == K2, "in_features mismatch"
    assert K % _LANES == 0, "K must be a multiple of 128"
    ks = K // _LANES

    x3 = x2d.reshape(B, ks, _LANES)   # dense K packing (row-major, bit-exact)
    w3 = w.reshape(N, ks, _LANES)
    b2 = b.reshape(1, N)

    return pl.pallas_call(
        _flatten_linear_kernel,
        out_shape=jax.ShapeDtypeStruct((B, N), x2d.dtype),
        grid=(1,),
        in_specs=[
            pl.BlockSpec((B, ks, _LANES), lambda i: (0, 0, 0)),
            pl.BlockSpec((N, ks, _LANES), lambda i: (0, 0, 0)),
            pl.BlockSpec((1, N), lambda i: (0, 0)),
        ],
        out_specs=pl.BlockSpec((B, N), lambda i: (0, 0)),
        compiler_params=pltpu.CompilerParams(
            dimension_semantics=("arbitrary",),
        ),
    )(x3, w3, b2)


def net_forward(x_nchw, w, b):
    """Full Net.forward.

    x_nchw : [B, C, H, W]                 (PyTorch NCHW)
    w      : [out_features, in_features]  (PyTorch Linear weight layout)
    b      : [out_features]
    """
    B = x_nchw.shape[0]
    # seresnet_layer = identity (see module analysis above).
    # TODO(synk): if children()[6:-1] ever contains real SE blocks (conv/BN/SE)
    #             they would need their own kernels; with the SENet child
    #             layout that slice is empty / eval-mode Dropout.
    x2d = x_nchw.reshape(B, -1)          # torch.flatten(x, 1) on contiguous NCHW
    return linear_pallas(x2d, w, b)      # x @ W.T + b, bias fused in-kernel


if __name__ == "__main__":
    # Shapes implied by the module: Linear in_features = 131072 = 2048 * 8 * 8.
    B, C, H, W = 2, 2048, 8, 8
    IN_FEATURES = C * H * W              # 131072
    OUT_FEATURES = 2

    key = jax.random.PRNGKey(0)
    kx, kw, kb = jax.random.split(key, 3)

    x = jax.random.normal(kx, (B, C, H, W), dtype=jnp.float32)

    # Deterministic PyTorch-Linear-style init: U(-1/sqrt(fan_in), 1/sqrt(fan_in)).
    bound = 1.0 / jnp.sqrt(jnp.float32(IN_FEATURES))
    w_lin = jax.random.uniform(
        kw, (OUT_FEATURES, IN_FEATURES), dtype=jnp.float32,
        minval=-bound, maxval=bound)
    b_lin = jax.random.uniform(
        kb, (OUT_FEATURES,), dtype=jnp.float32, minval=-bound, maxval=bound)

    out = net_forward(x, w_lin, b_lin)
    out = jax.block_until_ready(out)

    # Cross-check against plain-JAX reference (torch Linear: x @ W.T + b).
    ref = x.reshape(B, -1) @ w_lin.T + b_lin
    assert out.shape == (B, OUT_FEATURES)
    assert jnp.allclose(out, ref, atol=1e-3, rtol=1e-3), "mismatch vs reference"

    print("KERNEL_OK")
</pallas_src>

<mosaic_0001>
module attributes {stable_mosaic.version = 11 : i64} {
  func.func @_flatten_linear_kernel(%arg0: i32, %arg1: memref<2x1024x128xf32, #tpu.memory_space<vmem>>, %arg2: memref<2x1024x128xf32, #tpu.memory_space<vmem>>, %arg3: memref<1x2xf32, #tpu.memory_space<vmem>>, %arg4: memref<2x2xf32, #tpu.memory_space<vmem>>) attributes {dimension_semantics = [#tpu.dimension_semantics<arbitrary>], iteration_bounds = array<i64: 1>, scalar_prefetch = 0 : i64, scratch_operands = 0 : i64, tpu.core_type = #tpu.core_type<tc>, window_params = [{pipeline_mode = #tpu.pipeline_mode<synchronous>, transform_indices = @transform_0, window_bounds = array<i64: 2, 1024, 128>}, {pipeline_mode = #tpu.pipeline_mode<synchronous>, transform_indices = @transform_1, window_bounds = array<i64: 2, 1024, 128>}, {pipeline_mode = #tpu.pipeline_mode<synchronous>, transform_indices = @transform_2, window_bounds = array<i64: 1, 2>}, {pipeline_mode = #tpu.pipeline_mode<synchronous>, transform_indices = @transform_3, window_bounds = array<i64: 2, 2>}]} {
    %cst = arith.constant 0.000000e+00 : f32
    %0 = vector.broadcast %cst : f32 to vector<1x128xf32>
    %c0 = arith.constant 0 : index
    %c0_0 = arith.constant 0 : index
    %c0_1 = arith.constant 0 : index
    %1 = vector.load %arg1[%c0, %c0_0, %c0_1] : memref<2x1024x128xf32, #tpu.memory_space<vmem>>, vector<1x256x128xf32>
    %2 = vector.shape_cast %1 : vector<1x256x128xf32> to vector<256x128xf32>
    %c0_2 = arith.constant 0 : index
    %c0_3 = arith.constant 0 : index
    %c0_4 = arith.constant 0 : index
    %3 = vector.load %arg2[%c0_2, %c0_3, %c0_4] : memref<2x1024x128xf32, #tpu.memory_space<vmem>>, vector<1x256x128xf32>
    %4 = vector.shape_cast %3 : vector<1x256x128xf32> to vector<256x128xf32>
    %5 = arith.mulf %2, %4 : vector<256x128xf32>
    %cst_5 = arith.constant dense<0.000000e+00> : vector<128xf32>
    %6 = vector.multi_reduction <add>, %5, %cst_5 [0] : vector<256x128xf32> to vector<128xf32>
    %7 = vector.shape_cast %6 : vector<128xf32> to vector<1x128xf32>
    %8 = arith.addf %0, %7 : vector<1x128xf32>
    %c0_6 = arith.constant 0 : index
    %c256 = arith.constant 256 : index
    %c0_7 = arith.constant 0 : index
    %9 = vector.load %arg1[%c0_6, %c256, %c0_7] : memref<2x1024x128xf32, #tpu.memory_space<vmem>>, vector<1x256x128xf32>
    %10 = vector.shape_cast %9 : vector<1x256x128xf32> to vector<256x128xf32>
    %c0_8 = arith.constant 0 : index
    %c256_9 = arith.constant 256 : index
    %c0_10 = arith.constant 0 : index
    %11 = vector.load %arg2[%c0_8, %c256_9, %c0_10] : memref<2x1024x128xf32, #tpu.memory_space<vmem>>, vector<1x256x128xf32>
    %12 = vector.shape_cast %11 : vector<1x256x128xf32> to vector<256x128xf32>
    %13 = arith.mulf %10, %12 : vector<256x128xf32>
    %cst_11 = arith.constant dense<0.000000e+00> : vector<128xf32>
    %14 = vector.multi_reduction <add>, %13, %cst_11 [0] : vector<256x128xf32> to vector<128xf32>
    %15 = vector.shape_cast %14 : vector<128xf32> to vector<1x128xf32>
    %16 = arith.addf %8, %15 : vector<1x128xf32>
    %c0_12 = arith.constant 0 : index
    %c512 = arith.constant 512 : index
    %c0_13 = arith.constant 0 : index
    %17 = vector.load %arg1[%c0_12, %c512, %c0_13] : memref<2x1024x128xf32, #tpu.memory_space<vmem>>, vector<1x256x128xf32>
    %18 = vector.shape_cast %17 : vector<1x256x128xf32> to vector<256x128xf32>
    %c0_14 = arith.constant 0 : index
    %c512_15 = arith.constant 512 : index
    %c0_16 = arith.constant 0 : index
    %19 = vector.load %arg2[%c0_14, %c512_15, %c0_16] : memref<2x1024x128xf32, #tpu.memory_space<vmem>>, vector<1x256x128xf32>
    %20 = vector.shape_cast %19 : vector<1x256x128xf32> to vector<256x128xf32>
    %21 = arith.mulf %18, %20 : vector<256x128xf32>
    %cst_17 = arith.constant dense<0.000000e+00> : vector<128xf32>
    %22 = vector.multi_reduction <add>, %21, %cst_17 [0] : vector<256x128xf32> to vector<128xf32>
    %23 = vector.shape_cast %22 : vector<128xf32> to vector<1x128xf32>
    %24 = arith.addf %16, %23 : vector<1x128xf32>
    %c0_18 = arith.constant 0 : index
    %c768 = arith.constant 768 : index
    %c0_19 = arith.constant 0 : index
    %25 = vector.load %arg1[%c0_18, %c768, %c0_19] : memref<2x1024x128xf32, #tpu.memory_space<vmem>>, vector<1x256x128xf32>
    %26 = vector.shape_cast %25 : vector<1x256x128xf32> to vector<256x128xf32>
    %c0_20 = arith.constant 0 : index
    %c768_21 = arith.constant 768 : index
    %c0_22 = arith.constant 0 : index
    %27 = vector.load %arg2[%c0_20, %c768_21, %c0_22] : memref<2x1024x128xf32, #tpu.memory_space<vmem>>, vector<1x256x128xf32>
    %28 = vector.shape_cast %27 : vector<1x256x128xf32> to vector<256x128xf32>
    %29 = arith.mulf %26, %28 : vector<256x128xf32>
    %cst_23 = arith.constant dense<0.000000e+00> : vector<128xf32>
    %30 = vector.multi_reduction <add>, %29, %cst_23 [0] : vector<256x128xf32> to vector<128xf32>
    %31 = vector.shape_cast %30 : vector<128xf32> to vector<1x128xf32>
    %32 = arith.addf %24, %31 : vector<1x128xf32>
    %cst_24 = arith.constant dense<0.000000e+00> : vector<1xf32>
    %33 = vector.multi_reduction <add>, %32, %cst_24 [1] : vector<1x128xf32> to vector<1xf32>
    %34 = vector.shape_cast %33 : vector<1xf32> to vector<1x1xf32>
    %cst_25 = arith.constant 0.000000e+00 : f32
    %35 = vector.broadcast %cst_25 : f32 to vector<1x128xf32>
    %c1 = arith.constant 1 : index
    %c0_26 = arith.constant 0 : index
    %c0_27 = arith.constant 0 : index
    %36 = vector.load %arg1[%c1, %c0_26, %c0_27] : memref<2x1024x128xf32, #tpu.memory_space<vmem>>, vector<1x256x128xf32>
    %37 = vector.shape_cast %36 : vector<1x256x128xf32> to vector<256x128xf32>
    %c0_28 = arith.constant 0 : index
    %c0_29 = arith.constant 0 : index
    %c0_30 = arith.constant 0 : index
    %38 = vector.load %arg2[%c0_28, %c0_29, %c0_30] : memref<2x1024x128xf32, #tpu.memory_space<vmem>>, vector<1x256x128xf32>
    %39 = vector.shape_cast %38 : vector<1x256x128xf32> to vector<256x128xf32>
    %40 = arith.mulf %37, %39 : vector<256x128xf32>
    %cst_31 = arith.constant dense<0.000000e+00> : vector<128xf32>
    %41 = vector.multi_reduction <add>, %40, %cst_31 [0] : vector<256x128xf32> to vector<128xf32>
    %42 = vector.shape_cast %41 : vector<128xf32> to vector<1x128xf32>
    %43 = arith.addf %35, %42 : vector<1x128xf32>
    %c1_32 = arith.constant 1 : index
    %c256_33 = arith.constant 256 : index
    %c0_34 = arith.constant 0 : index
    %44 = vector.load %arg1[%c1_32, %c256_33, %c0_34] : memref<2x1024x128xf32, #tpu.memory_space<vmem>>, vector<1x256x128xf32>
    %45 = vector.shape_cast %44 : vector<1x256x128xf32> to vector<256x128xf32>
    %c0_35 = arith.constant 0 : index
    %c256_36 = arith.constant 256 : index
    %c0_37 = arith.constant 0 : index
    %46 = vector.load %arg2[%c0_35, %c256_36, %c0_37] : memref<2x1024x128xf32, #tpu.memory_space<vmem>>, vector<1x256x128xf32>
    %47 = vector.shape_cast %46 : vector<1x256x128xf32> to vector<256x128xf32>
    %48 = arith.mulf %45, %47 : vector<256x128xf32>
    %cst_38 = arith.constant dense<0.000000e+00> : vector<128xf32>
    %49 = vector.multi_reduction <add>, %48, %cst_38 [0] : vector<256x128xf32> to vector<128xf32>
    %50 = vector.shape_cast %49 : vector<128xf32> to vector<1x128xf32>
    %51 = arith.addf %43, %50 : vector<1x128xf32>
    %c1_39 = arith.constant 1 : index
    %c512_40 = arith.constant 512 : index
    %c0_41 = arith.constant 0 : index
    %52 = vector.load %arg1[%c1_39, %c512_40, %c0_41] : memref<2x1024x128xf32, #tpu.memory_space<vmem>>, vector<1x256x128xf32>
    %53 = vector.shape_cast %52 : vector<1x256x128xf32> to vector<256x128xf32>
    %c0_42 = arith.constant 0 : index
    %c512_43 = arith.constant 512 : index
    %c0_44 = arith.constant 0 : index
    %54 = vector.load %arg2[%c0_42, %c512_43, %c0_44] : memref<2x1024x128xf32, #tpu.memory_space<vmem>>, vector<1x256x128xf32>
    %55 = vector.shape_cast %54 : vector<1x256x128xf32> to vector<256x128xf32>
    %56 = arith.mulf %53, %55 : vector<256x128xf32>
    %cst_45 = arith.constant dense<0.000000e+00> : vector<128xf32>
    %57 = vector.multi_reduction <add>, %56, %cst_45 [0] : vector<256x128xf32> to vector<128xf32>
    %58 = vector.shape_cast %57 : vector<128xf32> to vector<1x128xf32>
    %59 = arith.addf %51, %58 : vector<1x128xf32>
    %c1_46 = arith.constant 1 : index
    %c768_47 = arith.constant 768 : index
    %c0_48 = arith.constant 0 : index
    %60 = vector.load %arg1[%c1_46, %c768_47, %c0_48] : memref<2x1024x128xf32, #tpu.memory_space<vmem>>, vector<1x256x128xf32>
    %61 = vector.shape_cast %60 : vector<1x256x128xf32> to vector<256x128xf32>
    %c0_49 = arith.constant 0 : index
    %c768_50 = arith.constant 768 : index
    %c0_51 = arith.constant 0 : index
    %62 = vector.load %arg2[%c0_49, %c768_50, %c0_51] : memref<2x1024x128xf32, #tpu.memory_space<vmem>>, vector<1x256x128xf32>
    %63 = vector.shape_cast %62 : vector<1x256x128xf32> to vector<256x128xf32>
    %64 = arith.mulf %61, %63 : vector<256x128xf32>
    %cst_52 = arith.constant dense<0.000000e+00> : vector<128xf32>
    %65 = vector.multi_reduction <add>, %64, %cst_52 [0] : vector<256x128xf32> to vector<128xf32>
    %66 = vector.shape_cast %65 : vector<128xf32> to vector<1x128xf32>
    %67 = arith.addf %59, %66 : vector<1x128xf32>
    %cst_53 = arith.constant dense<0.000000e+00> : vector<1xf32>
    %68 = vector.multi_reduction <add>, %67, %cst_53 [1] : vector<1x128xf32> to vector<1xf32>
    %69 = vector.shape_cast %68 : vector<1xf32> to vector<1x1xf32>
    %70 = tpu.concatenate %34, %69 in 0 : vector<1x1xf32>, vector<1x1xf32> -> vector<2x1xf32>
    %cst_54 = arith.constant 0.000000e+00 : f32
    %71 = vector.broadcast %cst_54 : f32 to vector<1x128xf32>
    %c0_55 = arith.constant 0 : index
    %c0_56 = arith.constant 0 : index
    %c0_57 = arith.constant 0 : index
    %72 = vector.load %arg1[%c0_55, %c0_56, %c0_57] : memref<2x1024x128xf32, #tpu.memory_space<vmem>>, vector<1x256x128xf32>
    %73 = vector.shape_cast %72 : vector<1x256x128xf32> to vector<256x128xf32>
    %c1_58 = arith.constant 1 : index
    %c0_59 = arith.constant 0 : index
    %c0_60 = arith.constant 0 : index
    %74 = vector.load %arg2[%c1_58, %c0_59, %c0_60] : memref<2x1024x128xf32, #tpu.memory_space<vmem>>, vector<1x256x128xf32>
    %75 = vector.shape_cast %74 : vector<1x256x128xf32> to vector<256x128xf32>
    %76 = arith.mulf %73, %75 : vector<256x128xf32>
    %cst_61 = arith.constant dense<0.000000e+00> : vector<128xf32>
    %77 = vector.multi_reduction <add>, %76, %cst_61 [0] : vector<256x128xf32> to vector<128xf32>
    %78 = vector.shape_cast %77 : vector<128xf32> to vector<1x128xf32>
    %79 = arith.addf %71, %78 : vector<1x128xf32>
    %c0_62 = arith.constant 0 : index
    %c256_63 = arith.constant 256 : index
    %c0_64 = arith.constant 0 : index
    %80 = vector.load %arg1[%c0_62, %c256_63, %c0_64] : memref<2x1024x128xf32, #tpu.memory_space<vmem>>, vector<1x256x128xf32>
    %81 = vector.shape_cast %80 : vector<1x256x128xf32> to vector<256x128xf32>
    %c1_65 = arith.constant 1 : index
    %c256_66 = arith.constant 256 : index
    %c0_67 = arith.constant 0 : index
    %82 = vector.load %arg2[%c1_65, %c256_66, %c0_67] : memref<2x1024x128xf32, #tpu.memory_space<vmem>>, vector<1x256x128xf32>
    %83 = vector.shape_cast %82 : vector<1x256x128xf32> to vector<256x128xf32>
    %84 = arith.mulf %81, %83 : vector<256x128xf32>
    %cst_68 = arith.constant dense<0.000000e+00> : vector<128xf32>
    %85 = vector.multi_reduction <add>, %84, %cst_68 [0] : vector<256x128xf32> to vector<128xf32>
    %86 = vector.shape_cast %85 : vector<128xf32> to vector<1x128xf32>
    %87 = arith.addf %79, %86 : vector<1x128xf32>
    %c0_69 = arith.constant 0 : index
    %c512_70 = arith.constant 512 : index
    %c0_71 = arith.constant 0 : index
    %88 = vector.load %arg1[%c0_69, %c512_70, %c0_71] : memref<2x1024x128xf32, #tpu.memory_space<vmem>>, vector<1x256x128xf32>
    %89 = vector.shape_cast %88 : vector<1x256x128xf32> to vector<256x128xf32>
    %c1_72 = arith.constant 1 : index
    %c512_73 = arith.constant 512 : index
    %c0_74 = arith.constant 0 : index
    %90 = vector.load %arg2[%c1_72, %c512_73, %c0_74] : memref<2x1024x128xf32, #tpu.memory_space<vmem>>, vector<1x256x128xf32>
    %91 = vector.shape_cast %90 : vector<1x256x128xf32> to vector<256x128xf32>
    %92 = arith.mulf %89, %91 : vector<256x128xf32>
    %cst_75 = arith.constant dense<0.000000e+00> : vector<128xf32>
    %93 = vector.multi_reduction <add>, %92, %cst_75 [0] : vector<256x128xf32> to vector<128xf32>
    %94 = vector.shape_cast %93 : vector<128xf32> to vector<1x128xf32>
    %95 = arith.addf %87, %94 : vector<1x128xf32>
    %c0_76 = arith.constant 0 : index
    %c768_77 = arith.constant 768 : index
    %c0_78 = arith.constant 0 : index
    %96 = vector.load %arg1[%c0_76, %c768_77, %c0_78] : memref<2x1024x128xf32, #tpu.memory_space<vmem>>, vector<1x256x128xf32>
    %97 = vector.shape_cast %96 : vector<1x256x128xf32> to vector<256x128xf32>
    %c1_79 = arith.constant 1 : index
    %c768_80 = arith.constant 768 : index
    %c0_81 = arith.constant 0 : index
    %98 = vector.load %arg2[%c1_79, %c768_80, %c0_81] : memref<2x1024x128xf32, #tpu.memory_space<vmem>>, vector<1x256x128xf32>
    %99 = vector.shape_cast %98 : vector<1x256x128xf32> to vector<256x128xf32>
    %100 = arith.mulf %97, %99 : vector<256x128xf32>
    %cst_82 = arith.constant dense<0.000000e+00> : vector<128xf32>
    %101 = vector.multi_reduction <add>, %100, %cst_82 [0] : vector<256x128xf32> to vector<128xf32>
    %102 = vector.shape_cast %101 : vector<128xf32> to vector<1x128xf32>
    %103 = arith.addf %95, %102 : vector<1x128xf32>
    %cst_83 = arith.constant dense<0.000000e+00> : vector<1xf32>
    %104 = vector.multi_reduction <add>, %103, %cst_83 [1] : vector<1x128xf32> to vector<1xf32>
    %105 = vector.shape_cast %104 : vector<1xf32> to vector<1x1xf32>
    %cst_84 = arith.constant 0.000000e+00 : f32
    %106 = vector.broadcast %cst_84 : f32 to vector<1x128xf32>
    %c1_85 = arith.constant 1 : index
    %c0_86 = arith.constant 0 : index
    %c0_87 = arith.constant 0 : index
    %107 = vector.load %arg1[%c1_85, %c0_86, %c0_87] : memref<2x1024x128xf32, #tpu.memory_space<vmem>>, vector<1x256x128xf32>
    %108 = vector.shape_cast %107 : vector<1x256x128xf32> to vector<256x128xf32>
    %c1_88 = arith.constant 1 : index
    %c0_89 = arith.constant 0 : index
    %c0_90 = arith.constant 0 : index
    %109 = vector.load %arg2[%c1_88, %c0_89, %c0_90] : memref<2x1024x128xf32, #tpu.memory_space<vmem>>, vector<1x256x128xf32>
    %110 = vector.shape_cast %109 : vector<1x256x128xf32> to vector<256x128xf32>
    %111 = arith.mulf %108, %110 : vector<256x128xf32>
    %cst_91 = arith.constant dense<0.000000e+00> : vector<128xf32>
    %112 = vector.multi_reduction <add>, %111, %cst_91 [0] : vector<256x128xf32> to vector<128xf32>
    %113 = vector.shape_cast %112 : vector<128xf32> to vector<1x128xf32>
    %114 = arith.addf %106, %113 : vector<1x128xf32>
    %c1_92 = arith.constant 1 : index
    %c256_93 = arith.constant 256 : index
    %c0_94 = arith.constant 0 : index
    %115 = vector.load %arg1[%c1_92, %c256_93, %c0_94] : memref<2x1024x128xf32, #tpu.memory_space<vmem>>, vector<1x256x128xf32>
    %116 = vector.shape_cast %115 : vector<1x256x128xf32> to vector<256x128xf32>
    %c1_95 = arith.constant 1 : index
    %c256_96 = arith.constant 256 : index
    %c0_97 = arith.constant 0 : index
    %117 = vector.load %arg2[%c1_95, %c256_96, %c0_97] : memref<2x1024x128xf32, #tpu.memory_space<vmem>>, vector<1x256x128xf32>
    %118 = vector.shape_cast %117 : vector<1x256x128xf32> to vector<256x128xf32>
    %119 = arith.mulf %116, %118 : vector<256x128xf32>
    %cst_98 = arith.constant dense<0.000000e+00> : vector<128xf32>
    %120 = vector.multi_reduction <add>, %119, %cst_98 [0] : vector<256x128xf32> to vector<128xf32>
    %121 = vector.shape_cast %120 : vector<128xf32> to vector<1x128xf32>
    %122 = arith.addf %114, %121 : vector<1x128xf32>
    %c1_99 = arith.constant 1 : index
    %c512_100 = arith.constant 512 : index
    %c0_101 = arith.constant 0 : index
    %123 = vector.load %arg1[%c1_99, %c512_100, %c0_101] : memref<2x1024x128xf32, #tpu.memory_space<vmem>>, vector<1x256x128xf32>
    %124 = vector.shape_cast %123 : vector<1x256x128xf32> to vector<256x128xf32>
    %c1_102 = arith.constant 1 : index
    %c512_103 = arith.constant 512 : index
    %c0_104 = arith.constant 0 : index
    %125 = vector.load %arg2[%c1_102, %c512_103, %c0_104] : memref<2x1024x128xf32, #tpu.memory_space<vmem>>, vector<1x256x128xf32>
    %126 = vector.shape_cast %125 : vector<1x256x128xf32> to vector<256x128xf32>
    %127 = arith.mulf %124, %126 : vector<256x128xf32>
    %cst_105 = arith.constant dense<0.000000e+00> : vector<128xf32>
    %128 = vector.multi_reduction <add>, %127, %cst_105 [0] : vector<256x128xf32> to vector<128xf32>
    %129 = vector.shape_cast %128 : vector<128xf32> to vector<1x128xf32>
    %130 = arith.addf %122, %129 : vector<1x128xf32>
    %c1_106 = arith.constant 1 : index
    %c768_107 = arith.constant 768 : index
    %c0_108 = arith.constant 0 : index
    %131 = vector.load %arg1[%c1_106, %c768_107, %c0_108] : memref<2x1024x128xf32, #tpu.memory_space<vmem>>, vector<1x256x128xf32>
    %132 = vector.shape_cast %131 : vector<1x256x128xf32> to vector<256x128xf32>
    %c1_109 = arith.constant 1 : index
    %c768_110 = arith.constant 768 : index
    %c0_111 = arith.constant 0 : index
    %133 = vector.load %arg2[%c1_109, %c768_110, %c0_111] : memref<2x1024x128xf32, #tpu.memory_space<vmem>>, vector<1x256x128xf32>
    %134 = vector.shape_cast %133 : vector<1x256x128xf32> to vector<256x128xf32>
    %135 = arith.mulf %132, %134 : vector<256x128xf32>
    %cst_112 = arith.constant dense<0.000000e+00> : vector<128xf32>
    %136 = vector.multi_reduction <add>, %135, %cst_112 [0] : vector<256x128xf32> to vector<128xf32>
    %137 = vector.shape_cast %136 : vector<128xf32> to vector<1x128xf32>
    %138 = arith.addf %130, %137 : vector<1x128xf32>
    %cst_113 = arith.constant dense<0.000000e+00> : vector<1xf32>
    %139 = vector.multi_reduction <add>, %138, %cst_113 [1] : vector<1x128xf32> to vector<1xf32>
    %140 = vector.shape_cast %139 : vector<1xf32> to vector<1x1xf32>
    %141 = tpu.concatenate %105, %140 in 0 : vector<1x1xf32>, vector<1x1xf32> -> vector<2x1xf32>
    %142 = tpu.concatenate %70, %141 in 1 : vector<2x1xf32>, vector<2x1xf32> -> vector<2x2xf32>
    %c0_114 = arith.constant 0 : index
    %c0_115 = arith.constant 0 : index
    %143 = vector.load %arg3[%c0_114, %c0_115] : memref<1x2xf32, #tpu.memory_space<vmem>>, vector<1x2xf32>
    %144 = vector.broadcast %143 : vector<1x2xf32> to vector<2x2xf32>
    %145 = arith.addf %142, %144 : vector<2x2xf32>
    %c0_116 = arith.constant 0 : index
    %c0_117 = arith.constant 0 : index
    %146 = vector.load %arg4[%c0_116, %c0_117] : memref<2x2xf32, #tpu.memory_space<vmem>>, vector<2x2xf32>
    tpu.vector_store %arg4[%c0_116, %c0_117], %145 {strides = array<i32>} : memref<2x2xf32, #tpu.memory_space<vmem>>, vector<2x2xf32>,
    return
  }
  func.func @transform_0(%arg0: i32) -> (i32, i32, i32) {
    %c0_i32 = arith.constant 0 : i32
    %c0_i32_0 = arith.constant 0 : i32
    %c0_i32_1 = arith.constant 0 : i32
    %c0_i32_2 = arith.constant 0 : i32
    return %c0_i32, %c0_i32_0, %c0_i32_1 : i32, i32, i32
  }
  func.func @transform_1(%arg0: i32) -> (i32, i32, i32) {
    %c0_i32 = arith.constant 0 : i32
    %c0_i32_0 = arith.constant 0 : i32
    %c0_i32_1 = arith.constant 0 : i32
    %c0_i32_2 = arith.constant 0 : i32
    return %c0_i32, %c0_i32_0, %c0_i32_1 : i32, i32, i32
  }
  func.func @transform_2(%arg0: i32) -> (i32, i32) {
    %c0_i32 = arith.constant 0 : i32
    %c0_i32_0 = arith.constant 0 : i32
    %c0_i32_1 = arith.constant 0 : i32
    return %c0_i32, %c0_i32_0 : i32, i32
  }
  func.func @transform_3(%arg0: i32) -> (i32, i32) {
    %c0_i32 = arith.constant 0 : i32
    %c0_i32_0 = arith.constant 0 : i32
    %c0_i32_1 = arith.constant 0 : i32
    return %c0_i32, %c0_i32_0 : i32, i32
  }
}

</mosaic_0001>

<bundles_post_ra>
// kernel: tpu_custom_call.1
= control target key start
LH: loop header
LB: loop body
LE: loop exit
PB: predicated region body
PF: predicated region fallthrough
CT: control target
= control target key end

     0   :  { %8 = vsyncpa [#allocation3], 0  ;;  %s3358_s0 = inlined_call_operand.hbm [shape: f32[2,1024,128], index: 0, kind: input, shape index: {}]   ;;  %s3359_s1 = inlined_call_operand.hbm [shape: f32[2,1024,128], index: 1, kind: input, shape index: {}]   ;;  %s3360_s2 = inlined_call_operand.vmem [shape: f32[1,2], index: 2, kind: input, shape index: {}]   ;;  %s3361_s3 = inlined_call_operand.hbm [shape: f32[2,2], index: 3, kind: output, shape index: {}]  }
   0x1   :  { %9 = vsyncpa [#allocation6], 0 }
   0x2   :  { %10 = vsyncpa [#allocation4], 0  ;;  %s2070_s12 = smov [#allocation2]   ;;  %s1998_s16 = scalar_lea.hbm %s3358_s0, 32768 }
   0x3   :  { %s16_s13 = sshll.u32 %s2070_s12, 4  ;;  %p1999_p0 = scmp.ne.s32.totalorder %s3358_s0, %s1998_s16  ;;  %s17_s13 = int_to_ptr.vmem [resolvable:$true] %s16_s13 }
   0x4   :  { %p2002_p1 = scmp.lt.u32.totalorder %s1998_s16, %s3358_s0 }
   0x6   :  { %p2004_p2 = pnand %p2002_p1, %p1999_p0 }
   0x8   :  { %2007 = shalt.err (!%p2004_p2)
}
   0x9   :  { %s2008_s21 = scalar_lea.vmem %s17_s13, 32768  ;;  %p2013_p4 = scmp.lt.s32.totalorder %s17_s13, %s17_s13 }
   0xa   :  { %p2009_p3 = scmp.ne.s32.totalorder %s17_s13, %s2008_s21  ;;  %p2014_p5 = scmp.lt.s32.totalorder %s2008_s21, %s2008_s21 }
   0xc   :  { %p2015_p6 = por %p2014_p5, %p2013_p4 }
   0xe   :  { %p2016_p7 = pnand %p2015_p6, %p2009_p3 }
  0x10   :  { %2019 = shalt.err (!%p2016_p7)
}
  0x11   :  { %s2071_s22 = smov 128   ;;  %s2072_s23 = smov 8  }
  0x12   :  { %22 = dma.hbm_to_vmem [thread:$0]  %s3358_s0, 32768, %s17_s13, [#allocation3], %s2071_s22, %s2071_s22, %s2072_s23  }
  0x13   :  { %s2073_s26 = smov [#allocation5]   ;;  %s2020_s30 = scalar_lea.hbm %s3359_s1, 32768 }
  0x14   :  { %s28_s27 = sshll.u32 %s2073_s26, 4  ;;  %p2021_p8 = scmp.ne.s32.totalorder %s3359_s1, %s2020_s30  ;;  %s29_s27 = int_to_ptr.vmem [resolvable:$true] %s28_s27 }
  0x15   :  { %p2024_p9 = scmp.lt.u32.totalorder %s2020_s30, %s3359_s1 }
  0x17   :  { %p2026_p10 = pnand %p2024_p9, %p2021_p8 }
  0x19   :  { %2029 = shalt.err (!%p2026_p10)
}
  0x1a   :  { %s2030_s8 = scalar_lea.vmem %s29_s27, 32768  ;;  %p2035_p12 = scmp.lt.s32.totalorder %s29_s27, %s29_s27 }
  0x1b   :  { %p2031_p11 = scmp.ne.s32.totalorder %s29_s27, %s2030_s8  ;;  %p2036_p13 = scmp.lt.s32.totalorder %s2030_s8, %s2030_s8 }
  0x1d   :  { %p2037_p0 = por %p2036_p13, %p2035_p12 }
  0x1f   :  { %p2038_p1 = pnand %p2037_p0, %p2031_p11 }
  0x21   :  { %2041 = shalt.err (!%p2038_p1)
}
  0x22   :  { %34 = dma.hbm_to_vmem [thread:$0]  %s3359_s1, 32768, %s29_s27, [#allocation6], %s2071_s22, %s2071_s22, %s2072_s23  }
  0x23   :  { %2064 = dma.done.wait [#allocation3], 32768  }
  0x24   :  { %2065 = vsyncadd [#allocation3], 4294934528 }
  0x25   :  { %2066 = dma.done.wait [#allocation6], 32768  }
  0x26   :  { %2067 = vsyncadd [#allocation6], 4294934528  ;;  %v43_v0 = vld [vmem:[#allocation2] sm:$0xff]  ;;  %v44_v1 = vld [vmem:[#allocation2 + $0x8] sm:$0xff]  ;;  %vm992_vm0 = vcmask 1040384   ;;  %s2074_s1 = smov 1  }
  0x27   :  { %v45_v2 = vld [vmem:[#allocation2 + $0x10] sm:$0xff]  ;;  %v46_v3 = vld [vmem:[#allocation2 + $0x18] sm:$0xff]  ;;  %v2120_v4 = vld [vmem:[#allocation5 + $0x400] sm:$0xff]  ;;  %vm1692_vm1 = vcmask 7168   ;;  %s2075_s12 = smov [#allocation7]   ;;  %vm1702_vm2 = vcmask 9216  }
  0x28   :  { %v2122_v5 = vld [vmem:[#allocation5 + $0x408] sm:$0xff]  ;;  %v2124_v6 = vld [vmem:[#allocation5 + $0x410] sm:$0xff]  ;;  %v2126_v7 = vld [vmem:[#allocation5 + $0x418] sm:$0xff]  ;;  %v1027_v8 = vmul.f32 %v2120_v4, %v43_v0  ;;  %s1710_s13 = sshll.u32 %s2075_s12, 4  ;;  %s1711_s13 = int_to_ptr.vmem [resolvable:$true] %s1710_s13 }
  0x29   :  { %v1028_v9 = vmul.f32 %v2122_v5, %v44_v1  ;;  %v1029_v10 = vmul.f32 %v2124_v6, %v45_v2  ;;  %v47_v11 = vld [vmem:[#allocation2 + $0x20] sm:$0xff]  ;;  %v1030_v13 = vmul.f32 %v2126_v7, %v46_v3  ;;  %v48_v15 = vld [vmem:[#allocation2 + $0x28] sm:$0xff]  ;;  %v49_v19 = vld [vmem:[#allocation2 + $0x30] sm:$0xff]  ;;  %s2042_s14 = scalar_lea.vmem %s1711_s13, 32  ;;  %p2047_p3 = scmp.lt.s32.totalorder %s1711_s13, %s1711_s13 }
  0x2a   :  { %v2131_v12 = vld [vmem:[#allocation5 + $0x420] sm:$0xff]  ;;  %v2134_v16 = vld [vmem:[#allocation5 + $0x428] sm:$0xff]  ;;  %v2137_v20 = vld [vmem:[#allocation5 + $0x430] sm:$0xff]  ;;  %p2043_p2 = scmp.ne.s32.totalorder %s1711_s13, %s2042_s14  ;;  %p2048_p4 = scmp.lt.s32.totalorder %s2042_s14, %s2042_s14 }
  0x2b   :  { %v1059_v14 = vadd.f32 %v1028_v9, %v1027_v8  ;;  %v1031_v17 = vmul.f32 %v2131_v12, %v47_v11  ;;  %v50_v21 = vld [vmem:[#allocation2 + $0x38] sm:$0xff]  ;;  %v1032_v22 = vmul.f32 %v2134_v16, %v48_v15  ;;  %v177_v24 = vld [vmem:[#allocation2 + $0x100] sm:$0xff]  ;;  %v178_v25 = vld [vmem:[#allocation2 + $0x108] sm:$0xff]  ;;  %v1033_v29 = vmul.f32 %v2137_v20, %v49_v19 }
  0x2c   :  { %v2140_v26 = vld [vmem:[#allocation5 + $0x438] sm:$0xff]  ;;  %v51_v27 = vld [vmem:[#allocation2 + $0x40] sm:$0xff]  ;;  %v179_v28 = vld [vmem:[#allocation2 + $0x110] sm:$0xff]  ;;  %p2049_p5 = por %p2048_p4, %p2047_p3 }
  0x2d   :  { %v1060_v18 = vadd.f32 %v1059_v14, %v1029_v10  ;;  %v2143_v31 = vld [vmem:[#allocation5 + $0x440] sm:$0xff]  ;;  %v2147_v33 = vld [vmem:[#allocation5 + $0x508] sm:$0xff]  ;;  %v180_v34 = vld [vmem:[#allocation2 + $0x118] sm:$0xff]  ;;  %v1034_v35 = vmul.f32 %v2140_v26, %v50_v21 }
  0x2e   :  { %3536 = vst [vmem:[#allocation11_spill] sm:$0xff] %v2143_v31  ;;  %v2145_v32 = vld [vmem:[#allocation5 + $0x500] sm:$0xff]  ;;  %3538 = vst [vmem:[#allocation13_spill] sm:$0xff] %v2147_v33  ;;  %v2150_v37 = vld [vmem:[#allocation5 + $0x510] sm:$0xff]  ;;  %v1130_v40 = vmul.f32 %v2147_v33, %v178_v25  ;;  %v1035_v45 = vmul.f32 %v2143_v31, %v51_v27  ;;  %p2050_p6 = pnand %p2049_p5, %p2043_p2 }
  0x2f   :  { %v1061_v23 = vadd.f32 %v1060_v18, %v1030_v13  ;;  %3537 = vst [vmem:[#allocation12_spill] sm:$0xff] %v2145_v32  ;;  %3539 = vst [vmem:[#allocation14_spill] sm:$0xff] %v2150_v37  ;;  %v2152_v38 = vld [vmem:[#allocation5 + $0x518] sm:$0xff]  ;;  %v1129_v39 = vmul.f32 %v2145_v32, %v177_v24  ;;  %v52_v41 = vld [vmem:[#allocation2 + $0x48] sm:$0xff]  ;;  %v1131_v43 = vmul.f32 %v2150_v37, %v179_v28 }
  0x30   :  { %3540 = vst [vmem:[#allocation15_spill] sm:$0xff] %v2152_v38  ;;  %v2156_v42 = vld [vmem:[#allocation5 + $0x448] sm:$0xff]  ;;  %v181_v44 = vld [vmem:[#allocation2 + $0x120] sm:$0xff]  ;;  %v53_v48 = vld [vmem:[#allocation2 + $0x50] sm:$0xff]  ;;  %v1132_v50 = vmul.f32 %v2152_v38, %v180_v34 }
  0x31   :  { %v1062_v30 = vadd.f32 %v1061_v23, %v1031_v17  ;;  %3541 = vst [vmem:[#allocation16_spill] sm:$0xff] %v2156_v42  ;;  %v2160_v47 = vld [vmem:[#allocation5 + $0x520] sm:$0xff]  ;;  %v2162_v49 = vld [vmem:[#allocation5 + $0x450] sm:$0xff]  ;;  %v1161_v51 = vadd.f32 %v1130_v40, %v1129_v39  ;;  %v182_v52 = vld [vmem:[#allocation2 + $0x128] sm:$0xff]  ;;  %v1036_v53 = vmul.f32 %v2156_v42, %v52_v41 }
  0x32   :  { %3542 = vst [vmem:[#allocation17_spill] sm:$0xff] %v2160_v47  ;;  %3543 = vst [vmem:[#allocation18_spill] sm:$0xff] %v2162_v49  ;;  %v2166_v55 = vld [vmem:[#allocation5 + $0x528] sm:$0xff]  ;;  %v54_v56 = vld [vmem:[#allocation2 + $0x58] sm:$0xff]  ;;  %v1133_v58 = vmul.f32 %v2160_v47, %v181_v44  ;;  %v1037_v61 = vmul.f32 %v2162_v49, %v53_v48 }
  0x33   :  { %v1063_v36 = vadd.f32 %v1062_v30, %v1032_v22  ;;  %3544 = vst [vmem:[#allocation19_spill] sm:$0xff] %v2166_v55  ;;  %v2168_v57 = vld [vmem:[#allocation5 + $0x458] sm:$0xff]  ;;  %v1162_v59 = vadd.f32 %v1161_v51, %v1131_v43  ;;  %v183_v60 = vld [vmem:[#allocation2 + $0x130] sm:$0xff]  ;;  %v55_v0 = vld [vmem:[#allocation2 + $0x60] sm:$0xff]  ;;  %v1134_v2 = vmul.f32 %v2166_v55, %v182_v52 }
  0x34   :  { %3545 = vst [vmem:[#allocation20_spill] sm:$0xff] %v2168_v57  ;;  %v2172_v63 = vld [vmem:[#allocation5 + $0x530] sm:$0xff]  ;;  %v2174_v1 = vld [vmem:[#allocation5 + $0x460] sm:$0xff]  ;;  %v184_v8 = vld [vmem:[#allocation2 + $0x138] sm:$0xff]  ;;  %v1038_v9 = vmul.f32 %v2168_v57, %v54_v56 }
  0x35   :  { %v1064_v46 = vadd.f32 %v1063_v36, %v1033_v29  ;;  %3546 = vst [vmem:[#allocation21_spill] sm:$0xff] %v2172_v63  ;;  %3547 = vst [vmem:[#allocation22_spill] sm:$0xff] %v2174_v1  ;;  %v1163_v3 = vadd.f32 %v1162_v59, %v1132_v50  ;;  %v2178_v11 = vld [vmem:[#allocation5 + $0x538] sm:$0xff]  ;;  %v56_v13 = vld [vmem:[#allocation2 + $0x68] sm:$0xff]  ;;  %v1135_v15 = vmul.f32 %v2172_v63, %v183_v60 }
  0x36   :  { %3548 = vst [vmem:[#allocation23_spill] sm:$0xff] %v2178_v11  ;;  %v2180_v14 = vld [vmem:[#allocation5 + $0x468] sm:$0xff]  ;;  %v185_v18 = vld [vmem:[#allocation2 + $0x140] sm:$0xff]  ;;  %v1039_v19 = vmul.f32 %v2174_v1, %v55_v0  ;;  %v57_v23 = vld [vmem:[#allocation2 + $0x70] sm:$0xff]  ;;  %v1136_v27 = vmul.f32 %v2178_v11, %v184_v8 }
  0x37   :  { %v1065_v54 = vadd.f32 %v1064_v46, %v1034_v35  ;;  %3549 = vst [vmem:[#allocation24_spill] sm:$0xff] %v2180_v14  ;;  %v1164_v17 = vadd.f32 %v1163_v3, %v1133_v58  ;;  %v2184_v22 = vld [vmem:[#allocation5 + $0x540] sm:$0xff]  ;;  %v58_v24 = vld [vmem:[#allocation2 + $0x78] sm:$0xff]  ;;  %v2186_v25 = vld [vmem:[#allocation5 + $0x470] sm:$0xff]  ;;  %v1040_v34 = vmul.f32 %v2180_v14, %v56_v13 }
  0x38   :  { %3550 = vst [vmem:[#allocation25_spill] sm:$0xff] %v2184_v22  ;;  %3551 = vst [vmem:[#allocation26_spill] sm:$0xff] %v2186_v25  ;;  %v186_v29 = vld [vmem:[#allocation2 + $0x148] sm:$0xff]  ;;  %v187_v30 = vld [vmem:[#allocation2 + $0x150] sm:$0xff]  ;;  %v1137_v44 = vmul.f32 %v2184_v22, %v185_v18  ;;  %v1041_v48 = vmul.f32 %v2186_v25, %v57_v23 }
  0x39   :  { %v1066_v62 = vadd.f32 %v1065_v54, %v1035_v45  ;;  %v1165_v28 = vadd.f32 %v1164_v17, %v1134_v2  ;;  %v1106_v36 = vld [vmem:[#allocation5 + $0x548] sm:$0xff]  ;;  %v59_v39 = vld [vmem:[#allocation2 + $0x80] sm:$0xff]  ;;  %v2190_v43 = vld [vmem:[#allocation5 + $0x478] sm:$0xff] }
  0x3a   :  { %v311_v40 = vld [vmem:[#allocation2 + $0x200] sm:$0xff]  ;;  %v312_v41 = vld [vmem:[#allocation2 + $0x208] sm:$0xff]  ;;  %3552 = vst [vmem:[#allocation27_spill] sm:$0xff] %v2190_v43  ;;  %v1107_v51 = vld [vmem:[#allocation5 + $0x550] sm:$0xff] }
  0x3b   :  { %v1067_v10 = vadd.f32 %v1066_v62, %v1036_v53  ;;  %v1166_v45 = vadd.f32 %v1165_v28, %v1135_v15  ;;  %v60_v46 = vld [vmem:[#allocation2 + $0x88] sm:$0xff]  ;;  %v1199_v52 = vld [vmem:[#allocation5 + $0x600] sm:$0xff]  ;;  %v61_v54 = vld [vmem:[#allocation2 + $0x90] sm:$0xff]  ;;  %v1138_v62 = vmul.f32 %v1106_v36, %v186_v29 }
  0x3c   :  { %v1200_v53 = vld [vmem:[#allocation5 + $0x608] sm:$0xff]  ;;  %v62_v56 = vld [vmem:[#allocation2 + $0x98] sm:$0xff]  ;;  %v63_v58 = vld [vmem:[#allocation2 + $0xa0] sm:$0xff] }
  0x3d   :  { %v1068_v21 = vadd.f32 %v1067_v10, %v1037_v61  ;;  %v188_v59 = vld [vmem:[#allocation2 + $0x158] sm:$0xff]  ;;  %v313_v60 = vld [vmem:[#allocation2 + $0x210] sm:$0xff]  ;;  %v2194_v61 = vld [vmem:[#allocation5 + $0x480] sm:$0xff]  ;;  %v1167_v0 = vadd.f32 %v1166_v45, %v1136_v27  ;;  %v1139_v27 = vmul.f32 %v1107_v51, %v187_v30  ;;  %v1232_v36 = vmul.f32 %v1200_v53, %v312_v41 }
  0x3e   :  { %3553 = vst [vmem:[#allocation28_spill] sm:$0xff] %v2194_v61  ;;  %v189_v2 = vld [vmem:[#allocation2 + $0x160] sm:$0xff]  ;;  %v314_v3 = vld [vmem:[#allocation2 + $0x218] sm:$0xff]  ;;  %v2196_v8 = vld [vmem:[#allocation5 + $0x488] sm:$0xff] }
  0x3f   :  { %v1069_v35 = vadd.f32 %v1068_v21, %v1038_v9  ;;  %3554 = vst [vmem:[#allocation29_spill] sm:$0xff] %v2196_v8  ;;  %v1042_v9 = vmul.f32 %v2190_v43, %v58_v24  ;;  %v2199_v13 = vld [vmem:[#allocation5 + $0x558] sm:$0xff]  ;;  %v1201_v15 = vld [vmem:[#allocation5 + $0x610] sm:$0xff]  ;;  %v64_v17 = vld [vmem:[#allocation2 + $0xa8] sm:$0xff]  ;;  %v1168_v29 = vadd.f32 %v1167_v0, %v1137_v44  ;;  %v1043_v24 = vmul.f32 %v2194_v61, %v59_v39 }
  0x40   :  { %3555 = vst [vmem:[#allocation30_spill] sm:$0xff] %v2199_v13  ;;  %v65_v18 = vld [vmem:[#allocation2 + $0xb0] sm:$0xff]  ;;  %v2203_v23 = vld [vmem:[#allocation5 + $0x498] sm:$0xff]  ;;  %v2205_v28 = vld [vmem:[#allocation5 + $0x4a0] sm:$0xff]  ;;  %v1140_v41 = vmul.f32 %v2199_v13, %v188_v59  ;;  %v1233_v39 = vmul.f32 %v1201_v15, %v313_v60 }
  0x41   :  { %v1070_v50 = vadd.f32 %v1069_v35, %v1039_v19  ;;  %v66_v19 = vld [vmem:[#allocation2 + $0xb8] sm:$0xff]  ;;  %v2201_v21 = vld [vmem:[#allocation5 + $0x490] sm:$0xff]  ;;  %3557 = vst [vmem:[#allocation32_spill] sm:$0xff] %v2203_v23  ;;  %3558 = vst [vmem:[#allocation33_spill] sm:$0xff] %v2205_v28  ;;  %v1231_v35 = vmul.f32 %v1199_v52, %v311_v40  ;;  %v1044_v40 = vmul.f32 %v2196_v8, %v60_v46 }
  0x42   :  { %3556 = vst [vmem:[#allocation31_spill] sm:$0xff] %v2201_v21  ;;  %v190_v45 = vld [vmem:[#allocation2 + $0x168] sm:$0xff]  ;;  %v315_v22 = vld [vmem:[#allocation2 + $0x220] sm:$0xff]  ;;  %v2210_v11 = vld [vmem:[#allocation5 + $0x618] sm:$0xff]  ;;  %v1169_v44 = vadd.f32 %v1168_v29, %v1138_v62  ;;  %v1045_v52 = vmul.f32 %v2201_v21, %v61_v54  ;;  %v2222_v53 = vmul.f32 %v2203_v23, %v62_v56  ;;  %v2225_v0 = vmul.f32 %v2205_v28, %v63_v58 }
  0x43   :  { %v1071_v10 = vadd.f32 %v1070_v50, %v1040_v34  ;;  %v2208_v50 = vld [vmem:[#allocation5 + $0x560] sm:$0xff]  ;;  %3560 = vst [vmem:[#allocation35_spill] sm:$0xff] %v2210_v11  ;;  %v68_v55 = vld [vmem:[#allocation2 + $0xc8] sm:$0xff]  ;;  %v69_v43 = vld [vmem:[#allocation2 + $0xd0] sm:$0xff]  ;;  %v1234_v58 = vmul.f32 %v2210_v11, %v314_v3  ;;  %v1263_v29 = vadd.f32 %v1232_v36, %v1231_v35 }
  0x44   :  { %3559 = vst [vmem:[#allocation34_spill] sm:$0xff] %v2208_v50  ;;  %v67_v63 = vld [vmem:[#allocation2 + $0xc0] sm:$0xff]  ;;  %v2212_v25 = vld [vmem:[#allocation5 + $0x4a8] sm:$0xff]  ;;  %v2214_v47 = vld [vmem:[#allocation5 + $0x4b0] sm:$0xff]  ;;  %v1141_v54 = vmul.f32 %v2208_v50, %v189_v2  ;;  %v1170_v56 = vadd.f32 %v1169_v44, %v1139_v27 }
  0x45   :  { %v1072_v34 = vadd.f32 %v1071_v10, %v1041_v48  ;;  %3561 = vst [vmem:[#allocation36_spill] sm:$0xff] %v2212_v25  ;;  %3562 = vst [vmem:[#allocation37_spill] sm:$0xff] %v2214_v47  ;;  %v2216_v30 = vld [vmem:[#allocation5 + $0x4b8] sm:$0xff]  ;;  %v191_v48 = vld [vmem:[#allocation2 + $0x170] sm:$0xff]  ;;  %v2240_v13 = vmul.f32 %v2212_v25, %v64_v17  ;;  %v2243_v28 = vmul.f32 %v2214_v47, %v65_v18 }
  0x46   :  { %3563 = vst [vmem:[#allocation38_spill] sm:$0xff] %v2216_v30  ;;  %v316_v51 = vld [vmem:[#allocation2 + $0x228] sm:$0xff]  ;;  %v2229_v14 = vld [vmem:[#allocation5 + $0x620] sm:$0xff]  ;;  %v70_v46 = vld [vmem:[#allocation2 + $0xd8] sm:$0xff]  ;;  %v2246_v23 = vmul.f32 %v2216_v30, %v66_v19  ;;  %v1171_v44 = vadd.f32 %v1170_v56, %v1140_v41  ;;  %v1264_v11 = vadd.f32 %v1263_v29, %v1233_v39 }
  0x47   :  { %v1073_v10 = vadd.f32 %v1072_v34, %v1042_v9  ;;  %v2227_v61 = vld [vmem:[#allocation5 + $0x568] sm:$0xff]  ;;  %3565 = vst [vmem:[#allocation40_spill] sm:$0xff] %v2229_v14  ;;  %v71_v8 = vld [vmem:[#allocation2 + $0xe0] sm:$0xff]  ;;  %v2235_v15 = vld [vmem:[#allocation5 + $0x4d0] sm:$0xff]  ;;  %v1235_v19 = vmul.f32 %v2229_v14, %v315_v22 }
  0x48   :  { %3564 = vst [vmem:[#allocation39_spill] sm:$0xff] %v2227_v61  ;;  %v72_v59 = vld [vmem:[#allocation2 + $0xe8] sm:$0xff]  ;;  %v2231_v62 = vld [vmem:[#allocation5 + $0x4c0] sm:$0xff]  ;;  %3568 = vst [vmem:[#allocation43_spill] sm:$0xff] %v2235_v15  ;;  %v1142_v18 = vmul.f32 %v2227_v61, %v190_v45  ;;  %v2267_v47 = vmul.f32 %v2235_v15, %v69_v43  ;;  %v1172_v29 = vadd.f32 %v1171_v44, %v1141_v54 }
  0x49   :  { %3566 = vst [vmem:[#allocation41_spill] sm:$0xff] %v2231_v62  ;;  %v2233_v60 = vld [vmem:[#allocation5 + $0x4c8] sm:$0xff]  ;;  %v192_v9 = vld [vmem:[#allocation2 + $0x178] sm:$0xff]  ;;  %v317_v34 = vld [vmem:[#allocation2 + $0x230] sm:$0xff]  ;;  %v1074_v21 = vadd.f32 %v1073_v10, %v1043_v24  ;;  %v2261_v50 = vmul.f32 %v2231_v62, %v67_v63  ;;  %v1265_v14 = vadd.f32 %v1264_v11, %v1234_v58 }
  0x4a   :  { %3567 = vst [vmem:[#allocation42_spill] sm:$0xff] %v2233_v60  ;;  %v2248_v38 = vld [vmem:[#allocation5 + $0x570] sm:$0xff]  ;;  %v2250_v1 = vld [vmem:[#allocation5 + $0x628] sm:$0xff]  ;;  %v74_v27 = vld [vmem:[#allocation2 + $0xf8] sm:$0xff]  ;;  %v2264_v30 = vmul.f32 %v2233_v60, %v68_v55  ;;  %v1173_v44 = vadd.f32 %v1172_v29, %v1142_v18 }
  0x4b   :  { %3569 = vst [vmem:[#allocation44_spill] sm:$0xff] %v2248_v38  ;;  %3570 = vst [vmem:[#allocation45_spill] sm:$0xff] %v2250_v1  ;;  %v73_v2 = vld [vmem:[#allocation2 + $0xf0] sm:$0xff]  ;;  %v193_v3 = vld [vmem:[#allocation2 + $0x180] sm:$0xff]  ;;  %v1075_v25 = vadd.f32 %v1074_v21, %v1044_v40  ;;  %v1143_v63 = vmul.f32 %v2248_v38, %v191_v48  ;;  %v1236_v55 = vmul.f32 %v2250_v1, %v316_v51 }
  0x4c   :  { %v2252_v35 = vld [vmem:[#allocation5 + $0x4d8] sm:$0xff]  ;;  %v2254_v36 = vld [vmem:[#allocation5 + $0x4e0] sm:$0xff]  ;;  %v2256_v17 = vld [vmem:[#allocation5 + $0x4e8] sm:$0xff]  ;;  %v1266_v1 = vadd.f32 %v1265_v14, %v1235_v19 }
  0x4d   :  { %3571 = vst [vmem:[#allocation46_spill] sm:$0xff] %v2252_v35  ;;  %3572 = vst [vmem:[#allocation47_spill] sm:$0xff] %v2254_v36  ;;  %v194_v24 = vld [vmem:[#allocation2 + $0x188] sm:$0xff]  ;;  %v318_v10 = vld [vmem:[#allocation2 + $0x238] sm:$0xff]  ;;  %v2280_v40 = vmul.f32 %v2252_v35, %v70_v46  ;;  %v2283_v15 = vmul.f32 %v2254_v36, %v71_v8  ;;  %v2286_v60 = vmul.f32 %v2256_v17, %v72_v59 }
  0x4e   :  { %3573 = vst [vmem:[#allocation48_spill] sm:$0xff] %v2256_v17  ;;  %v2269_v37 = vld [vmem:[#allocation5 + $0x578] sm:$0xff]  ;;  %v2271_v57 = vld [vmem:[#allocation5 + $0x630] sm:$0xff]  ;;  %v445_v41 = vld [vmem:[#allocation2 + $0x300] sm:$0xff]  ;;  %v1076_v62 = vadd.f32 %v1075_v25, %v1045_v52 }
  0x4f   :  { %3574 = vst [vmem:[#allocation49_spill] sm:$0xff] %v2269_v37  ;;  %3575 = vst [vmem:[#allocation50_spill] sm:$0xff] %v2271_v57  ;;  %v195_v45 = vld [vmem:[#allocation2 + $0x190] sm:$0xff]  ;;  %v1026_v39 = vld [vmem:[#allocation5 + $0x4f8] sm:$0xff]  ;;  %v1144_v58 = vmul.f32 %v2269_v37, %v192_v9  ;;  %v1237_v46 = vmul.f32 %v2271_v57, %v317_v34 }
  0x50   :  { %v2273_v22 = vld [vmem:[#allocation5 + $0x4f0] sm:$0xff]  ;;  %v2275_v56 = vld [vmem:[#allocation5 + $0x580] sm:$0xff]  ;;  %v196_v43 = vld [vmem:[#allocation2 + $0x198] sm:$0xff]  ;;  %3578 = vst [vmem:[#allocation53_spill] sm:$0xff] %v2286_v60  ;;  %v2303_v38 = vmul.f32 %v1026_v39, %v74_v27  ;;  %v1077_v35 = vadd.f32 %v1076_v62, %v2222_v53  ;;  %v1267_v39 = vadd.f32 %v1266_v1, %v1236_v55 }
  0x51   :  { %3576 = vst [vmem:[#allocation51_spill] sm:$0xff] %v2273_v22  ;;  %3577 = vst [vmem:[#allocation52_spill] sm:$0xff] %v2275_v56  ;;  %v319_v61 = vld [vmem:[#allocation2 + $0x240] sm:$0xff]  ;;  %v446_v21 = vld [vmem:[#allocation2 + $0x308] sm:$0xff]  ;;  %v2301_v17 = vmul.f32 %v2273_v22, %v73_v2  ;;  %v1145_v9 = vmul.f32 %v2275_v56, %v193_v3  ;;  %v1174_v2 = vadd.f32 %v1173_v44, %v1143_v63 }
  0x52   :  { %v2288_v33 = vld [vmem:[#allocation5 + $0x588] sm:$0xff]  ;;  %v2290_v48 = vld [vmem:[#allocation5 + $0x638] sm:$0xff]  ;;  %v197_v54 = vld [vmem:[#allocation2 + $0x1a0] sm:$0xff]  ;;  %3585 = vst [vmem:[#allocation60_spill] sm:$0xff] %v2303_v38  ;;  %v1078_v3 = vadd.f32 %v1077_v35, %v2225_v0  ;;  %v1268_v35 = vadd.f32 %v1267_v39, %v1237_v46 }
  0x53   :  { %3579 = vst [vmem:[#allocation54_spill] sm:$0xff] %v2288_v33  ;;  %3580 = vst [vmem:[#allocation55_spill] sm:$0xff] %v2290_v48  ;;  %v198_v51 = vld [vmem:[#allocation2 + $0x1a8] sm:$0xff]  ;;  %v2292_v11 = vld [vmem:[#allocation5 + $0x590] sm:$0xff]  ;;  %v1146_v57 = vmul.f32 %v2288_v33, %v194_v24  ;;  %v1238_v27 = vmul.f32 %v2290_v48, %v318_v10  ;;  %v1175_v33 = vadd.f32 %v1174_v2, %v1144_v58 }
  0x54   :  { %3581 = vst [vmem:[#allocation56_spill] sm:$0xff] %v2292_v11  ;;  %v2296_v8 = vld [vmem:[#allocation5 + $0x700] sm:$0xff]  ;;  %v2298_v36 = vld [vmem:[#allocation5 + $0x708] sm:$0xff]  ;;  %v199_v59 = vld [vmem:[#allocation2 + $0x1b0] sm:$0xff]  ;;  %v1147_v37 = vmul.f32 %v2292_v11, %v195_v45 }
  0x55   :  { %3582 = vst [vmem:[#allocation57_spill] sm:$0xff] %v2296_v8  ;;  %3583 = vst [vmem:[#allocation58_spill] sm:$0xff] %v2298_v36  ;;  %v320_v25 = vld [vmem:[#allocation2 + $0x248] sm:$0xff]  ;;  %v447_v52 = vld [vmem:[#allocation2 + $0x310] sm:$0xff]  ;;  %v1334_v24 = vmul.f32 %v2298_v36, %v446_v21 }
  0x56   :  { %3584 = vst [vmem:[#allocation59_spill] sm:$0xff] %v2301_v17  ;;  %v2306_v32 = vld [vmem:[#allocation5 + $0x598] sm:$0xff]  ;;  %v2309_v34 = vld [vmem:[#allocation5 + $0x640] sm:$0xff]  ;;  %v2313_v29 = vld [vmem:[#allocation5 + $0x5a8] sm:$0xff]  ;;  %v1333_v17 = vmul.f32 %v2296_v8, %v445_v41  ;;  %v1079_v41 = vadd.f32 %v1078_v3, %v2240_v13  ;;  %v1269_v3 = vadd.f32 %v1268_v35, %v1238_v27 }
  0x57   :  { %3586 = vst [vmem:[#allocation61_spill] sm:$0xff] %v2306_v32  ;;  %3587 = vst [vmem:[#allocation62_spill] sm:$0xff] %v2309_v34  ;;  %v200_v14 = vld [vmem:[#allocation2 + $0x1b8] sm:$0xff]  ;;  %v201_v18 = vld [vmem:[#allocation2 + $0x1c0] sm:$0xff]  ;;  %v2330_v55 = vmul.f32 %v2306_v32, %v196_v43  ;;  %v1239_v0 = vmul.f32 %v2309_v34, %v319_v61  ;;  %v2340_v36 = vmul.f32 %v2313_v29, %v198_v51 }
  0x58   :  { %v2311_v19 = vld [vmem:[#allocation5 + $0x5a0] sm:$0xff]  ;;  %3589 = vst [vmem:[#allocation64_spill] sm:$0xff] %v2313_v29  ;;  %v2317_v22 = vld [vmem:[#allocation5 + $0x710] sm:$0xff]  ;;  %v448_v62 = vld [vmem:[#allocation2 + $0x318] sm:$0xff]  ;;  %v1176_v32 = vadd.f32 %v1175_v33, %v1145_v9 }
  0x59   :  { %3588 = vst [vmem:[#allocation63_spill] sm:$0xff] %v2311_v19  ;;  %3590 = vst [vmem:[#allocation65_spill] sm:$0xff] %v2317_v22  ;;  %v321_v53 = vld [vmem:[#allocation2 + $0x250] sm:$0xff]  ;;  %v2323_v38 = vld [vmem:[#allocation5 + $0x648] sm:$0xff]  ;;  %v2337_v21 = vmul.f32 %v2311_v19, %v197_v54  ;;  %v1335_v43 = vmul.f32 %v2317_v22, %v447_v52 }
  0x5a   :  { %v2320_v56 = vld [vmem:[#allocation5 + $0x5b0] sm:$0xff]  ;;  %3592 = vst [vmem:[#allocation67_spill] sm:$0xff] %v2323_v38  ;;  %v202_v63 = vld [vmem:[#allocation2 + $0x1c8] sm:$0xff]  ;;  %v2327_v10 = vld [vmem:[#allocation5 + $0x5b8] sm:$0xff]  ;;  %v1240_v13 = vmul.f32 %v2323_v38, %v320_v25  ;;  %v1080_v25 = vadd.f32 %v1079_v41, %v2243_v28  ;;  %v1177_v35 = vadd.f32 %v1176_v32, %v1146_v57 }
  0x5b   :  { %3591 = vst [vmem:[#allocation66_spill] sm:$0xff] %v2320_v56  ;;  %v203_v44 = vld [vmem:[#allocation2 + $0x1d0] sm:$0xff]  ;;  %3593 = vst [vmem:[#allocation68_spill] sm:$0xff] %v2327_v10  ;;  %v1121_v1 = vld [vmem:[#allocation5 + $0x5c0] sm:$0xff]  ;;  %v2346_v39 = vmul.f32 %v2320_v56, %v199_v59  ;;  %v2352_v34 = vmul.f32 %v2327_v10, %v200_v14  ;;  %v1365_v59 = vadd.f32 %v1334_v24, %v1333_v17 }
  0x5c   :  { %v2333_v48 = vld [vmem:[#allocation5 + $0x718] sm:$0xff]  ;;  %v449_v49 = vld [vmem:[#allocation2 + $0x320] sm:$0xff]  ;;  %v2342_v8 = vld [vmem:[#allocation5 + $0x650] sm:$0xff]  ;;  %v2354_v52 = vmul.f32 %v1121_v1, %v201_v18  ;;  %v1270_v14 = vadd.f32 %v1269_v3, %v1239_v0  ;;  %v1178_v0 = vadd.f32 %v1177_v35, %v1147_v37 }
  0x5d   :  { %3594 = vst [vmem:[#allocation69_spill] sm:$0xff] %v2333_v48  ;;  %v204_v45 = vld [vmem:[#allocation2 + $0x1d8] sm:$0xff]  ;;  %3595 = vst [vmem:[#allocation70_spill] sm:$0xff] %v2342_v8  ;;  %v205_v58 = vld [vmem:[#allocation2 + $0x1e0] sm:$0xff]  ;;  %v1336_v42 = vmul.f32 %v2333_v48, %v448_v62  ;;  %v1241_v38 = vmul.f32 %v2342_v8, %v321_v53  ;;  %v1366_v24 = vadd.f32 %v1365_v59, %v1335_v43 }
  0x5e   :  { %v322_v11 = vld [vmem:[#allocation2 + $0x258] sm:$0xff]  ;;  %v206_v61 = vld [vmem:[#allocation2 + $0x1e8] sm:$0xff]  ;;  %v1123_v2 = vld [vmem:[#allocation5 + $0x5d0] sm:$0xff]  ;;  %v1179_v35 = vadd.f32 %v1178_v0, %v2330_v55 }
  0x5f   :  { %v1122_v46 = vld [vmem:[#allocation5 + $0x5c8] sm:$0xff]  ;;  %v2349_v54 = vld [vmem:[#allocation5 + $0x720] sm:$0xff]  ;;  %v1124_v29 = vld [vmem:[#allocation5 + $0x5d8] sm:$0xff]  ;;  %v2369_v17 = vmul.f32 %v1123_v2, %v203_v44  ;;  %v1367_v37 = vadd.f32 %v1366_v24, %v1336_v42 }
  0x60   :  { %3596 = vst [vmem:[#allocation71_spill] sm:$0xff] %v2349_v54  ;;  %v323_v19 = vld [vmem:[#allocation2 + $0x260] sm:$0xff]  ;;  %v450_v51 = vld [vmem:[#allocation2 + $0x328] sm:$0xff]  ;;  %v2356_v22 = vld [vmem:[#allocation5 + $0x658] sm:$0xff]  ;;  %v2367_v31 = vmul.f32 %v1122_v46, %v202_v63  ;;  %v1337_v28 = vmul.f32 %v2349_v54, %v449_v49  ;;  %v2378_v53 = vmul.f32 %v1124_v29, %v204_v45  ;;  %v1271_v63 = vadd.f32 %v1270_v14, %v1240_v13 }
  0x61   :  { %3597 = vst [vmem:[#allocation72_spill] sm:$0xff] %v2356_v22  ;;  %v207_v56 = vld [vmem:[#allocation2 + $0x1f0] sm:$0xff]  ;;  %v208_v33 = vld [vmem:[#allocation2 + $0x1f8] sm:$0xff]  ;;  %v2360_v9 = vld [vmem:[#allocation5 + $0x5e0] sm:$0xff]  ;;  %v1242_v3 = vmul.f32 %v2356_v22, %v322_v11  ;;  %v1081_v13 = vadd.f32 %v1080_v25, %v2246_v23 }
  0x62   :  { %3598 = vst [vmem:[#allocation73_spill] sm:$0xff] %v2360_v9  ;;  %v2362_v27 = vld [vmem:[#allocation5 + $0x5e8] sm:$0xff]  ;;  %v325_v1 = vld [vmem:[#allocation2 + $0x270] sm:$0xff]  ;;  %v2371_v62 = vld [vmem:[#allocation5 + $0x660] sm:$0xff]  ;;  %v2384_v8 = vmul.f32 %v2360_v9, %v205_v58  ;;  %v1368_v25 = vadd.f32 %v1367_v37, %v1337_v28 }
  0x63   :  { %3599 = vst [vmem:[#allocation74_spill] sm:$0xff] %v2362_v27  ;;  %v2365_v10 = vld [vmem:[#allocation5 + $0x728] sm:$0xff]  ;;  %v451_v60 = vld [vmem:[#allocation2 + $0x330] sm:$0xff]  ;;  %3601 = vst [vmem:[#allocation76_spill] sm:$0xff] %v2371_v62  ;;  %v2387_v49 = vmul.f32 %v2362_v27, %v206_v61  ;;  %v1243_v61 = vmul.f32 %v2371_v62, %v323_v19  ;;  %v1272_v27 = vadd.f32 %v1271_v63, %v1241_v38 }
  0x64   :  { %3600 = vst [vmem:[#allocation75_spill] sm:$0xff] %v2365_v10  ;;  %v324_v18 = vld [vmem:[#allocation2 + $0x268] sm:$0xff]  ;;  %v326_v41 = vld [vmem:[#allocation2 + $0x278] sm:$0xff]  ;;  %v327_v48 = vld [vmem:[#allocation2 + $0x280] sm:$0xff]  ;;  %v1338_v29 = vmul.f32 %v2365_v10, %v450_v51  ;;  %v1180_v19 = vadd.f32 %v1179_v35, %v2337_v21 }
  0x65   :  { %v2374_v32 = vld [vmem:[#allocation5 + $0x5f0] sm:$0xff]  ;;  %v2376_v57 = vld [vmem:[#allocation5 + $0x5f8] sm:$0xff]  ;;  %v328_v44 = vld [vmem:[#allocation2 + $0x288] sm:$0xff]  ;;  %3605 = vst [vmem:[#allocation80_spill] sm:$0xff] %v2387_v49 }
  0x66   :  { %3602 = vst [vmem:[#allocation77_spill] sm:$0xff] %v2374_v32  ;;  %3603 = vst [vmem:[#allocation78_spill] sm:$0xff] %v2376_v57  ;;  %v2381_v46 = vld [vmem:[#allocation5 + $0x730] sm:$0xff]  ;;  %v452_v2 = vld [vmem:[#allocation2 + $0x338] sm:$0xff]  ;;  %v2404_v42 = vmul.f32 %v2374_v32, %v207_v56  ;;  %v2407_v51 = vmul.f32 %v2376_v57, %v208_v33  ;;  %v1273_v32 = vadd.f32 %v1272_v27, %v1242_v3 }
  0x67   :  { %3604 = vst [vmem:[#allocation79_spill] sm:$0xff] %v2381_v46  ;;  %v2389_v43 = vld [vmem:[#allocation5 + $0x668] sm:$0xff]  ;;  %v2391_v59 = vld [vmem:[#allocation5 + $0x670] sm:$0xff]  ;;  %v330_v11 = vld [vmem:[#allocation2 + $0x298] sm:$0xff]  ;;  %v1339_v55 = vmul.f32 %v2381_v46, %v451_v60  ;;  %v1369_v37 = vadd.f32 %v1368_v25, %v1338_v29  ;;  %v1181_v27 = vadd.f32 %v1180_v19, %v2340_v36 }
  0x68   :  { %3606 = vst [vmem:[#allocation81_spill] sm:$0xff] %v2389_v43  ;;  %3607 = vst [vmem:[#allocation82_spill] sm:$0xff] %v2391_v59  ;;  %v329_v45 = vld [vmem:[#allocation2 + $0x290] sm:$0xff]  ;;  %v2396_v14 = vld [vmem:[#allocation5 + $0x678] sm:$0xff]  ;;  %v1244_v63 = vmul.f32 %v2389_v43, %v324_v18  ;;  %v1245_v56 = vmul.f32 %v2391_v59, %v325_v1  ;;  %v1082_v1 = vadd.f32 %v1081_v13, %v2261_v50 }
  0x69   :  { %v2398_v58 = vld [vmem:[#allocation5 + $0x680] sm:$0xff]  ;;  %v2401_v9 = vld [vmem:[#allocation5 + $0x738] sm:$0xff]  ;;  %v332_v22 = vld [vmem:[#allocation2 + $0x2a8] sm:$0xff]  ;;  %v1246_v60 = vmul.f32 %v2396_v14, %v326_v41  ;;  %v1274_v59 = vadd.f32 %v1273_v32, %v1243_v61  ;;  %v1370_v36 = vadd.f32 %v1369_v37, %v1339_v55 }
  0x6a   :  { %3608 = vst [vmem:[#allocation83_spill] sm:$0xff] %v2398_v58  ;;  %3609 = vst [vmem:[#allocation84_spill] sm:$0xff] %v2401_v9  ;;  %v331_v54 = vld [vmem:[#allocation2 + $0x2a0] sm:$0xff]  ;;  %v2409_v23 = vld [vmem:[#allocation5 + $0x688] sm:$0xff]  ;;  %v2427_v21 = vmul.f32 %v2398_v58, %v327_v48  ;;  %v1340_v28 = vmul.f32 %v2401_v9, %v452_v2 }
  0x6b   :  { %v453_v49 = vld [vmem:[#allocation2 + $0x340] sm:$0xff]  ;;  %3610 = vst [vmem:[#allocation85_spill] sm:$0xff] %v2409_v23  ;;  %v333_v24 = vld [vmem:[#allocation2 + $0x2b0] sm:$0xff]  ;;  %v2415_v0 = vld [vmem:[#allocation5 + $0x698] sm:$0xff]  ;;  %v2435_v46 = vmul.f32 %v2409_v23, %v328_v44  ;;  %v1182_v44 = vadd.f32 %v1181_v27, %v2346_v39 }
  0x6c   :  { %v2413_v38 = vld [vmem:[#allocation5 + $0x690] sm:$0xff]  ;;  %3612 = vst [vmem:[#allocation87_spill] sm:$0xff] %v2415_v0  ;;  %v2419_v10 = vld [vmem:[#allocation5 + $0x740] sm:$0xff]  ;;  %v454_v33 = vld [vmem:[#allocation2 + $0x348] sm:$0xff]  ;;  %v2443_v29 = vmul.f32 %v2415_v0, %v330_v11  ;;  %v1371_v37 = vadd.f32 %v1370_v36, %v1340_v28 }
  0x6d   :  { %3611 = vst [vmem:[#allocation86_spill] sm:$0xff] %v2413_v38  ;;  %3613 = vst [vmem:[#allocation88_spill] sm:$0xff] %v2419_v10  ;;  %v2421_v57 = vld [vmem:[#allocation5 + $0x6a0] sm:$0xff]  ;;  %v2423_v62 = vld [vmem:[#allocation5 + $0x6a8] sm:$0xff]  ;;  %v2440_v2 = vmul.f32 %v2413_v38, %v329_v45  ;;  %v1341_v50 = vmul.f32 %v2419_v10, %v453_v49  ;;  %v1275_v38 = vadd.f32 %v1274_v59, %v1244_v63 }
  0x6e   :  { %3614 = vst [vmem:[#allocation89_spill] sm:$0xff] %v2421_v57  ;;  %3615 = vst [vmem:[#allocation90_spill] sm:$0xff] %v2423_v62  ;;  %v334_v35 = vld [vmem:[#allocation2 + $0x2b8] sm:$0xff]  ;;  %v335_v18 = vld [vmem:[#allocation2 + $0x2c0] sm:$0xff]  ;;  %v2452_v61 = vmul.f32 %v2421_v57, %v331_v54  ;;  %v2455_v45 = vmul.f32 %v2423_v62, %v332_v22  ;;  %v1083_v54 = vadd.f32 %v1082_v1, %v2264_v30 }
  0x6f   :  { %v2432_v3 = vld [vmem:[#allocation5 + $0x6b0] sm:$0xff]  ;;  %v2437_v43 = vld [vmem:[#allocation5 + $0x748] sm:$0xff]  ;;  %v582_v41 = vld [vmem:[#allocation2 + $0x400] sm:$0xff]  ;;  %v1183_v22 = vadd.f32 %v1182_v44, %v2352_v34  ;;  %v1276_v59 = vadd.f32 %v1275_v38, %v1245_v56  ;;  %v1372_v34 = vadd.f32 %v1371_v37, %v1341_v50 }
  0x70   :  { %3616 = vst [vmem:[#allocation91_spill] sm:$0xff] %v2432_v3  ;;  %v336_v48 = vld [vmem:[#allocation2 + $0x2c8] sm:$0xff]  ;;  %v455_v58 = vld [vmem:[#allocation2 + $0x350] sm:$0xff]  ;;  %v2447_v19 = vld [vmem:[#allocation5 + $0x6b8] sm:$0xff]  ;;  %v2462_v55 = vmul.f32 %v2432_v3, %v333_v24  ;;  %v1342_v39 = vmul.f32 %v2437_v43, %v454_v33  ;;  %v1405_v10 = vmul.f32 %v2120_v4, %v582_v41 }
  0x71   :  { %v583_v13 = vld [vmem:[#allocation2 + $0x408] sm:$0xff]  ;;  %v337_v25 = vld [vmem:[#allocation2 + $0x2d0] sm:$0xff]  ;;  %v2449_v32 = vld [vmem:[#allocation5 + $0x6c0] sm:$0xff]  ;;  %v2474_v33 = vmul.f32 %v2447_v19, %v334_v35  ;;  %v1184_v38 = vadd.f32 %v1183_v22, %v2354_v52  ;;  %v1277_v41 = vadd.f32 %v1276_v59, %v1246_v60 }
  0x72   :  { %v2457_v11 = vld [vmem:[#allocation5 + $0x750] sm:$0xff]  ;;  %v456_v0 = vld [vmem:[#allocation2 + $0x358] sm:$0xff]  ;;  %v2459_v49 = vld [vmem:[#allocation5 + $0x6c8] sm:$0xff]  ;;  %v1406_v23 = vmul.f32 %v2122_v5, %v583_v13  ;;  %v2477_v4 = vmul.f32 %v2449_v32, %v335_v18  ;;  %v1373_v52 = vadd.f32 %v1372_v34, %v1342_v39 }
  0x73   :  { %3617 = vst [vmem:[#allocation92_spill] sm:$0xff] %v2459_v49  ;;  %v584_v27 = vld [vmem:[#allocation2 + $0x410] sm:$0xff]  ;;  %v2470_v63 = vld [vmem:[#allocation5 + $0x758] sm:$0xff]  ;;  %v339_v3 = vld [vmem:[#allocation2 + $0x2e0] sm:$0xff]  ;;  %v1343_v30 = vmul.f32 %v2457_v11, %v455_v58  ;;  %v2486_v5 = vmul.f32 %v2459_v49, %v336_v48  ;;  %v1084_v48 = vadd.f32 %v1083_v54, %v2267_v47  ;;  %v1185_v60 = vadd.f32 %v1184_v38, %v2367_v31 }
  0x74   :  { %v2468_v62 = vld [vmem:[#allocation5 + $0x6d0] sm:$0xff]  ;;  %v585_v57 = vld [vmem:[#allocation2 + $0x418] sm:$0xff]  ;;  %v457_v9 = vld [vmem:[#allocation2 + $0x360] sm:$0xff]  ;;  %v1407_v35 = vmul.f32 %v2124_v6, %v584_v27  ;;  %v1344_v50 = vmul.f32 %v2470_v63, %v456_v0  ;;  %v1278_v6 = vadd.f32 %v1277_v41, %v2427_v21 }
  0x75   :  { %3618 = vst [vmem:[#allocation93_spill] sm:$0xff] %v2468_v62  ;;  %v338_v24 = vld [vmem:[#allocation2 + $0x2d8] sm:$0xff]  ;;  %v340_v28 = vld [vmem:[#allocation2 + $0x2e8] sm:$0xff]  ;;  %v2483_v1 = vld [vmem:[#allocation5 + $0x6e0] sm:$0xff]  ;;  %v2492_v58 = vmul.f32 %v2468_v62, %v337_v25  ;;  %v1408_v37 = vmul.f32 %v2126_v7, %v585_v57  ;;  %v1437_v25 = vadd.f32 %v1406_v23, %v1405_v10  ;;  %v1374_v31 = vadd.f32 %v1373_v52, %v1343_v30 }
  0x76   :  { %v2481_v56 = vld [vmem:[#allocation5 + $0x6d8] sm:$0xff]  ;;  %3620 = vst [vmem:[#allocation95_spill] sm:$0xff] %v2483_v1  ;;  %v2488_v36 = vld [vmem:[#allocation5 + $0x760] sm:$0xff]  ;;  %v341_v18 = vld [vmem:[#allocation2 + $0x2f0] sm:$0xff]  ;;  %v2509_v7 = vmul.f32 %v2483_v1, %v339_v3  ;;  %v1186_v38 = vadd.f32 %v1185_v60, %v2369_v17  ;;  %v1279_v41 = vadd.f32 %v1278_v6, %v2435_v46  ;;  %v1085_v46 = vadd.f32 %v1084_v48, %v2280_v40 }
  0x77   :  { %3619 = vst [vmem:[#allocation94_spill] sm:$0xff] %v2481_v56  ;;  %3621 = vst [vmem:[#allocation96_spill] sm:$0xff] %v2488_v36  ;;  %v458_v13 = vld [vmem:[#allocation2 + $0x368] sm:$0xff]  ;;  %v586_v44 = vld [vmem:[#allocation2 + $0x420] sm:$0xff]  ;;  %v2506_v39 = vmul.f32 %v2481_v56, %v338_v24  ;;  %v1345_v47 = vmul.f32 %v2488_v36, %v457_v9  ;;  %v1438_v24 = vadd.f32 %v1437_v25, %v1407_v35 }
  0x78   :  { %v342_v22 = vld [vmem:[#allocation2 + $0x2f8] sm:$0xff]  ;;  %v2498_v59 = vld [vmem:[#allocation5 + $0x6e8] sm:$0xff]  ;;  %v2500_v49 = vld [vmem:[#allocation5 + $0x6f0] sm:$0xff]  ;;  %v1409_v23 = vmul.f32 %v2131_v12, %v586_v44  ;;  %v1375_v17 = vadd.f32 %v1374_v31, %v1344_v50  ;;  %v1280_v6 = vadd.f32 %v1279_v41, %v2440_v2 }
  0x79   :  { %3622 = vst [vmem:[#allocation97_spill] sm:$0xff] %v2498_v59  ;;  %3623 = vst [vmem:[#allocation98_spill] sm:$0xff] %v2500_v49  ;;  %v2503_v27 = vld [vmem:[#allocation5 + $0x768] sm:$0xff]  ;;  %v459_v62 = vld [vmem:[#allocation2 + $0x370] sm:$0xff]  ;;  %v2518_v3 = vmul.f32 %v2498_v59, %v340_v28  ;;  %v2521_v9 = vmul.f32 %v2500_v49, %v341_v18  ;;  %v1439_v44 = vadd.f32 %v1438_v24, %v1408_v37 }
  0x7a   :  { %3624 = vst [vmem:[#allocation99_spill] sm:$0xff] %v2503_v27  ;;  %v460_v0 = vld [vmem:[#allocation2 + $0x378] sm:$0xff]  ;;  %v587_v57 = vld [vmem:[#allocation2 + $0x428] sm:$0xff]  ;;  %v461_v54 = vld [vmem:[#allocation2 + $0x380] sm:$0xff]  ;;  %v1346_v52 = vmul.f32 %v2503_v27, %v458_v13  ;;  %v1187_v13 = vadd.f32 %v1186_v38, %v2378_v53  ;;  %v1376_v40 = vadd.f32 %v1375_v17, %v1345_v47  ;;  %v1281_v59 = vadd.f32 %v1280_v6, %v2443_v29 }
  0x7b   :  { %v462_v34 = vld [vmem:[#allocation2 + $0x388] sm:$0xff]  ;;  %v1230_v21 = vld [vmem:[#allocation5 + $0x6f8] sm:$0xff]  ;;  %v2514_v10 = vld [vmem:[#allocation5 + $0x770] sm:$0xff]  ;;  %v1410_v18 = vmul.f32 %v2134_v16, %v587_v57  ;;  %v1440_v57 = vadd.f32 %v1439_v44, %v1409_v23  ;;  %v1086_v24 = vadd.f32 %v1085_v46, %v2283_v15 }
  0x7c   :  { %v463_v56 = vld [vmem:[#allocation2 + $0x390] sm:$0xff]  ;;  %v2523_v30 = vld [vmem:[#allocation5 + $0x778] sm:$0xff]  ;;  %v2528_v12 = vld [vmem:[#allocation5 + $0x780] sm:$0xff]  ;;  %v2536_v50 = vmul.f32 %v1230_v21, %v342_v22  ;;  %v1347_v31 = vmul.f32 %v2514_v10, %v459_v62  ;;  %v1377_v29 = vadd.f32 %v1376_v40, %v1346_v52  ;;  %v1282_v17 = vadd.f32 %v1281_v59, %v2452_v61 }
  0x7d   :  { %v588_v60 = vld [vmem:[#allocation2 + $0x430] sm:$0xff]  ;;  %v464_v1 = vld [vmem:[#allocation2 + $0x398] sm:$0xff]  ;;  %3625 = vst [vmem:[#allocation100_spill] sm:$0xff] %v2528_v12  ;;  %v2530_v35 = vld [vmem:[#allocation5 + $0x788] sm:$0xff]  ;;  %v1348_v16 = vmul.f32 %v2523_v30, %v460_v0  ;;  %v1349_v62 = vmul.f32 %v2528_v12, %v461_v54  ;;  %v1441_v54 = vadd.f32 %v1440_v57, %v1410_v18 }
  0x7e   :  { %3626 = vst [vmem:[#allocation101_spill] sm:$0xff] %v2530_v35  ;;  %v2532_v28 = vld [vmem:[#allocation5 + $0x790] sm:$0xff]  ;;  %v465_v25 = vld [vmem:[#allocation2 + $0x3a0] sm:$0xff]  ;;  %v466_v49 = vld [vmem:[#allocation2 + $0x3a8] sm:$0xff]  ;;  %v1411_v37 = vmul.f32 %v2137_v20, %v588_v60  ;;  %v1350_v47 = vmul.f32 %v2530_v35, %v462_v34  ;;  %v1378_v15 = vadd.f32 %v1377_v29, %v1347_v31  ;;  %v1283_v46 = vadd.f32 %v1282_v17, %v2455_v45 }
  0x7f   :  { %3627 = vst [vmem:[#allocation102_spill] sm:$0xff] %v2532_v28  ;;  %v589_v48 = vld [vmem:[#allocation2 + $0x438] sm:$0xff]  ;;  %v467_v2 = vld [vmem:[#allocation2 + $0x3b0] sm:$0xff]  ;;  %v2542_v36 = vld [vmem:[#allocation5 + $0x7a0] sm:$0xff]  ;;  %v2551_v38 = vmul.f32 %v2532_v28, %v463_v56  ;;  %v1188_v56 = vadd.f32 %v1187_v13, %v2384_v8 }
  0x80   :  { %v468_v41 = vld [vmem:[#allocation2 + $0x3b8] sm:$0xff]  ;;  %3629 = vst [vmem:[#allocation104_spill] sm:$0xff] %v2542_v36  ;;  %v469_v53 = vld [vmem:[#allocation2 + $0x3c0] sm:$0xff]  ;;  %v2546_v22 = vld [vmem:[#allocation5 + $0x7a8] sm:$0xff]  ;;  %v1412_v60 = vmul.f32 %v2140_v26, %v589_v48  ;;  %v2565_v44 = vmul.f32 %v2542_v36, %v465_v25  ;;  %v1442_v8 = vadd.f32 %v1441_v54, %v1411_v37  ;;  %v1379_v57 = vadd.f32 %v1378_v15, %v1348_v16 }
  0x81   :  { %v2540_v27 = vld [vmem:[#allocation5 + $0x798] sm:$0xff]  ;;  %3630 = vst [vmem:[#allocation105_spill] sm:$0xff] %v2546_v22  ;;  %v590_v21 = vld [vmem:[#allocation2 + $0x440] sm:$0xff]  ;;  %v2555_v0 = vld [vmem:[#allocation5 + $0x7b0] sm:$0xff]  ;;  %v2573_v26 = vmul.f32 %v2546_v22, %v466_v49  ;;  %v1284_v22 = vadd.f32 %v1283_v46, %v2462_v55 }
  0x82   :  { %3628 = vst [vmem:[#allocation103_spill] sm:$0xff] %v2540_v27  ;;  %3631 = vst [vmem:[#allocation106_spill] sm:$0xff] %v2555_v0  ;;  %v2557_v20 = vld [vmem:[#allocation5 + $0x7b8] sm:$0xff]  ;;  %v2559_v23 = vld [vmem:[#allocation5 + $0x7c0] sm:$0xff]  ;;  %v1352_v52 = vmul.f32 %v2540_v27, %v464_v1  ;;  %v2579_v25 = vmul.f32 %v2555_v0, %v467_v2  ;;  %v1443_v27 = vadd.f32 %v1442_v8, %v1412_v60 }
  0x83   :  { %3632 = vst [vmem:[#allocation107_spill] sm:$0xff] %v2557_v20  ;;  %3633 = vst [vmem:[#allocation108_spill] sm:$0xff] %v2559_v23  ;;  %v470_v6 = vld [vmem:[#allocation2 + $0x3c8] sm:$0xff]  ;;  %v471_v34 = vld [vmem:[#allocation2 + $0x3d0] sm:$0xff]  ;;  %v2582_v31 = vmul.f32 %v2557_v20, %v468_v41  ;;  %v2585_v45 = vmul.f32 %v2559_v23, %v469_v53  ;;  %v1380_v16 = vadd.f32 %v1379_v57, %v1349_v62 }
  0x84   :  { %v591_v61 = vld [vmem:[#allocation2 + $0x448] sm:$0xff]  ;;  %v472_v59 = vld [vmem:[#allocation2 + $0x3d8] sm:$0xff]  ;;  %v2570_v28 = vld [vmem:[#allocation5 + $0x7d0] sm:$0xff] }
  0x85   :  { %v2568_v40 = vld [vmem:[#allocation5 + $0x7c8] sm:$0xff]  ;;  %3635 = vst [vmem:[#allocation110_spill] sm:$0xff] %v2570_v28  ;;  %v473_v13 = vld [vmem:[#allocation2 + $0x3e0] sm:$0xff]  ;;  %v2576_v1 = vld [vmem:[#allocation5 + $0x7d8] sm:$0xff]  ;;  %v2595_v53 = vmul.f32 %v2570_v28, %v471_v34 }
  0x86   :  { %3634 = vst [vmem:[#allocation109_spill] sm:$0xff] %v2568_v40  ;;  %v3636_v18 = vld [vmem:[#allocation11_spill] sm:$0xff]  ;;  %v592_v29 = vld [vmem:[#allocation2 + $0x450] sm:$0xff]  ;;  %v2592_v41 = vmul.f32 %v2568_v40, %v470_v6  ;;  %v593_v15 = vld [vmem:[#allocation2 + $0x458] sm:$0xff]  ;;  %v2599_v46 = vmul.f32 %v2576_v1, %v472_v59 }
  0x87   :  { %v1413_v48 = vmul.f32 %v3636_v18, %v590_v21  ;;  %3637 = vst [vmem:[#allocation11_spill] sm:$0xff] %v2576_v1  ;;  %v3638_v17 = vld [vmem:[#allocation53_spill] sm:$0xff]  ;;  %v1329_v21 = vld [vmem:[#allocation5 + $0x7e0] sm:$0xff]  ;;  %v685_v54 = vld [vmem:[#allocation2 + $0x508] sm:$0xff] }
  0x88   :  { %v1087_v49 = vadd.f32 %v1086_v24, %v3638_v17  ;;  %v684_v37 = vld [vmem:[#allocation2 + $0x500] sm:$0xff]  ;;  %v3639_v18 = vld [vmem:[#allocation16_spill] sm:$0xff]  ;;  %v1285_v24 = vadd.f32 %v1284_v22, %v2474_v33  ;;  %v2602_v6 = vmul.f32 %v1329_v21, %v473_v13  ;;  %v3643_v57 = vld [vmem:[#allocation13_spill] sm:$0xff] }
  0x89   :  { %v1414_v36 = vmul.f32 %v3639_v18, %v591_v61  ;;  %v3640_v2 = vld [vmem:[#allocation80_spill] sm:$0xff]  ;;  %v3641_v61 = vld [vmem:[#allocation18_spill] sm:$0xff]  ;;  %v1444_v8 = vadd.f32 %v1443_v27, %v1413_v48  ;;  %v1476_v40 = vmul.f32 %v3643_v57, %v685_v54  ;;  %v3644_v33 = vld [vmem:[#allocation59_spill] sm:$0xff] }
  0x8a   :  { %v1189_v0 = vadd.f32 %v1188_v56, %v3640_v2  ;;  %v474_v23 = vld [vmem:[#allocation2 + $0x3e8] sm:$0xff]  ;;  %v686_v17 = vld [vmem:[#allocation2 + $0x510] sm:$0xff]  ;;  %v1415_v60 = vmul.f32 %v3641_v61, %v592_v29  ;;  %v1381_v2 = vadd.f32 %v1380_v16, %v1350_v47  ;;  %v594_v34 = vld [vmem:[#allocation2 + $0x460] sm:$0xff]  ;;  %v1088_v22 = vadd.f32 %v1087_v49, %v3644_v33 }
  0x8b   :  { %v1330_v55 = vld [vmem:[#allocation5 + $0x7e8] sm:$0xff]  ;;  %v475_v56 = vld [vmem:[#allocation2 + $0x3f0] sm:$0xff]  ;;  %v476_v20 = vld [vmem:[#allocation2 + $0x3f8] sm:$0xff]  ;;  %v1286_v59 = vadd.f32 %v1285_v24, %v2477_v4  ;;  %v1445_v27 = vadd.f32 %v1444_v8, %v1414_v36 }
  0x8c   :  { %v1331_v18 = vld [vmem:[#allocation5 + $0x7f0] sm:$0xff]  ;;  %v1332_v1 = vld [vmem:[#allocation5 + $0x7f8] sm:$0xff]  ;;  %v1190_v48 = vadd.f32 %v1189_v0, %v2404_v42  ;;  %v2610_v13 = vmul.f32 %v1330_v55, %v474_v23  ;;  %v1382_v47 = vadd.f32 %v1381_v2, %v2551_v38  ;;  %v595_v21 = vld [vmem:[#allocation2 + $0x468] sm:$0xff] }
  0x8d   :  { %v3642_v28 = vld [vmem:[#allocation12_spill] sm:$0xff]  ;;  %v687_v35 = vld [vmem:[#allocation2 + $0x518] sm:$0xff]  ;;  %v1287_v54 = vadd.f32 %v1286_v59, %v2486_v5  ;;  %v2615_v16 = vmul.f32 %v1331_v18, %v475_v56  ;;  %v688_v49 = vld [vmem:[#allocation2 + $0x520] sm:$0xff]  ;;  %v1446_v61 = vadd.f32 %v1445_v27, %v1415_v60  ;;  %v2618_v57 = vmul.f32 %v1332_v1, %v476_v20 }
  0x8e   :  { %v1475_v62 = vmul.f32 %v3642_v28, %v684_v37  ;;  %v3645_v12 = vld [vmem:[#allocation20_spill] sm:$0xff]  ;;  %v3646_v28 = vld [vmem:[#allocation14_spill] sm:$0xff]  ;;  %v1383_v36 = vadd.f32 %v1382_v47, %v1352_v52  ;;  %v3648_v0 = vld [vmem:[#allocation15_spill] sm:$0xff] }
  0x8f   :  { %v1416_v29 = vmul.f32 %v3645_v12, %v593_v15  ;;  %v1477_v37 = vmul.f32 %v3646_v28, %v686_v17  ;;  %v3647_v4 = vld [vmem:[#allocation22_spill] sm:$0xff]  ;;  %v596_v12 = vld [vmem:[#allocation2 + $0x470] sm:$0xff]  ;;  %v1478_v23 = vmul.f32 %v3648_v0, %v687_v35  ;;  %v1288_v17 = vadd.f32 %v1287_v54, %v2492_v58  ;;  %v689_v5 = vld [vmem:[#allocation2 + $0x528] sm:$0xff] }
  0x90   :  { %v1417_v24 = vmul.f32 %v3647_v4, %v594_v34  ;;  %v597_v42 = vld [vmem:[#allocation2 + $0x478] sm:$0xff]  ;;  %v1507_v15 = vadd.f32 %v1476_v40, %v1475_v62  ;;  %v3649_v38 = vld [vmem:[#allocation60_spill] sm:$0xff]  ;;  %v598_v8 = vld [vmem:[#allocation2 + $0x480] sm:$0xff]  ;;  %v1191_v34 = vadd.f32 %v1190_v48, %v2407_v51  ;;  %v1384_v20 = vadd.f32 %v1383_v36, %v2565_v44 }
  0x91   :  { %v1089_v55 = vadd.f32 %v1088_v22, %v3649_v38  ;;  %v3650_v56 = vld [vmem:[#allocation24_spill] sm:$0xff]  ;;  %v1447_v2 = vadd.f32 %v1446_v61, %v1416_v29  ;;  %v3651_v52 = vld [vmem:[#allocation17_spill] sm:$0xff]  ;;  %v1289_v35 = vadd.f32 %v1288_v17, %v2506_v39  ;;  %v3652_v62 = vld [vmem:[#allocation26_spill] sm:$0xff] }
  0x92   :  { %v1418_v18 = vmul.f32 %v3650_v56, %v595_v21  ;;  %v599_v1 = vld [vmem:[#allocation2 + $0x488] sm:$0xff]  ;;  %v1479_v60 = vmul.f32 %v3651_v52, %v688_v49  ;;  %v1508_v33 = vadd.f32 %v1507_v15, %v1477_v37  ;;  %v690_v40 = vld [vmem:[#allocation2 + $0x530] sm:$0xff]  ;;  %v1419_v22 = vmul.f32 %v3652_v62, %v596_v12  ;;  %v601_v29 = vld [vmem:[#allocation2 + $0x498] sm:$0xff] }
  0x93   :  { %v3653_v59 = vld [vmem:[#allocation27_spill] sm:$0xff]  ;;  %v1448_v27 = vadd.f32 %v1447_v2, %v1417_v24  ;;  %v1385_v47 = vadd.f32 %v1384_v20, %v2573_v26  ;;  %v600_v21 = vld [vmem:[#allocation2 + $0x490] sm:$0xff]  ;;  %v1090_v4 = vrot.slane %v1089_v55, 4  ;;  %v1290_v37 = vadd.f32 %v1289_v35, %v2509_v7  ;;  %v691_v39 = vld [vmem:[#allocation2 + $0x538] sm:$0xff] }
  0x94   :  { %v1420_v58 = vmul.f32 %v3653_v59, %v597_v42  ;;  %v3654_v28 = vld [vmem:[#allocation28_spill] sm:$0xff]  ;;  %v3655_v48 = vld [vmem:[#allocation19_spill] sm:$0xff]  ;;  %v1509_v54 = vadd.f32 %v1508_v33, %v1478_v23  ;;  %v3656_v61 = vld [vmem:[#allocation29_spill] sm:$0xff]  ;;  %v1192_v0 = vrot.slane %v1191_v34, 4 }
  0x95   :  { %v1421_v51 = vmul.f32 %v3654_v28, %v598_v8  ;;  %v1480_v44 = vmul.f32 %v3655_v48, %v689_v5  ;;  %v602_v49 = vld [vmem:[#allocation2 + $0x4a0] sm:$0xff]  ;;  %v1422_v36 = vmul.f32 %v3656_v61, %v599_v1  ;;  %v1449_v12 = vadd.f32 %v1448_v27, %v1418_v18  ;;  %v603_v42 = vld [vmem:[#allocation2 + $0x4a8] sm:$0xff]  ;;  %v3657_v26 = vld [vmem:[#allocation21_spill] sm:$0xff] }
  0x96   :  { %v1386_v24 = vadd.f32 %v1385_v47, %v2579_v25  ;;  %v1481_v15 = vmul.f32 %v3657_v26, %v690_v40  ;;  %v1510_v38 = vadd.f32 %v1509_v54, %v1479_v60  ;;  %v1291_v17 = vadd.f32 %v1290_v37, %v2518_v3  ;;  %v692_v8 = vld [vmem:[#allocation2 + $0x540] sm:$0xff]  ;;  %v3659_v56 = vld [vmem:[#allocation32_spill] sm:$0xff]  ;;  %v605_v1 = vld [vmem:[#allocation2 + $0x4b8] sm:$0xff] }
  0x97   :  { %v3658_v5 = vld [vmem:[#allocation31_spill] sm:$0xff]  ;;  %v1424_v2 = vmul.f32 %v3659_v56, %v601_v29  ;;  %v1450_v7 = vadd.f32 %v1449_v12, %v1419_v22  ;;  %v604_v52 = vld [vmem:[#allocation2 + $0x4b0] sm:$0xff]  ;;  %v1091_v40 = vadd.f32 %v1090_v4, %v1089_v55  ;;  %v1193_v22 = vadd.f32 %v1192_v0, %v1191_v34 }
  0x98   :  { %v1423_v23 = vmul.f32 %v3658_v5, %v600_v21  ;;  %v1387_v20 = vadd.f32 %v1386_v24, %v2582_v31  ;;  %v3660_v18 = vld [vmem:[#allocation33_spill] sm:$0xff]  ;;  %v3661_v25 = vld [vmem:[#allocation23_spill] sm:$0xff]  ;;  %v1511_v62 = vadd.f32 %v1510_v38, %v1480_v44  ;;  %v1292_v60 = vadd.f32 %v1291_v17, %v2521_v9  ;;  %v3662_v27 = vld [vmem:[#allocation36_spill] sm:$0xff] }
  0x99   :  { %v2642_v33 = vmul.f32 %v3660_v18, %v602_v49  ;;  %v1482_v35 = vmul.f32 %v3661_v25, %v691_v39  ;;  %v606_v3 = vld [vmem:[#allocation2 + $0x4c0] sm:$0xff]  ;;  %v693_v59 = vld [vmem:[#allocation2 + $0x548] sm:$0xff]  ;;  %v2647_v47 = vmul.f32 %v3662_v27, %v603_v42  ;;  %v1451_v21 = vadd.f32 %v1450_v7, %v1420_v58  ;;  %v3663_v28 = vld [vmem:[#allocation25_spill] sm:$0xff] }
  0x9a   :  { %v1388_v31 = vadd.f32 %v1387_v20, %v2585_v45  ;;  %v607_v29 = vld [vmem:[#allocation2 + $0x4c8] sm:$0xff]  ;;  %v1483_v48 = vmul.f32 %v3663_v28, %v692_v8  ;;  %v1512_v54 = vadd.f32 %v1511_v62, %v1481_v15  ;;  %v1293_v37 = vadd.f32 %v1292_v60, %v2536_v50  ;;  %v694_v49 = vld [vmem:[#allocation2 + $0x550] sm:$0xff]  ;;  %v3665_v9 = vld [vmem:[#allocation38_spill] sm:$0xff] }
  0x9b   :  { %v3664_v44 = vld [vmem:[#allocation37_spill] sm:$0xff]  ;;  %v2656_v4 = vmul.f32 %v3665_v9, %v605_v1  ;;  %v1452_v39 = vadd.f32 %v1451_v21, %v1421_v51  ;;  %v786_v58 = vld [vmem:[#allocation2 + $0x600] sm:$0xff]  ;;  %v787_v34 = vld [vmem:[#allocation2 + $0x608] sm:$0xff]  ;;  %v1092_v26 = vrot.slane %v1091_v40, 2  ;;  %v1194_v56 = vrot.slane %v1193_v22, 2 }
  0x9c   :  { %v2653_v55 = vmul.f32 %v3664_v44, %v604_v52  ;;  %v1389_v61 = vadd.f32 %v1388_v31, %v2592_v41  ;;  %v3666_v12 = vld [vmem:[#allocation41_spill] sm:$0xff]  ;;  %v1727_v0 = vld [vmem:[#allocation5 + $0x548] sm:$0xff]  ;;  %v1513_v42 = vadd.f32 %v1512_v54, %v1482_v35  ;;  %v1294_v50 = vrot.slane %v1293_v37, 4  ;;  %v3667_v17 = vld [vmem:[#allocation42_spill] sm:$0xff] }
  0x9d   :  { %v2660_v45 = vmul.f32 %v3666_v12, %v606_v3  ;;  %v1484_v24 = vmul.f32 %v1727_v0, %v693_v59  ;;  %v608_v15 = vld [vmem:[#allocation2 + $0x4d0] sm:$0xff]  ;;  %v695_v38 = vld [vmem:[#allocation2 + $0x558] sm:$0xff]  ;;  %v2663_v8 = vmul.f32 %v3667_v17, %v607_v29  ;;  %v1453_v5 = vadd.f32 %v1452_v39, %v1422_v36  ;;  %v696_v41 = vld [vmem:[#allocation2 + $0x560] sm:$0xff] }
  0x9e   :  { %v1390_v51 = vadd.f32 %v1389_v61, %v2595_v53  ;;  %v788_v7 = vld [vmem:[#allocation2 + $0x610] sm:$0xff]  ;;  %v1514_v1 = vadd.f32 %v1513_v42, %v1483_v48  ;;  %v1295_v18 = vadd.f32 %v1294_v50, %v1293_v37  ;;  %v1729_v62 = vld [vmem:[#allocation5 + $0x600] sm:$0xff]  ;;  %v1730_v60 = vld [vmem:[#allocation5 + $0x608] sm:$0xff]  ;;  %v1093_v54 = vadd.f32 %v1092_v26, %v1091_v40 }
  0x9f   :  { %v1728_v20 = vld [vmem:[#allocation5 + $0x550] sm:$0xff]  ;;  %v1454_v25 = vadd.f32 %v1453_v5, %v1423_v23  ;;  %v1545_v35 = vmul.f32 %v1729_v62, %v786_v58  ;;  %v1546_v3 = vmul.f32 %v1730_v60, %v787_v34  ;;  %v609_v27 = vld [vmem:[#allocation2 + $0x4d8] sm:$0xff]  ;;  %v3668_v31 = vld [vmem:[#allocation43_spill] sm:$0xff]  ;;  %v1195_v61 = vadd.f32 %v1194_v56, %v1193_v22 }
  0xa0   :  { %v1485_v52 = vmul.f32 %v1728_v20, %v694_v49  ;;  %v1391_v59 = vadd.f32 %v1390_v51, %v2599_v46  ;;  %v789_v21 = vld [vmem:[#allocation2 + $0x618] sm:$0xff]  ;;  %v2668_v36 = vmul.f32 %v3668_v31, %v608_v15  ;;  %v1515_v28 = vadd.f32 %v1514_v1, %v1484_v24  ;;  %v697_v44 = vld [vmem:[#allocation2 + $0x568] sm:$0xff]  ;;  %v698_v49 = vld [vmem:[#allocation2 + $0x570] sm:$0xff] }
  0xa1   :  { %v3669_v29 = vld [vmem:[#allocation30_spill] sm:$0xff]  ;;  %v1455_v48 = vadd.f32 %v1454_v25, %v1424_v2  ;;  %v1731_v9 = vld [vmem:[#allocation5 + $0x610] sm:$0xff]  ;;  %v1296_v58 = vrot.slane %v1295_v18, 2  ;;  %v3672_v24 = vld [vmem:[#allocation35_spill] sm:$0xff]  ;;  %v1577_v26 = vadd.f32 %v1546_v3, %v1545_v35  ;;  %v1196_v25 = vrot.slane %v1195_v61, 1 }
  0xa2   :  { %v1486_v53 = vmul.f32 %v3669_v29, %v695_v38  ;;  %v3670_v37 = vld [vmem:[#allocation34_spill] sm:$0xff]  ;;  %v1547_v39 = vmul.f32 %v1731_v9, %v788_v7  ;;  %v1392_v46 = vadd.f32 %v1391_v59, %v2602_v6  ;;  %v1516_v12 = vadd.f32 %v1515_v28, %v1485_v52  ;;  %v791_v38 = vld [vmem:[#allocation2 + $0x628] sm:$0xff]  ;;  %v612_v9 = vld [vmem:[#allocation2 + $0x4f0] sm:$0xff] }
  0xa3   :  { %v1487_v23 = vmul.f32 %v3670_v37, %v696_v41  ;;  %v790_v34 = vld [vmem:[#allocation2 + $0x620] sm:$0xff]  ;;  %v1456_v50 = vadd.f32 %v1455_v48, %v2642_v33  ;;  %v1548_v40 = vmul.f32 %v3672_v24, %v789_v21  ;;  %v3674_v22 = vld [vmem:[#allocation44_spill] sm:$0xff]  ;;  %v1094_v6 = vrot.slane %v1093_v54, 1  ;;  %v699_v41 = vld [vmem:[#allocation2 + $0x578] sm:$0xff] }
  0xa4   :  { %v3671_v0 = vld [vmem:[#allocation46_spill] sm:$0xff]  ;;  %v1393_v2 = vadd.f32 %v1392_v46, %v2610_v13  ;;  %v3673_v17 = vld [vmem:[#allocation39_spill] sm:$0xff]  ;;  %v1489_v56 = vmul.f32 %v3674_v22, %v698_v49  ;;  %v1517_v51 = vadd.f32 %v1516_v12, %v1486_v53  ;;  %v3675_v52 = vld [vmem:[#allocation40_spill] sm:$0xff]  ;;  %v1578_v33 = vadd.f32 %v1577_v26, %v1547_v39 }
  0xa5   :  { %v2674_v42 = vmul.f32 %v3671_v0, %v609_v27  ;;  %v610_v15 = vld [vmem:[#allocation2 + $0x4e0] sm:$0xff]  ;;  %v1488_v5 = vmul.f32 %v3673_v17, %v697_v44  ;;  %v1457_v20 = vadd.f32 %v1456_v50, %v2647_v47  ;;  %v1549_v1 = vmul.f32 %v3675_v52, %v790_v34  ;;  %v792_v13 = vld [vmem:[#allocation2 + $0x630] sm:$0xff]  ;;  %v611_v47 = vld [vmem:[#allocation2 + $0x4e8] sm:$0xff] }
  0xa6   :  { %v700_v7 = vld [vmem:[#allocation2 + $0x580] sm:$0xff]  ;;  %v1297_v62 = vadd.f32 %v1296_v58, %v1295_v18  ;;  %v1394_v35 = vadd.f32 %v1393_v2, %v2615_v16  ;;  %v1518_v60 = vadd.f32 %v1517_v51, %v1487_v23  ;;  %v3677_v21 = vld [vmem:[#allocation45_spill] sm:$0xff]  ;;  %v1579_v29 = vadd.f32 %v1578_v33, %v1548_v40  ;;  %v3679_v48 = vld [vmem:[#allocation52_spill] sm:$0xff] }
  0xa7   :  { %v3676_v3 = vld [vmem:[#allocation47_spill] sm:$0xff]  ;;  %v1458_v27 = vadd.f32 %v1457_v20, %v2653_v55  ;;  %v1550_v31 = vmul.f32 %v3677_v21, %v791_v38  ;;  %v793_v28 = vld [vmem:[#allocation2 + $0x638] sm:$0xff]  ;;  %v1491_v18 = vmul.f32 %v3679_v48, %v700_v7  ;;  %v1095_v16 = vadd.f32 %v1094_v6, %v1093_v54  ;;  %v702_v50 = vld [vmem:[#allocation2 + $0x590] sm:$0xff] }
  0xa8   :  { %v2685_v59 = vmul.f32 %v3676_v3, %v610_v15  ;;  %v1395_v53 = vadd.f32 %v1394_v35, %v2618_v57  ;;  %v3678_v44 = vld [vmem:[#allocation49_spill] sm:$0xff]  ;;  %v1519_v37 = vadd.f32 %v1518_v60, %v1488_v5  ;;  %v701_v23 = vld [vmem:[#allocation2 + $0x588] sm:$0xff]  ;;  %v3680_v58 = vld [vmem:[#allocation50_spill] sm:$0xff]  ;;  %v1580_v55 = vadd.f32 %v1579_v29, %v1549_v1 }
  0xa9   :  { %v1490_v49 = vmul.f32 %v3678_v44, %v699_v41  ;;  %v1459_v39 = vadd.f32 %v1458_v27, %v2656_v4  ;;  %v1551_v46 = vmul.f32 %v3680_v58, %v792_v13  ;;  %v1197_v34 = vadd.f32 %v1196_v25, %v1195_v61  ;;  %v794_v57 = vld [vmem:[#allocation2 + $0x640] sm:$0xff]  ;;  %v3681_v40 = vld [vmem:[#allocation48_spill] sm:$0xff]  ;;  %v613_v5 = vld [vmem:[#allocation2 + $0x4f8] sm:$0xff] }
  0xaa   :  { %v1298_v12 = vrot.slane %v1297_v62, 1  ;;  %v1396_v0 = vrot.slane %v1395_v53, 4  ;;  %v1520_v24 = vadd.f32 %v1519_v37, %v1489_v56  ;;  %v1434_v26 = vmul.f32 %v3681_v40, %v611_v47  ;;  %v3682_v15 = vld [vmem:[#allocation55_spill] sm:$0xff]  ;;  %v3684_v6 = vld [vmem:[#allocation54_spill] sm:$0xff]  ;;  %v796_v20 = vld [vmem:[#allocation2 + $0x650] sm:$0xff] }
  0xab   :  { %v1460_v2 = vadd.f32 %v1459_v39, %v2660_v45  ;;  %v1552_v38 = vmul.f32 %v3682_v15, %v793_v28  ;;  %v1581_v54 = vadd.f32 %v1580_v55, %v1550_v31  ;;  %v795_v22 = vld [vmem:[#allocation2 + $0x648] sm:$0xff]  ;;  %v1492_v41 = vmul.f32 %v3684_v6, %v701_v23  ;;  %v703_v7 = vld [vmem:[#allocation2 + $0x598] sm:$0xff]  ;;  %v888_v3 = vld [vmem:[#allocation2 + $0x700] sm:$0xff] }
  0xac   :  { %v1397_v17 = vadd.f32 %v1396_v0, %v1395_v53  ;;  %v3683_v4 = vld [vmem:[#allocation51_spill] sm:$0xff]  ;;  %v1521_v61 = vadd.f32 %v1520_v24, %v1490_v49  ;;  %v3685_v56 = vld [vmem:[#allocation56_spill] sm:$0xff]  ;;  %v3686_v33 = vld [vmem:[#allocation62_spill] sm:$0xff]  ;;  %v1198_v35 = vadd.f32 %v1197_v34, %v1095_v16  ;;  %v1299_v13 = vadd.f32 %v1298_v12, %v1297_v62 }
  0xad   :  { %v1435_v51 = vmul.f32 %v3683_v4, %v612_v9  ;;  %v1461_v52 = vadd.f32 %v1460_v2, %v2663_v8  ;;  %v1493_v1 = vmul.f32 %v3685_v56, %v702_v50  ;;  %v1553_v25 = vmul.f32 %v3686_v33, %v794_v57  ;;  %v889_v27 = vld [vmem:[#allocation2 + $0x708] sm:$0xff]  ;;  %v704_v31 = vld [vmem:[#allocation2 + $0x5a0] sm:$0xff]  ;;  %v1732_v29 = vld [vmem:[#allocation5 + $0x4f8] sm:$0xff] }
  0xae   :  { %v1582_v45 = vadd.f32 %v1581_v54, %v1551_v46  ;;  %v1398_v60 = vrot.slane %v1397_v17, 2  ;;  %v1522_v21 = vadd.f32 %v1521_v61, %v1491_v18  ;;  %v1436_v53 = vmul.f32 %v1732_v29, %v613_v5  ;;  %v3687_v28 = vld [vmem:[#allocation67_spill] sm:$0xff]  ;;  %v797_v48 = vld [vmem:[#allocation2 + $0x658] sm:$0xff]  ;;  %v890_v37 = vld [vmem:[#allocation2 + $0x710] sm:$0xff] }
  0xaf   :  { %v1462_v47 = vadd.f32 %v1461_v52, %v2668_v36  ;;  %v1554_v44 = vmul.f32 %v3687_v28, %v795_v22  ;;  %v3688_v9 = vld [vmem:[#allocation61_spill] sm:$0xff]  ;;  %v3689_v16 = vld [vmem:[#allocation70_spill] sm:$0xff]  ;;  %v705_v58 = vld [vmem:[#allocation2 + $0x5a8] sm:$0xff]  ;;  %v1300_v50 = vadd.f32 %v1299_v13, %v1198_v35 }
  0xb0   :  { %v1583_v49 = vadd.f32 %v1582_v45, %v1552_v38  ;;  %v1399_v8 = vadd.f32 %v1398_v60, %v1397_v17  ;;  %v1494_v23 = vmul.f32 %v3688_v9, %v703_v7  ;;  %v1523_v39 = vadd.f32 %v1522_v21, %v1492_v41  ;;  %v798_v46 = vld [vmem:[#allocation2 + $0x660] sm:$0xff]  ;;  %v3690_v34 = vld [vmem:[#allocation57_spill] sm:$0xff]  ;;  %v799_v54 = vld [vmem:[#allocation2 + $0x668] sm:$0xff] }
  0xb1   :  { %v1555_v62 = vmul.f32 %v3689_v16, %v796_v20  ;;  %v1463_v18 = vadd.f32 %v1462_v47, %v2674_v42  ;;  %v1615_v12 = vmul.f32 %v3690_v34, %v888_v3  ;;  %v3691_v0 = vld [vmem:[#allocation58_spill] sm:$0xff]  ;;  %v3692_v40 = vld [vmem:[#allocation63_spill] sm:$0xff]  ;;  %v706_v38 = vld [vmem:[#allocation2 + $0x5b0] sm:$0xff] }
  0xb2   :  { %v1584_v55 = vadd.f32 %v1583_v49, %v1553_v25  ;;  %v1616_v36 = vmul.f32 %v3691_v0, %v889_v27  ;;  %v1400_v57 = vrot.slane %v1399_v8, 1  ;;  %v891_v24 = vld [vmem:[#allocation2 + $0x718] sm:$0xff]  ;;  %v1495_v2 = vmul.f32 %v3692_v40, %v704_v31  ;;  %v3693_v5 = vld [vmem:[#allocation72_spill] sm:$0xff]  ;;  %v892_v61 = vld [vmem:[#allocation2 + $0x720] sm:$0xff] }
  0xb3   :  { %v1524_v15 = vadd.f32 %v1523_v39, %v1493_v1  ;;  %v1464_v17 = vadd.f32 %v1463_v18, %v2685_v59  ;;  %v1556_v22 = vmul.f32 %v3693_v5, %v797_v48  ;;  %v3694_v6 = vld [vmem:[#allocation65_spill] sm:$0xff]  ;;  %v3695_v7 = vld [vmem:[#allocation64_spill] sm:$0xff]  ;;  %v3698_v21 = vld [vmem:[#allocation66_spill] sm:$0xff] }
  0xb4   :  { %v1585_v4 = vadd.f32 %v1584_v55, %v1554_v44  ;;  %v1617_v42 = vmul.f32 %v3694_v6, %v890_v37  ;;  %v1401_v41 = vadd.f32 %v1400_v57, %v1399_v8  ;;  %v1496_v20 = vmul.f32 %v3695_v7, %v705_v58  ;;  %v3696_v56 = vld [vmem:[#allocation76_spill] sm:$0xff]  ;;  %v707_v25 = vld [vmem:[#allocation2 + $0x5b8] sm:$0xff]  ;;  %v708_v44 = vld [vmem:[#allocation2 + $0x5c0] sm:$0xff] }
  0xb5   :  { %v1525_v52 = vadd.f32 %v1524_v15, %v1494_v23  ;;  %v1557_v33 = vmul.f32 %v3696_v56, %v798_v46  ;;  %v800_v45 = vld [vmem:[#allocation2 + $0x670] sm:$0xff]  ;;  %v1465_v35 = vadd.f32 %v1464_v17, %v1434_v26  ;;  %v1647_v3 = vadd.f32 %v1616_v36, %v1615_v12  ;;  %v893_v27 = vld [vmem:[#allocation2 + $0x728] sm:$0xff]  ;;  %v801_v23 = vld [vmem:[#allocation2 + $0x678] sm:$0xff] }
  0xb6   :  { %v1586_v1 = vadd.f32 %v1585_v4, %v1555_v62  ;;  %v3697_v13 = vld [vmem:[#allocation69_spill] sm:$0xff]  ;;  %v1402_v59 = vadd.f32 %v1401_v41, %v1300_v50  ;;  %v1497_v31 = vmul.f32 %v3698_v21, %v706_v38  ;;  %v3700_v48 = vld [vmem:[#allocation71_spill] sm:$0xff]  ;;  %v3701_v39 = vld [vmem:[#allocation68_spill] sm:$0xff]  ;;  %v1560_v17 = vmul.f32 %v2396_v14, %v801_v23 }
  0xb7   :  { %v1618_v60 = vmul.f32 %v3697_v13, %v891_v24  ;;  %v1526_v29 = vadd.f32 %v1525_v52, %v1495_v2  ;;  %v3699_v47 = vld [vmem:[#allocation81_spill] sm:$0xff]  ;;  %v1466_v49 = vadd.f32 %v1465_v35, %v1435_v51  ;;  %v1619_v37 = vmul.f32 %v3700_v48, %v892_v61  ;;  %v3702_v58 = vld [vmem:[#allocation82_spill] sm:$0xff]  ;;  %v709_v18 = vld [vmem:[#allocation2 + $0x5c8] sm:$0xff] }
  0xb8   :  { %v1558_v28 = vmul.f32 %v3699_v47, %v799_v54  ;;  %v1587_v8 = vadd.f32 %v1586_v1, %v1556_v22  ;;  %v1648_v9 = vadd.f32 %v1647_v3, %v1617_v42  ;;  %1403 = vadd.xlane.f32.xlu0 %v1402_v59  ;;  %v894_v26 = vld [vmem:[#allocation2 + $0x730] sm:$0xff]  ;;  %v1498_v16 = vmul.f32 %v3701_v39, %v707_v25  ;;  %v3703_v0 = vld [vmem:[#allocation75_spill] sm:$0xff]  ;;  %v895_v57 = vld [vmem:[#allocation2 + $0x738] sm:$0xff] }
  0xb9   :  { %v1527_v62 = vadd.f32 %v1526_v29, %v1496_v20  ;;  %v1559_v46 = vmul.f32 %v3702_v58, %v800_v45  ;;  %v710_v55 = vld [vmem:[#allocation2 + $0x5d0] sm:$0xff]  ;;  %v2721_v34 = vadd.f32 %v1466_v49, %v1436_v53  ;;  %v1620_v36 = vmul.f32 %v3703_v0, %v893_v27  ;;  %v802_v50 = vld [vmem:[#allocation2 + $0x680] sm:$0xff]  ;;  %v711_v15 = vld [vmem:[#allocation2 + $0x5d8] sm:$0xff] }
  0xba   :  { %v1588_v12 = vadd.f32 %v1587_v8, %v1557_v33  ;;  %v1649_v51 = vadd.f32 %v1648_v9, %v1618_v60  ;;  %v1733_v24 = vld [vmem:[#allocation5 + $0x5c0] sm:$0xff]  ;;  %v713_v54 = vld [vmem:[#allocation2 + $0x5e8] sm:$0xff]  ;;  %v1735_v7 = vld [vmem:[#allocation5 + $0x5d0] sm:$0xff] }
  0xbb   :  { %v1499_v40 = vmul.f32 %v1733_v24, %v708_v44  ;;  %v1528_v2 = vadd.f32 %v1527_v62, %v1497_v31  ;;  %v712_v38 = vld [vmem:[#allocation2 + $0x5e0] sm:$0xff]  ;;  %v803_v53 = vld [vmem:[#allocation2 + $0x688] sm:$0xff]  ;;  %v1501_v20 = vmul.f32 %v1735_v7, %v710_v55  ;;  %v714_v56 = vld [vmem:[#allocation2 + $0x5f0] sm:$0xff] }
  0xbc   :  { %v1589_v5 = vadd.f32 %v1588_v12, %v1558_v28  ;;  %v3704_v22 = vld [vmem:[#allocation79_spill] sm:$0xff]  ;;  %v1650_v6 = vadd.f32 %v1649_v51, %v1619_v37  ;;  %v715_v33 = vld [vmem:[#allocation2 + $0x5f8] sm:$0xff]  ;;  %v804_v25 = vld [vmem:[#allocation2 + $0x690] sm:$0xff] }
  0xbd   :  { %v1621_v4 = vmul.f32 %v3704_v22, %v894_v26  ;;  %v896_v42 = vld [vmem:[#allocation2 + $0x740] sm:$0xff]  ;;  %v1734_v41 = vld [vmem:[#allocation5 + $0x5c8] sm:$0xff]  ;;  %v1529_v52 = vadd.f32 %v1528_v2, %v1498_v16  ;;  %v1736_v59 = vld [vmem:[#allocation5 + $0x5d8] sm:$0xff] }
  0xbe   :  { %v1500_v61 = vmul.f32 %v1734_v41, %v709_v18  ;;  %v3705_v45 = vld [vmem:[#allocation83_spill] sm:$0xff]  ;;  %v1590_v1 = vadd.f32 %v1589_v5, %v1559_v46  ;;  %v3706_v13 = vld [vmem:[#allocation84_spill] sm:$0xff]  ;;  %v1651_v14 = vadd.f32 %v1650_v6, %v1620_v36  ;;  %v1502_v27 = vmul.f32 %v1736_v59, %v711_v15  ;;  %v3707_v21 = vld [vmem:[#allocation73_spill] sm:$0xff] }
  0xbf   :  { %v1561_v35 = vmul.f32 %v3705_v45, %v802_v50  ;;  %v1622_v60 = vmul.f32 %v3706_v13, %v895_v57  ;;  %v897_v3 = vld [vmem:[#allocation2 + $0x748] sm:$0xff]  ;;  %v1503_v31 = vmul.f32 %v3707_v21, %v712_v38  ;;  %v3708_v29 = vld [vmem:[#allocation74_spill] sm:$0xff]  ;;  %v1530_v28 = vadd.f32 %v1529_v52, %v1499_v40  ;;  %v3709_v49 = vld [vmem:[#allocation85_spill] sm:$0xff] }
  0xc0   :  { %v1504_v47 = vmul.f32 %v3708_v29, %v713_v54  ;;  %v805_v44 = vld [vmem:[#allocation2 + $0x698] sm:$0xff]  ;;  %v1562_v8 = vmul.f32 %v3709_v49, %v803_v53  ;;  %v1591_v48 = vadd.f32 %v1590_v1, %v1560_v17  ;;  %v3710_v37 = vld [vmem:[#allocation88_spill] sm:$0xff]  ;;  %v1652_v23 = vadd.f32 %v1651_v14, %v1621_v4  ;;  %v2732_v26 = vld [vmem:[#allocation5] sm:$0xff] }
  0xc1   :  { %v1623_v9 = vmul.f32 %v3710_v37, %v896_v42  ;;  %v2734_v39 = vld [vmem:[#allocation5 + $0x8] sm:$0xff]  ;;  %v806_v16 = vld [vmem:[#allocation2 + $0x6a0] sm:$0xff]  ;;  %v898_v62 = vld [vmem:[#allocation2 + $0x750] sm:$0xff]  ;;  %v1531_v12 = vadd.f32 %v1530_v28, %v1500_v61  ;;  %v1468_v57 = vrot.slane %v2721_v34, 4  ;;  %v1624_v40 = vmul.f32 %v2437_v43, %v897_v3 }
  0xc2   :  { %v3711_v58 = vld [vmem:[#allocation77_spill] sm:$0xff]  ;;  %v3712_v18 = vld [vmem:[#allocation78_spill] sm:$0xff]  ;;  %v807_v51 = vld [vmem:[#allocation2 + $0x6a8] sm:$0xff]  ;;  %v1592_v24 = vadd.f32 %v1591_v48, %v1561_v35  ;;  %v1653_v2 = vadd.f32 %v1652_v23, %v1622_v60  ;;  %v1625_v52 = vmul.f32 %v2457_v11, %v898_v62 }
  0xc3   :  { %v2737_v46 = vmul.f32 %v3711_v58, %v714_v56  ;;  %v2740_v55 = vmul.f32 %v3712_v18, %v715_v33  ;;  %v3713_v0 = vld [vmem:[#allocation86_spill] sm:$0xff]  ;;  %v808_v50 = vld [vmem:[#allocation2 + $0x6b0] sm:$0xff]  ;;  %v1532_v54 = vadd.f32 %v1531_v12, %v1501_v20  ;;  %v3714_v17 = vld [vmem:[#allocation87_spill] sm:$0xff]  ;;  %v1469_v59 = vadd.f32 %v1468_v57, %v2721_v34 }
  0xc4   :  { %v1563_v36 = vmul.f32 %v3713_v0, %v804_v25  ;;  %v2745_v15 = vld [vmem:[#allocation5 + $0x10] sm:$0xff]  ;;  %v899_v38 = vld [vmem:[#allocation2 + $0x758] sm:$0xff]  ;;  %v1564_v5 = vmul.f32 %v3714_v17, %v805_v44  ;;  %v1737_v22 = vld [vmem:[#allocation2] sm:$0xff]  ;;  %v1593_v7 = vadd.f32 %v1592_v24, %v1562_v8  ;;  %v1654_v43 = vadd.f32 %v1653_v2, %v1623_v9 }
  0xc5   :  { %v107_v4 = vmul.f32 %v1737_v22, %v2732_v26  ;;  %v1738_v6 = vld [vmem:[#allocation2 + $0x8] sm:$0xff]  ;;  %v809_v42 = vld [vmem:[#allocation2 + $0x6b8] sm:$0xff]  ;;  %v810_v33 = vld [vmem:[#allocation2 + $0x6c0] sm:$0xff]  ;;  %v1533_v20 = vadd.f32 %v1532_v54, %v1502_v27  ;;  %v1626_v29 = vmul.f32 %v2470_v63, %v899_v38  ;;  %v1470_v24 = vrot.slane %v1469_v59, 2 }
  0xc6   :  { %v108_v53 = vmul.f32 %v1738_v6, %v2734_v39  ;;  %v3715_v41 = vld [vmem:[#allocation89_spill] sm:$0xff]  ;;  %v900_v25 = vld [vmem:[#allocation2 + $0x760] sm:$0xff]  ;;  %v811_v3 = vld [vmem:[#allocation2 + $0x6c8] sm:$0xff]  ;;  %v1594_v21 = vadd.f32 %v1593_v7, %v1563_v36  ;;  %v1655_v11 = vadd.f32 %v1654_v43, %v1624_v40  ;;  %v1568_v27 = vmul.f32 %v2447_v19, %v809_v42 }
  0xc7   :  { %v1565_v61 = vmul.f32 %v3715_v41, %v806_v16  ;;  %v2752_v56 = vld [vmem:[#allocation5 + $0x18] sm:$0xff]  ;;  %v3717_v1 = vld [vmem:[#allocation91_spill] sm:$0xff]  ;;  %v1739_v60 = vld [vmem:[#allocation2 + $0x10] sm:$0xff]  ;;  %v1534_v49 = vadd.f32 %v1533_v20, %v1503_v31  ;;  %v2764_v23 = vmul.f32 %v2449_v32, %v810_v33 }
  0xc8   :  { %v3716_v45 = vld [vmem:[#allocation90_spill] sm:$0xff]  ;;  %v1567_v13 = vmul.f32 %v3717_v1, %v808_v50  ;;  %v109_v14 = vmul.f32 %v1739_v60, %v2745_v15  ;;  %v901_v44 = vld [vmem:[#allocation2 + $0x768] sm:$0xff]  ;;  %v139_v37 = vadd.f32 %v108_v53, %v107_v4  ;;  %v812_v9 = vld [vmem:[#allocation2 + $0x6d0] sm:$0xff]  ;;  %v1595_v16 = vadd.f32 %v1594_v21, %v1564_v5 }
  0xc9   :  { %v1566_v35 = vmul.f32 %v3716_v45, %v807_v51  ;;  %v2759_v28 = vld [vmem:[#allocation5 + $0x20] sm:$0xff]  ;;  %v1740_v8 = vld [vmem:[#allocation2 + $0x18] sm:$0xff]  ;;  %v3718_v34 = vld [vmem:[#allocation96_spill] sm:$0xff]  ;;  %v1656_v58 = vadd.f32 %v1655_v11, %v1625_v52  ;;  %v1535_v0 = vadd.f32 %v1534_v49, %v1504_v47 }
  0xca   :  { %v110_v48 = vmul.f32 %v1740_v8, %v2752_v56  ;;  %v1627_v62 = vmul.f32 %v3718_v34, %v900_v25  ;;  %v2767_v63 = vld [vmem:[#allocation5 + $0x28] sm:$0xff]  ;;  %v813_v18 = vld [vmem:[#allocation2 + $0x6d8] sm:$0xff]  ;;  %v902_v12 = vld [vmem:[#allocation2 + $0x770] sm:$0xff]  ;;  %v140_v50 = vadd.f32 %v139_v37, %v109_v14  ;;  %v1596_v32 = vadd.f32 %v1595_v16, %v1565_v61 }
  0xcb   :  { %v3719_v31 = vld [vmem:[#allocation92_spill] sm:$0xff]  ;;  %v1741_v19 = vld [vmem:[#allocation2 + $0x20] sm:$0xff]  ;;  %v1657_v38 = vadd.f32 %v1656_v58, %v1626_v29  ;;  %v903_v17 = vld [vmem:[#allocation2 + $0x778] sm:$0xff]  ;;  %v1536_v5 = vadd.f32 %v1535_v0, %v2737_v46  ;;  %v1629_v52 = vmul.f32 %v2514_v10, %v902_v12  ;;  %v1471_v29 = vadd.f32 %v1470_v24, %v1469_v59 }
  0xcc   :  { %v2770_v36 = vmul.f32 %v3719_v31, %v811_v3  ;;  %v111_v51 = vmul.f32 %v1741_v19, %v2759_v28  ;;  %v814_v57 = vld [vmem:[#allocation2 + $0x6e0] sm:$0xff]  ;;  %v2774_v54 = vld [vmem:[#allocation5 + $0x30] sm:$0xff]  ;;  %v1742_v4 = vld [vmem:[#allocation2 + $0x28] sm:$0xff]  ;;  %v141_v53 = vadd.f32 %v140_v50, %v110_v48  ;;  %v1597_v61 = vadd.f32 %v1596_v32, %v1566_v35 }
  0xcd   :  { %v3720_v40 = vld [vmem:[#allocation99_spill] sm:$0xff]  ;;  %v3721_v22 = vld [vmem:[#allocation93_spill] sm:$0xff]  ;;  %v112_v6 = vmul.f32 %v1742_v4, %v2767_v63  ;;  %v3722_v41 = vld [vmem:[#allocation94_spill] sm:$0xff]  ;;  %v1658_v43 = vadd.f32 %v1657_v38, %v1627_v62  ;;  %v1537_v46 = vadd.f32 %v1536_v5, %v2740_v55  ;;  %v1630_v35 = vmul.f32 %v2523_v30, %v903_v17 }
  0xce   :  { %v1628_v2 = vmul.f32 %v3720_v40, %v901_v44  ;;  %v2778_v47 = vmul.f32 %v3721_v22, %v812_v9  ;;  %v815_v42 = vld [vmem:[#allocation2 + $0x6e8] sm:$0xff]  ;;  %v2782_v7 = vmul.f32 %v3722_v41, %v813_v18  ;;  %v2785_v33 = vld [vmem:[#allocation5 + $0x38] sm:$0xff]  ;;  %v816_v25 = vld [vmem:[#allocation2 + $0x6f0] sm:$0xff]  ;;  %v142_v3 = vadd.f32 %v141_v53, %v111_v51 }
  0xcf   :  { %v904_v20 = vld [vmem:[#allocation2 + $0x780] sm:$0xff]  ;;  %v1743_v60 = vld [vmem:[#allocation2 + $0x30] sm:$0xff]  ;;  %v905_v21 = vld [vmem:[#allocation2 + $0x788] sm:$0xff]  ;;  %v1598_v11 = vadd.f32 %v1597_v61, %v1567_v13  ;;  %v1538_v49 = vrot.slane %v1537_v46, 4  ;;  %v1472_v40 = vrot.slane %v1471_v29, 1 }
  0xd0   :  { %v3723_v45 = vld [vmem:[#allocation95_spill] sm:$0xff]  ;;  %v113_v14 = vmul.f32 %v1743_v60, %v2774_v54  ;;  %v1659_v10 = vadd.f32 %v1658_v43, %v1628_v2  ;;  %v3724_v8 = vld [vmem:[#allocation97_spill] sm:$0xff]  ;;  %v143_v16 = vadd.f32 %v142_v3, %v112_v6  ;;  %v3725_v34 = vld [vmem:[#allocation98_spill] sm:$0xff] }
  0xd1   :  { %v2789_v1 = vmul.f32 %v3723_v45, %v814_v57  ;;  %v2793_v44 = vld [vmem:[#allocation5 + $0x40] sm:$0xff]  ;;  %v2796_v48 = vmul.f32 %v3724_v8, %v815_v42  ;;  %v2798_v55 = vld [vmem:[#allocation5 + $0x48] sm:$0xff]  ;;  %v1744_v37 = vld [vmem:[#allocation2 + $0x38] sm:$0xff]  ;;  %v2802_v62 = vmul.f32 %v3725_v34, %v816_v25  ;;  %v1599_v59 = vadd.f32 %v1598_v11, %v1568_v27 }
  0xd2   :  { %v114_v9 = vmul.f32 %v1744_v37, %v2785_v33  ;;  %v3726_v13 = vld [vmem:[#allocation100_spill] sm:$0xff]  ;;  %v1660_v30 = vadd.f32 %v1659_v10, %v1629_v52  ;;  %v2805_v18 = vld [vmem:[#allocation5 + $0x100] sm:$0xff]  ;;  %v907_v31 = vld [vmem:[#allocation2 + $0x798] sm:$0xff]  ;;  %v1539_v19 = vadd.f32 %v1538_v49, %v1537_v46  ;;  %v144_v32 = vadd.f32 %v143_v16, %v113_v14 }
  0xd3   :  { %v1631_v58 = vmul.f32 %v3726_v13, %v904_v20  ;;  %v2807_v12 = vld [vmem:[#allocation5 + $0x108] sm:$0xff]  ;;  %v906_v0 = vld [vmem:[#allocation2 + $0x790] sm:$0xff]  ;;  %v1745_v57 = vld [vmem:[#allocation2 + $0x40] sm:$0xff]  ;;  %v1600_v2 = vadd.f32 %v1599_v59, %v2764_v23  ;;  %v1473_v37 = vadd.f32 %v1472_v40, %v1471_v29 }
  0xd4   :  { %v3727_v51 = vld [vmem:[#allocation101_spill] sm:$0xff]  ;;  %v115_v24 = vmul.f32 %v1745_v57, %v2793_v44  ;;  %v1661_v27 = vadd.f32 %v1660_v30, %v1630_v35  ;;  %v1746_v17 = vld [vmem:[#allocation2 + $0x48] sm:$0xff]  ;;  %v1540_v4 = vrot.slane %v1539_v19, 2  ;;  %v145_v53 = vadd.f32 %v144_v32, %v114_v9  ;;  %v1747_v42 = vld [vmem:[#allocation2 + $0x100] sm:$0xff] }
  0xd5   :  { %v1632_v50 = vmul.f32 %v3727_v51, %v905_v21  ;;  %v2812_v38 = vld [vmem:[#allocation5 + $0x50] sm:$0xff]  ;;  %v116_v5 = vmul.f32 %v1746_v17, %v2798_v55  ;;  %v2817_v6 = vld [vmem:[#allocation5 + $0x58] sm:$0xff]  ;;  %v241_v41 = vmul.f32 %v1747_v42, %v2805_v18  ;;  %v1748_v61 = vld [vmem:[#allocation2 + $0x108] sm:$0xff]  ;;  %v1601_v23 = vadd.f32 %v1600_v2, %v2770_v36 }
  0xd6   :  { %v2815_v22 = vld [vmem:[#allocation5 + $0x110] sm:$0xff]  ;;  %v242_v52 = vmul.f32 %v1748_v61, %v2807_v12  ;;  %v3728_v43 = vld [vmem:[#allocation102_spill] sm:$0xff]  ;;  %v3729_v20 = vld [vmem:[#allocation103_spill] sm:$0xff]  ;;  %v1662_v45 = vadd.f32 %v1661_v27, %v1631_v58  ;;  %v1541_v3 = vadd.f32 %v1540_v4, %v1539_v19  ;;  %v146_v10 = vadd.f32 %v145_v53, %v115_v24 }
  0xd7   :  { %v1633_v25 = vmul.f32 %v3728_v43, %v906_v0  ;;  %v1634_v46 = vmul.f32 %v3729_v20, %v907_v31  ;;  %v2824_v60 = vld [vmem:[#allocation5 + $0x118] sm:$0xff]  ;;  %v908_v14 = vld [vmem:[#allocation2 + $0x7a0] sm:$0xff]  ;;  %v1749_v11 = vld [vmem:[#allocation2 + $0x50] sm:$0xff]  ;;  %v1602_v36 = vadd.f32 %v1601_v23, %v2778_v47 }
  0xd8   :  { %v2826_v21 = vld [vmem:[#allocation5 + $0x60] sm:$0xff]  ;;  %v117_v35 = vmul.f32 %v1749_v11, %v2812_v38  ;;  %v1750_v49 = vld [vmem:[#allocation2 + $0x110] sm:$0xff]  ;;  %v1663_v9 = vadd.f32 %v1662_v45, %v1632_v50  ;;  %v1751_v16 = vld [vmem:[#allocation2 + $0x58] sm:$0xff]  ;;  %v1542_v58 = vrot.slane %v1541_v3, 1  ;;  %v147_v0 = vadd.f32 %v146_v10, %v116_v5 }
  0xd9   :  { %v243_v8 = vmul.f32 %v1750_v49, %v2815_v22  ;;  %v118_v34 = vmul.f32 %v1751_v16, %v2817_v6  ;;  %v2832_v59 = vld [vmem:[#allocation5 + $0x120] sm:$0xff]  ;;  %v909_v13 = vld [vmem:[#allocation2 + $0x7a8] sm:$0xff]  ;;  %v1752_v31 = vld [vmem:[#allocation2 + $0x118] sm:$0xff]  ;;  %v273_v51 = vadd.f32 %v242_v52, %v241_v41  ;;  %v1603_v57 = vadd.f32 %v1602_v36, %v2782_v7 }
  0xda   :  { %v2834_v30 = vld [vmem:[#allocation5 + $0x68] sm:$0xff]  ;;  %v244_v19 = vmul.f32 %v1752_v31, %v2824_v60  ;;  %v1664_v47 = vadd.f32 %v1663_v9, %v1633_v25  ;;  %v1753_v50 = vld [vmem:[#allocation2 + $0x60] sm:$0xff]  ;;  %v817_v2 = vld [vmem:[#allocation2 + $0x6f8] sm:$0xff]  ;;  %v1543_v17 = vadd.f32 %v1542_v58, %v1541_v3  ;;  %v148_v4 = vadd.f32 %v147_v0, %v117_v35 }
  0xdb   :  { %v3730_v29 = vld [vmem:[#allocation104_spill] sm:$0xff]  ;;  %v119_v32 = vmul.f32 %v1753_v50, %v2826_v21  ;;  %v1754_v53 = vld [vmem:[#allocation2 + $0x120] sm:$0xff]  ;;  %v274_v42 = vadd.f32 %v273_v51, %v243_v8  ;;  %v1604_v41 = vadd.f32 %v1603_v57, %v2789_v1  ;;  %v3731_v61 = vld [vmem:[#allocation105_spill] sm:$0xff] }
  0xdc   :  { %v1635_v24 = vmul.f32 %v3730_v29, %v908_v14  ;;  %v2840_v40 = vld [vmem:[#allocation5 + $0x128] sm:$0xff]  ;;  %v910_v27 = vld [vmem:[#allocation2 + $0x7b0] sm:$0xff]  ;;  %v245_v5 = vmul.f32 %v1754_v53, %v2832_v59  ;;  %v1636_v7 = vmul.f32 %v3731_v61, %v909_v13  ;;  %v1665_v52 = vadd.f32 %v1664_v47, %v1634_v46  ;;  %v911_v45 = vld [vmem:[#allocation2 + $0x7b8] sm:$0xff] }
  0xdd   :  { %v2845_v23 = vld [vmem:[#allocation5 + $0x70] sm:$0xff]  ;;  %v1755_v43 = vld [vmem:[#allocation2 + $0x68] sm:$0xff]  ;;  %v2850_v14 = vadd.f32 %v1543_v17, %v1473_v37  ;;  %v149_v3 = vadd.f32 %v148_v4, %v118_v34  ;;  %v275_v10 = vadd.f32 %v274_v42, %v244_v19  ;;  %v1757_v49 = vld [vmem:[#allocation5 + $0x6f8] sm:$0xff]  ;;  %v1605_v8 = vadd.f32 %v1604_v41, %v2796_v48 }
  0xde   :  { %v120_v25 = vmul.f32 %v1755_v43, %v2834_v30  ;;  %v2848_v20 = vld [vmem:[#allocation5 + $0x130] sm:$0xff]  ;;  %v1756_v11 = vld [vmem:[#allocation2 + $0x128] sm:$0xff]  ;;  %v1576_v1 = vmul.f32 %v1757_v49, %v817_v2  ;;  %v3732_v46 = vld [vmem:[#allocation106_spill] sm:$0xff]  ;;  %v1666_v9 = vadd.f32 %v1665_v52, %v1635_v24 }
  0xdf   :  { %v246_v35 = vmul.f32 %v1756_v11, %v2840_v40  ;;  %v1637_v36 = vmul.f32 %v3732_v46, %v910_v27  ;;  %v2855_v16 = vld [vmem:[#allocation5 + $0x78] sm:$0xff]  ;;  %v912_v58 = vld [vmem:[#allocation2 + $0x7c0] sm:$0xff]  ;;  %v913_v0 = vld [vmem:[#allocation2 + $0x7c8] sm:$0xff]  ;;  %v150_v31 = vadd.f32 %v149_v3, %v119_v32  ;;  %v276_v57 = vadd.f32 %v275_v10, %v245_v5 }
  0xe0   :  { %v2857_v13 = vld [vmem:[#allocation5 + $0x138] sm:$0xff]  ;;  %v1758_v37 = vld [vmem:[#allocation2 + $0x70] sm:$0xff]  ;;  %v1606_v29 = vadd.f32 %v1605_v8, %v2802_v62  ;;  %v3733_v48 = vld [vmem:[#allocation107_spill] sm:$0xff]  ;;  %v1667_v50 = vadd.f32 %v1666_v9, %v1636_v7 }
  0xe1   :  { %v121_v34 = vmul.f32 %v1758_v37, %v2845_v23  ;;  %v1759_v51 = vld [vmem:[#allocation2 + $0x130] sm:$0xff]  ;;  %v1638_v47 = vmul.f32 %v3733_v48, %v911_v45  ;;  %v2863_v24 = vld [vmem:[#allocation5 + $0x80] sm:$0xff]  ;;  %v915_v17 = vld [vmem:[#allocation2 + $0x7d8] sm:$0xff]  ;;  %v151_v42 = vadd.f32 %v150_v31, %v120_v25  ;;  %v277_v61 = vadd.f32 %v276_v57, %v246_v35 }
  0xe2   :  { %v247_v19 = vmul.f32 %v1759_v51, %v2848_v20  ;;  %v2865_v2 = vld [vmem:[#allocation5 + $0x140] sm:$0xff]  ;;  %v914_v27 = vld [vmem:[#allocation2 + $0x7d0] sm:$0xff]  ;;  %v1760_v4 = vld [vmem:[#allocation2 + $0x78] sm:$0xff]  ;;  %v1607_v5 = vadd.f32 %v1606_v29, %v1576_v1  ;;  %v1668_v7 = vadd.f32 %v1667_v50, %v1637_v36 }
  0xe3   :  { %v122_v53 = vmul.f32 %v1760_v4, %v2855_v16  ;;  %v1761_v32 = vld [vmem:[#allocation2 + $0x138] sm:$0xff]  ;;  %v3734_v52 = vld [vmem:[#allocation108_spill] sm:$0xff]  ;;  %v1762_v10 = vld [vmem:[#allocation2 + $0x80] sm:$0xff]  ;;  %v152_v8 = vadd.f32 %v151_v42, %v121_v34 }
  0xe4   :  { %v248_v41 = vmul.f32 %v1761_v32, %v2857_v13  ;;  %v1639_v62 = vmul.f32 %v3734_v52, %v912_v58  ;;  %v3735_v43 = vld [vmem:[#allocation109_spill] sm:$0xff]  ;;  %v2871_v3 = vld [vmem:[#allocation5 + $0x88] sm:$0xff]  ;;  %v123_v49 = vmul.f32 %v1762_v10, %v2863_v24  ;;  %v1763_v46 = vld [vmem:[#allocation2 + $0x140] sm:$0xff]  ;;  %v278_v9 = vadd.f32 %v277_v61, %v247_v19 }
  0xe5   :  { %v1640_v45 = vmul.f32 %v3735_v43, %v913_v0  ;;  %3736 = vst [vmem:[#allocation53_spill] sm:$0xff] %v2871_v3  ;;  %v2873_v11 = vld [vmem:[#allocation5 + $0x148] sm:$0xff]  ;;  %v249_v25 = vmul.f32 %v1763_v46, %v2865_v2  ;;  %v2877_v37 = vld [vmem:[#allocation5 + $0x200] sm:$0xff]  ;;  %v1608_v1 = vrot.slane %v1607_v5, 4  ;;  %v1669_v51 = vadd.f32 %v1668_v7, %v1638_v47  ;;  %v2883_v57 = vld [vmem:[#allocation5 + $0x90] sm:$0xff] }
  0xe6   :  { %3737 = vst [vmem:[#allocation16_spill] sm:$0xff] %v2873_v11  ;;  %3738 = vst [vmem:[#allocation80_spill] sm:$0xff] %v2877_v37  ;;  %v2879_v35 = vld [vmem:[#allocation5 + $0x208] sm:$0xff]  ;;  %v3740_v58 = vld [vmem:[#allocation110_spill] sm:$0xff]  ;;  %v153_v4 = vadd.f32 %v152_v8, %v122_v53  ;;  %v279_v32 = vadd.f32 %v278_v9, %v248_v41 }
  0xe7   :  { %3739 = vst [vmem:[#allocation18_spill] sm:$0xff] %v2879_v35  ;;  %v1641_v0 = vmul.f32 %v3740_v58, %v914_v27  ;;  %v3741_v36 = vld [vmem:[#allocation11_spill] sm:$0xff]  ;;  %3742 = vst [vmem:[#allocation12_spill] sm:$0xff] %v2883_v57  ;;  %v2885_v29 = vld [vmem:[#allocation5 + $0x150] sm:$0xff]  ;;  %v1609_v27 = vadd.f32 %v1608_v1, %v1607_v5  ;;  %v1670_v43 = vadd.f32 %v1669_v51, %v1639_v62 }
  0xe8   :  { %v1642_v31 = vmul.f32 %v3741_v36, %v915_v17  ;;  %3743 = vst [vmem:[#allocation13_spill] sm:$0xff] %v2885_v29  ;;  %v916_v48 = vld [vmem:[#allocation2 + $0x7e0] sm:$0xff]  ;;  %v1764_v34 = vld [vmem:[#allocation2 + $0x88] sm:$0xff]  ;;  %v2889_v61 = vld [vmem:[#allocation5 + $0x210] sm:$0xff]  ;;  %v154_v8 = vadd.f32 %v153_v4, %v123_v49  ;;  %v280_v9 = vadd.f32 %v279_v32, %v249_v25 }
  0xe9   :  { %v124_v50 = vmul.f32 %v1764_v34, %v2871_v3  ;;  %v1765_v19 = vld [vmem:[#allocation2 + $0x148] sm:$0xff]  ;;  %3744 = vst [vmem:[#allocation59_spill] sm:$0xff] %v2889_v61  ;;  %v2891_v17 = vld [vmem:[#allocation5 + $0x158] sm:$0xff]  ;;  %v1766_v47 = vld [vmem:[#allocation2 + $0x200] sm:$0xff]  ;;  %v1610_v5 = vrot.slane %v1609_v27, 2  ;;  %v1671_v51 = vadd.f32 %v1670_v43, %v1640_v45 }
  0xea   :  { %v250_v42 = vmul.f32 %v1765_v19, %v2873_v11  ;;  %v917_v52 = vld [vmem:[#allocation2 + $0x7e8] sm:$0xff]  ;;  %3745 = vst [vmem:[#allocation20_spill] sm:$0xff] %v2891_v17  ;;  %v375_v7 = vmul.f32 %v1766_v47, %v2877_v37  ;;  %v1768_v58 = vld [vmem:[#allocation2 + $0x90] sm:$0xff]  ;;  %v2897_v34 = vld [vmem:[#allocation5 + $0x218] sm:$0xff] }
  0xeb   :  { %v1767_v10 = vld [vmem:[#allocation2 + $0x208] sm:$0xff]  ;;  %v125_v53 = vmul.f32 %v1768_v58, %v2883_v57  ;;  %v1769_v36 = vld [vmem:[#allocation2 + $0x150] sm:$0xff]  ;;  %3746 = vst [vmem:[#allocation14_spill] sm:$0xff] %v2897_v34  ;;  %v1770_v62 = vld [vmem:[#allocation5 + $0x7e0] sm:$0xff]  ;;  %v155_v49 = vadd.f32 %v154_v8, %v124_v50  ;;  %v1672_v45 = vadd.f32 %v1671_v51, %v1641_v0 }
  0xec   :  { %v376_v46 = vmul.f32 %v1767_v10, %v2879_v35  ;;  %v251_v41 = vmul.f32 %v1769_v36, %v2885_v29  ;;  %v1643_v1 = vmul.f32 %v1770_v62, %v916_v48  ;;  %v2899_v19 = vld [vmem:[#allocation5 + $0x98] sm:$0xff]  ;;  %v2901_v47 = vld [vmem:[#allocation5 + $0x160] sm:$0xff]  ;;  %v1771_v37 = vld [vmem:[#allocation2 + $0x210] sm:$0xff]  ;;  %v281_v25 = vadd.f32 %v280_v9, %v250_v42 }
  0xed   :  { %3747 = vst [vmem:[#allocation22_spill] sm:$0xff] %v2899_v19  ;;  %3748 = vst [vmem:[#allocation15_spill] sm:$0xff] %v2901_v47  ;;  %v377_v10 = vmul.f32 %v1771_v37, %v2889_v61  ;;  %v1772_v35 = vld [vmem:[#allocation5 + $0x7e8] sm:$0xff]  ;;  %v1773_v4 = vld [vmem:[#allocation2 + $0x158] sm:$0xff]  ;;  %v1611_v48 = vadd.f32 %v1610_v5, %v1609_v27  ;;  %v156_v50 = vadd.f32 %v155_v49, %v125_v53 }
  0xee   :  { %v1644_v58 = vmul.f32 %v1772_v35, %v917_v52  ;;  %v252_v36 = vmul.f32 %v1773_v4, %v2891_v17  ;;  %v2905_v32 = vld [vmem:[#allocation5 + $0x220] sm:$0xff]  ;;  %v918_v57 = vld [vmem:[#allocation2 + $0x7f0] sm:$0xff]  ;;  %v919_v29 = vld [vmem:[#allocation2 + $0x7f8] sm:$0xff]  ;;  %v407_v3 = vadd.f32 %v376_v46, %v375_v7  ;;  %v282_v42 = vadd.f32 %v281_v25, %v251_v41 }
  0xef   :  { %3749 = vst [vmem:[#allocation60_spill] sm:$0xff] %v2905_v32  ;;  %v2907_v43 = vld [vmem:[#allocation5 + $0x168] sm:$0xff]  ;;  %v1774_v62 = vld [vmem:[#allocation2 + $0x218] sm:$0xff]  ;;  %v1776_v52 = vld [vmem:[#allocation2 + $0x160] sm:$0xff]  ;;  %v1612_v4 = vrot.slane %v1611_v48, 1  ;;  %v1673_v61 = vadd.f32 %v1672_v45, %v1642_v31 }
  0xf0   :  { %v378_v11 = vmul.f32 %v1774_v62, %v2897_v34  ;;  %v1775_v37 = vld [vmem:[#allocation2 + $0x98] sm:$0xff]  ;;  %v253_v8 = vmul.f32 %v1776_v52, %v2901_v47  ;;  %v2912_v9 = vld [vmem:[#allocation5 + $0x228] sm:$0xff]  ;;  %v2914_v27 = vld [vmem:[#allocation5 + $0xa0] sm:$0xff]  ;;  %v408_v7 = vadd.f32 %v407_v3, %v377_v10  ;;  %v283_v41 = vadd.f32 %v282_v42, %v252_v36 }
  0xf1   :  { %v126_v35 = vmul.f32 %v1775_v37, %v2899_v19  ;;  %3750 = vst [vmem:[#allocation24_spill] sm:$0xff] %v2912_v9  ;;  %3751 = vst [vmem:[#allocation17_spill] sm:$0xff] %v2914_v27  ;;  %v2916_v0 = vld [vmem:[#allocation5 + $0x170] sm:$0xff]  ;;  %v1777_v5 = vld [vmem:[#allocation2 + $0x220] sm:$0xff]  ;;  %v1613_v19 = vadd.f32 %v1612_v4, %v1611_v48  ;;  %v1674_v31 = vadd.f32 %v1673_v61, %v1643_v1 }
  0xf2   :  { %3752 = vst [vmem:[#allocation26_spill] sm:$0xff] %v2916_v0  ;;  %v379_v51 = vmul.f32 %v1777_v5, %v2905_v32  ;;  %v1778_v46 = vld [vmem:[#allocation5 + $0x7f0] sm:$0xff]  ;;  %v1779_v37 = vld [vmem:[#allocation5 + $0x7f8] sm:$0xff]  ;;  %v1780_v49 = vld [vmem:[#allocation2 + $0x168] sm:$0xff]  ;;  %v409_v17 = vadd.f32 %v408_v7, %v378_v11 }
  0xf3   :  { %v1645_v62 = vmul.f32 %v1778_v46, %v918_v57  ;;  %v1646_v53 = vmul.f32 %v1779_v37, %v919_v29  ;;  %v254_v52 = vmul.f32 %v1780_v49, %v2907_v43  ;;  %v2920_v25 = vld [vmem:[#allocation5 + $0x230] sm:$0xff]  ;;  %v2922_v45 = vld [vmem:[#allocation5 + $0x178] sm:$0xff]  ;;  %v1781_v34 = vld [vmem:[#allocation2 + $0x228] sm:$0xff]  ;;  %v157_v57 = vadd.f32 %v156_v50, %v126_v35 }
  0xf4   :  { %3753 = vst [vmem:[#allocation27_spill] sm:$0xff] %v2920_v25  ;;  %3754 = vst [vmem:[#allocation28_spill] sm:$0xff] %v2922_v45  ;;  %v380_v47 = vmul.f32 %v1781_v34, %v2912_v9  ;;  %v1782_v5 = vld [vmem:[#allocation2 + $0xa0] sm:$0xff]  ;;  %v1783_v10 = vld [vmem:[#allocation2 + $0x170] sm:$0xff]  ;;  %v284_v46 = vadd.f32 %v283_v41, %v253_v8  ;;  %v2930_v36 = vadd.f32 %v1613_v19, %v2850_v14 }
  0xf5   :  { %v127_v3 = vmul.f32 %v1782_v5, %v2914_v27  ;;  %v255_v29 = vmul.f32 %v1783_v10, %v2916_v0  ;;  %v2927_v37 = vld [vmem:[#allocation5 + $0x238] sm:$0xff]  ;;  %v1675_v61 = vadd.f32 %v1674_v31, %v1644_v58  ;;  %v2932_v1 = vld [vmem:[#allocation5 + $0xa8] sm:$0xff]  ;;  %v2934_v48 = vld [vmem:[#allocation5 + $0x180] sm:$0xff]  ;;  %v410_v42 = vadd.f32 %v409_v17, %v379_v51 }
  0xf6   :  { %3755 = vst [vmem:[#allocation19_spill] sm:$0xff] %v2927_v37  ;;  %3756 = vst [vmem:[#allocation29_spill] sm:$0xff] %v2932_v1  ;;  %v1784_v34 = vld [vmem:[#allocation2 + $0x230] sm:$0xff]  ;;  %v1785_v4 = vld [vmem:[#allocation2 + $0x178] sm:$0xff]  ;;  %v285_v50 = vadd.f32 %v284_v46, %v254_v52 }
  0xf7   :  { %3757 = vst [vmem:[#allocation21_spill] sm:$0xff] %v2934_v48  ;;  %v381_v11 = vmul.f32 %v1784_v34, %v2920_v25  ;;  %v256_v35 = vmul.f32 %v1785_v4, %v2922_v45  ;;  %v2938_v7 = vld [vmem:[#allocation5 + $0x240] sm:$0xff]  ;;  %v1676_v8 = vadd.f32 %v1675_v61, %v1645_v62  ;;  %v2940_v49 = vld [vmem:[#allocation5 + $0x188] sm:$0xff]  ;;  %v1786_v14 = vld [vmem:[#allocation2 + $0x238] sm:$0xff]  ;;  %v411_v58 = vadd.f32 %v410_v42, %v380_v47 }
  0xf8   :  { %3758 = vst [vmem:[#allocation31_spill] sm:$0xff] %v2938_v7  ;;  %3759 = vst [vmem:[#allocation32_spill] sm:$0xff] %v2940_v49  ;;  %v382_v19 = vmul.f32 %v1786_v14, %v2927_v37  ;;  %v2943_v41 = vld [vmem:[#allocation5 + $0xb0] sm:$0xff]  ;;  %v1787_v31 = vld [vmem:[#allocation2 + $0xa8] sm:$0xff]  ;;  %v158_v10 = vadd.f32 %v157_v57, %v127_v3  ;;  %v286_v34 = vadd.f32 %v285_v50, %v255_v29 }
  0xf9   :  { %3760 = vst [vmem:[#allocation33_spill] sm:$0xff] %v2943_v41  ;;  %v128_v5 = vmul.f32 %v1787_v31, %v2932_v1  ;;  %v1788_v17 = vld [vmem:[#allocation2 + $0x180] sm:$0xff]  ;;  %v2947_v52 = vld [vmem:[#allocation5 + $0x248] sm:$0xff]  ;;  %v1677_v46 = vadd.f32 %v1676_v8, %v1646_v53  ;;  %v2949_v62 = vld [vmem:[#allocation5 + $0x190] sm:$0xff]  ;;  %v412_v42 = vadd.f32 %v411_v58, %v381_v11 }
  0xfa   :  { %v257_v51 = vmul.f32 %v1788_v17, %v2934_v48  ;;  %3761 = vst [vmem:[#allocation23_spill] sm:$0xff] %v2947_v52  ;;  %3762 = vst [vmem:[#allocation36_spill] sm:$0xff] %v2949_v62  ;;  %v2951_v61 = vld [vmem:[#allocation5 + $0x250] sm:$0xff]  ;;  %v1789_v4 = vld [vmem:[#allocation2 + $0x240] sm:$0xff]  ;;  %v287_v31 = vadd.f32 %v286_v34, %v256_v35 }
  0xfb   :  { %3763 = vst [vmem:[#allocation25_spill] sm:$0xff] %v2951_v61  ;;  %v383_v47 = vmul.f32 %v1789_v4, %v2938_v7  ;;  %v1790_v14 = vld [vmem:[#allocation2 + $0x188] sm:$0xff]  ;;  %v2955_v3 = vld [vmem:[#allocation5 + $0x300] sm:$0xff]  ;;  %v1678_v29 = vrot.slane %v1677_v46, 4  ;;  %v2959_v50 = vld [vmem:[#allocation5 + $0xb8] sm:$0xff]  ;;  %v413_v11 = vadd.f32 %v412_v42, %v382_v19  ;;  %v159_v58 = vadd.f32 %v158_v10, %v128_v5 }
  0xfc   :  { %v258_v37 = vmul.f32 %v1790_v14, %v2940_v49  ;;  %3764 = vst [vmem:[#allocation37_spill] sm:$0xff] %v2955_v3  ;;  %v2957_v57 = vld [vmem:[#allocation5 + $0x308] sm:$0xff]  ;;  %3766 = vst [vmem:[#allocation41_spill] sm:$0xff] %v2959_v50  ;;  %v1791_v53 = vld [vmem:[#allocation2 + $0xb0] sm:$0xff]  ;;  %v288_v34 = vadd.f32 %v287_v31, %v257_v51 }
  0xfd   :  { %3765 = vst [vmem:[#allocation38_spill] sm:$0xff] %v2957_v57  ;;  %v129_v8 = vmul.f32 %v1791_v53, %v2943_v41  ;;  %v2962_v17 = vld [vmem:[#allocation5 + $0x198] sm:$0xff]  ;;  %v1792_v1 = vld [vmem:[#allocation2 + $0x248] sm:$0xff]  ;;  %v1793_v7 = vld [vmem:[#allocation2 + $0x190] sm:$0xff]  ;;  %v1679_v45 = vadd.f32 %v1678_v29, %v1677_v46  ;;  %v414_v27 = vadd.f32 %v413_v11, %v383_v47 }
  0xfe   :  { %3767 = vst [vmem:[#allocation42_spill] sm:$0xff] %v2962_v17  ;;  %v384_v4 = vmul.f32 %v1792_v1, %v2947_v52  ;;  %v259_v35 = vmul.f32 %v1793_v7, %v2949_v62  ;;  %v2966_v14 = vld [vmem:[#allocation5 + $0x258] sm:$0xff]  ;;  %v1794_v49 = vld [vmem:[#allocation2 + $0x250] sm:$0xff]  ;;  %v2971_v53 = vld [vmem:[#allocation5 + $0x1a0] sm:$0xff]  ;;  %v289_v31 = vadd.f32 %v288_v34, %v258_v37 }
  0xff   :  { %3768 = vst [vmem:[#allocation43_spill] sm:$0xff] %v2966_v14  ;;  %v385_v48 = vmul.f32 %v1794_v49, %v2951_v61  ;;  %v2969_v25 = vld [vmem:[#allocation5 + $0x310] sm:$0xff]  ;;  %3770 = vst [vmem:[#allocation34_spill] sm:$0xff] %v2971_v53  ;;  %v2973_v41 = vld [vmem:[#allocation5 + $0x260] sm:$0xff]  ;;  %v1680_v46 = vrot.slane %v1679_v45, 2 }
 0x100   :  { %3769 = vst [vmem:[#allocation30_spill] sm:$0xff] %v2969_v25  ;;  %3771 = vst [vmem:[#allocation46_spill] sm:$0xff] %v2973_v41  ;;  %v1795_v1 = vld [vmem:[#allocation2 + $0x300] sm:$0xff]  ;;  %v1796_v5 = vld [vmem:[#allocation2 + $0x308] sm:$0xff]  ;;  %v290_v34 = vadd.f32 %v289_v31, %v259_v35 }
 0x101   :  { %v509_v19 = vmul.f32 %v1795_v1, %v2955_v3  ;;  %v510_v7 = vmul.f32 %v1796_v5, %v2957_v57  ;;  %v1797_v10 = vld [vmem:[#allocation2 + $0xb8] sm:$0xff]  ;;  %v2981_v29 = vld [vmem:[#allocation5 + $0xc0] sm:$0xff]  ;;  %v2983_v52 = vld [vmem:[#allocation5 + $0x1a8] sm:$0xff]  ;;  %v415_v5 = vadd.f32 %v414_v27, %v384_v4  ;;  %v1681_v9 = vadd.f32 %v1680_v46, %v1679_v45 }
 0x102   :  { %v130_v51 = vmul.f32 %v1797_v10, %v2959_v50  ;;  %v1798_v42 = vld [vmem:[#allocation2 + $0x198] sm:$0xff]  ;;  %3773 = vst [vmem:[#allocation39_spill] sm:$0xff] %v2981_v29  ;;  %3774 = vst [vmem:[#allocation44_spill] sm:$0xff] %v2983_v52  ;;  %v2985_v47 = vld [vmem:[#allocation5 + $0x268] sm:$0xff]  ;;  %v160_v50 = vadd.f32 %v159_v58, %v129_v8 }
 0x103   :  { %v260_v49 = vmul.f32 %v1798_v42, %v2962_v17  ;;  %v2979_v61 = vld [vmem:[#allocation5 + $0x318] sm:$0xff]  ;;  %3775 = vst [vmem:[#allocation40_spill] sm:$0xff] %v2985_v47  ;;  %v1800_v57 = vld [vmem:[#allocation2 + $0x310] sm:$0xff]  ;;  %v1801_v3 = vld [vmem:[#allocation2 + $0x1a0] sm:$0xff]  ;;  %v1682_v46 = vrot.slane %v1681_v9, 1 }
 0x104   :  { %3772 = vst [vmem:[#allocation35_spill] sm:$0xff] %v2979_v61  ;;  %v1799_v11 = vld [vmem:[#allocation2 + $0x258] sm:$0xff]  ;;  %v511_v10 = vmul.f32 %v1800_v57, %v2969_v25  ;;  %v261_v37 = vmul.f32 %v1801_v3, %v2971_v53  ;;  %v1802_v42 = vld [vmem:[#allocation2 + $0x260] sm:$0xff]  ;;  %v2993_v0 = vld [vmem:[#allocation5 + $0x1b0] sm:$0xff]  ;;  %v541_v57 = vadd.f32 %v510_v7, %v509_v19 }
 0x105   :  { %v386_v1 = vmul.f32 %v1799_v11, %v2966_v14  ;;  %v387_v17 = vmul.f32 %v1802_v42, %v2973_v41  ;;  %v2991_v62 = vld [vmem:[#allocation5 + $0x320] sm:$0xff]  ;;  %3777 = vst [vmem:[#allocation45_spill] sm:$0xff] %v2993_v0  ;;  %v2995_v32 = vld [vmem:[#allocation5 + $0x270] sm:$0xff]  ;;  %v416_v11 = vadd.f32 %v415_v5, %v385_v48  ;;  %v1803_v27 = vld [vmem:[#allocation2 + $0x318] sm:$0xff]  ;;  %v291_v31 = vadd.f32 %v290_v34, %v260_v49 }
 0x106   :  { %3776 = vst [vmem:[#allocation47_spill] sm:$0xff] %v2991_v62  ;;  %3778 = vst [vmem:[#allocation49_spill] sm:$0xff] %v2995_v32  ;;  %v512_v4 = vmul.f32 %v1803_v27, %v2979_v61  ;;  %v1804_v8 = vld [vmem:[#allocation2 + $0xc0] sm:$0xff]  ;;  %v1805_v3 = vld [vmem:[#allocation2 + $0x1a8] sm:$0xff]  ;;  %v1683_v61 = vadd.f32 %v1682_v46, %v1681_v9 }
 0x107   :  { %v131_v58 = vmul.f32 %v1804_v8, %v2981_v29  ;;  %v262_v35 = vmul.f32 %v1805_v3, %v2983_v52  ;;  %v1806_v42 = vld [vmem:[#allocation2 + $0x268] sm:$0xff]  ;;  %v3005_v48 = vld [vmem:[#allocation5 + $0x1b8] sm:$0xff]  ;;  %v417_v19 = vadd.f32 %v416_v11, %v386_v1  ;;  %v1807_v7 = vld [vmem:[#allocation2 + $0x320] sm:$0xff]  ;;  %v542_v8 = vadd.f32 %v541_v57, %v511_v10 }
 0x108   :  { %v388_v41 = vmul.f32 %v1806_v42, %v2985_v47  ;;  %v3001_v45 = vld [vmem:[#allocation5 + $0x328] sm:$0xff]  ;;  %3781 = vst [vmem:[#allocation48_spill] sm:$0xff] %v3005_v48  ;;  %v3007_v5 = vld [vmem:[#allocation5 + $0x278] sm:$0xff]  ;;  %v513_v27 = vmul.f32 %v1807_v7, %v2991_v62  ;;  %v161_v29 = vadd.f32 %v160_v50, %v130_v51  ;;  %v1808_v3 = vld [vmem:[#allocation2 + $0x1b0] sm:$0xff]  ;;  %v292_v34 = vadd.f32 %v291_v31, %v261_v37 }
 0x109   :  { %3779 = vst [vmem:[#allocation52_spill] sm:$0xff] %v3001_v45  ;;  %v3003_v14 = vld [vmem:[#allocation5 + $0xc8] sm:$0xff]  ;;  %3782 = vst [vmem:[#allocation55_spill] sm:$0xff] %v3007_v5  ;;  %v263_v49 = vmul.f32 %v1808_v3, %v2993_v0  ;;  %v1809_v42 = vld [vmem:[#allocation2 + $0x270] sm:$0xff]  ;;  %v418_v1 = vadd.f32 %v417_v19, %v387_v17  ;;  %v543_v10 = vadd.f32 %v542_v8, %v512_v4 }
 0x10a   :  { %3780 = vst [vmem:[#allocation50_spill] sm:$0xff] %v3003_v14  ;;  %v389_v47 = vmul.f32 %v1809_v42, %v2995_v32  ;;  %v3012_v52 = vld [vmem:[#allocation5 + $0x330] sm:$0xff]  ;;  %v3016_v25 = vld [vmem:[#allocation5 + $0x1c0] sm:$0xff]  ;;  %v1810_v11 = vld [vmem:[#allocation2 + $0x328] sm:$0xff]  ;;  %v293_v31 = vadd.f32 %v292_v34, %v262_v35  ;;  %v1684_v17 = vadd.f32 %v1683_v61, %v2930_v36 }
 0x10b   :  { %3783 = vst [vmem:[#allocation51_spill] sm:$0xff] %v3012_v52  ;;  %v3014_v53 = vld [vmem:[#allocation5 + $0xd0] sm:$0xff]  ;;  %3785 = vst [vmem:[#allocation56_spill] sm:$0xff] %v3016_v25  ;;  %v514_v7 = vmul.f32 %v1810_v11, %v3001_v45  ;;  %v1811_v50 = vld [vmem:[#allocation2 + $0xc8] sm:$0xff]  ;;  %v419_v8 = vadd.f32 %v418_v1, %v388_v41  ;;  %v544_v35 = vadd.f32 %v543_v10, %v513_v27 }
 0x10c   :  { %3784 = vst [vmem:[#allocation54_spill] sm:$0xff] %v3014_v53  ;;  %v132_v51 = vmul.f32 %v1811_v50, %v3003_v14  ;;  %v1812_v57 = vld [vmem:[#allocation2 + $0x1b8] sm:$0xff]  ;;  %v3021_v3 = vld [vmem:[#allocation5 + $0x280] sm:$0xff]  ;;  %v3031_v4 = vld [vmem:[#allocation5 + $0x1c8] sm:$0xff]  ;;  %v294_v36 = vadd.f32 %v293_v31, %v263_v49  ;;  %1685 = vadd.xlane.f32.xlu0 %v1684_v17 }
 0x10d   :  { %v264_v37 = vmul.f32 %v1812_v57, %v3005_v48  ;;  %3786 = vst [vmem:[#allocation62_spill] sm:$0xff] %v3021_v3  ;;  %v1813_v42 = vld [vmem:[#allocation2 + $0x278] sm:$0xff]  ;;  %v3029_v11 = vld [vmem:[#allocation5 + $0xe0] sm:$0xff]  ;;  %3790 = vst [vmem:[#allocation57_spill] sm:$0xff] %v3031_v4  ;;  %v420_v10 = vadd.f32 %v419_v8, %v389_v47 }
 0x10e   :  { %v390_v9 = vmul.f32 %v1813_v42, %v3007_v5  ;;  %v3024_v46 = vld [vmem:[#allocation5 + $0x338] sm:$0xff]  ;;  %3789 = vst [vmem:[#allocation70_spill] sm:$0xff] %v3029_v11  ;;  %v1814_v50 = vld [vmem:[#allocation2 + $0x330] sm:$0xff]  ;;  %v162_v42 = vadd.f32 %v161_v29, %v131_v58  ;;  %v1816_v5 = vld [vmem:[#allocation2 + $0x1c0] sm:$0xff]  ;;  %v545_v58 = vadd.f32 %v544_v35, %v514_v7 }
 0x10f   :  { %3787 = vst [vmem:[#allocation67_spill] sm:$0xff] %v3024_v46  ;;  %v3027_v19 = vld [vmem:[#allocation5 + $0xd8] sm:$0xff]  ;;  %v515_v57 = vmul.f32 %v1814_v50, %v3012_v52  ;;  %v1815_v34 = vld [vmem:[#allocation2 + $0xd0] sm:$0xff]  ;;  %v265_v32 = vmul.f32 %v1816_v5, %v3016_v25  ;;  %v3038_v61 = vld [vmem:[#allocation5 + $0x288] sm:$0xff]  ;;  %v295_v25 = vadd.f32 %v294_v36, %v264_v37 }
 0x110   :  { %3788 = vst [vmem:[#allocation61_spill] sm:$0xff] %v3027_v19  ;;  %v3035_v14 = vmul.f32 %v1815_v34, %v3014_v53  ;;  %3791 = vst [vmem:[#allocation58_spill] sm:$0xff] %v3038_v61  ;;  %v3040_v48 = vld [vmem:[#allocation5 + $0x340] sm:$0xff]  ;;  %v3042_v45 = vld [vmem:[#allocation5 + $0xe8] sm:$0xff] }
 0x111   :  { %3792 = vst [vmem:[#allocation63_spill] sm:$0xff] %v3040_v48  ;;  %3793 = vst [vmem:[#allocation72_spill] sm:$0xff] %v3042_v45  ;;  %v3044_v41 = vld [vmem:[#allocation5 + $0xf0] sm:$0xff]  ;;  %v1817_v1 = vld [vmem:[#allocation2 + $0x280] sm:$0xff] }
 0x112   :  { %3794 = vst [vmem:[#allocation65_spill] sm:$0xff] %v3044_v41  ;;  %v391_v27 = vmul.f32 %v1817_v1, %v3021_v3  ;;  %v1818_v50 = vld [vmem:[#allocation2 + $0x338] sm:$0xff]  ;;  %v1820_v49 = vld [vmem:[#allocation2 + $0xe0] sm:$0xff]  ;;  %v1821_v17 = vld [vmem:[#allocation2 + $0x1c8] sm:$0xff]  ;;  %v163_v3 = vadd.f32 %v162_v42, %v132_v51 }
 0x113   :  { %v516_v29 = vmul.f32 %v1818_v50, %v3024_v46  ;;  %v1819_v34 = vld [vmem:[#allocation2 + $0xd8] sm:$0xff]  ;;  %v3052_v31 = vmul.f32 %v1820_v49, %v3029_v11  ;;  %v266_v53 = vmul.f32 %v1821_v17, %v3031_v4  ;;  %v3055_v52 = vld [vmem:[#allocation5 + $0x290] sm:$0xff]  ;;  %v3057_v1 = vld [vmem:[#allocation5 + $0x348] sm:$0xff]  ;;  %v421_v50 = vadd.f32 %v420_v10, %v390_v9 }
 0x114   :  { %v3049_v5 = vmul.f32 %v1819_v34, %v3027_v19  ;;  %3795 = vst [vmem:[#allocation64_spill] sm:$0xff] %v3055_v52  ;;  %3796 = vst [vmem:[#allocation76_spill] sm:$0xff] %v3057_v1  ;;  %v3059_v47 = vld [vmem:[#allocation5 + $0x1d0] sm:$0xff]  ;;  %v3061_v8 = vld [vmem:[#allocation5 + $0x298] sm:$0xff]  ;;  %v546_v19 = vadd.f32 %v545_v58, %v515_v57  ;;  %v296_v46 = vadd.f32 %v295_v25, %v265_v32 }
 0x115   :  { %3797 = vst [vmem:[#allocation69_spill] sm:$0xff] %v3059_v47  ;;  %3798 = vst [vmem:[#allocation66_spill] sm:$0xff] %v3061_v8  ;;  %v1822_v7 = vld [vmem:[#allocation2 + $0x288] sm:$0xff]  ;;  %v3064_v34 = vld [vmem:[#allocation5 + $0x350] sm:$0xff]  ;;  %v422_v57 = vadd.f32 %v421_v50, %v391_v27 }
 0x116   :  { %v392_v35 = vmul.f32 %v1822_v7, %v3038_v61  ;;  %3799 = vst [vmem:[#allocation81_spill] sm:$0xff] %v3064_v34  ;;  %v1823_v49 = vld [vmem:[#allocation2 + $0x340] sm:$0xff]  ;;  %v1824_v17 = vld [vmem:[#allocation2 + $0xe8] sm:$0xff]  ;;  %v1825_v36 = vld [vmem:[#allocation2 + $0xf0] sm:$0xff] }
 0x117   :  { %v517_v11 = vmul.f32 %v1823_v49, %v3040_v48  ;;  %v3068_v37 = vmul.f32 %v1824_v17, %v3042_v45  ;;  %v3071_v4 = vmul.f32 %v1825_v36, %v3044_v41  ;;  %v3073_v0 = vld [vmem:[#allocation5 + $0xf8] sm:$0xff]  ;;  %v3077_v9 = vld [vmem:[#allocation5 + $0x2a0] sm:$0xff]  ;;  %v1826_v10 = vld [vmem:[#allocation2 + $0x290] sm:$0xff]  ;;  %v547_v45 = vadd.f32 %v546_v19, %v516_v29 }
 0x118   :  { %3800 = vst [vmem:[#allocation71_spill] sm:$0xff] %v3073_v0  ;;  %v3075_v7 = vld [vmem:[#allocation5 + $0x1d8] sm:$0xff]  ;;  %3802 = vst [vmem:[#allocation82_spill] sm:$0xff] %v3077_v9  ;;  %v393_v49 = vmul.f32 %v1826_v10, %v3055_v52  ;;  %v1827_v58 = vld [vmem:[#allocation2 + $0x348] sm:$0xff]  ;;  %v297_v41 = vadd.f32 %v296_v46, %v266_v53  ;;  %v423_v27 = vadd.f32 %v422_v57, %v392_v35 }
 0x119   :  { %3801 = vst [vmem:[#allocation68_spill] sm:$0xff] %v3075_v7  ;;  %v518_v17 = vmul.f32 %v1827_v58, %v3057_v1  ;;  %v1828_v61 = vld [vmem:[#allocation2 + $0x1d0] sm:$0xff]  ;;  %v1829_v51 = vld [vmem:[#allocation2 + $0x298] sm:$0xff]  ;;  %v3086_v62 = vld [vmem:[#allocation5 + $0x1e0] sm:$0xff]  ;;  %v548_v19 = vadd.f32 %v547_v45, %v517_v11 }
 0x11a   :  { %v267_v36 = vmul.f32 %v1828_v61, %v3059_v47  ;;  %v394_v32 = vmul.f32 %v1829_v51, %v3061_v8  ;;  %v3083_v25 = vld [vmem:[#allocation5 + $0x358] sm:$0xff]  ;;  %v1830_v42 = vld [vmem:[#allocation2 + $0x350] sm:$0xff]  ;;  %3803 = vst [vmem:[#allocation75_spill] sm:$0xff] %v3086_v62  ;;  %v3088_v10 = vld [vmem:[#allocation5 + $0x2a8] sm:$0xff] }
 0x11b   :  { %v519_v48 = vmul.f32 %v1830_v42, %v3064_v34  ;;  %3804 = vst [vmem:[#allocation79_spill] sm:$0xff] %v3088_v10  ;;  %v3090_v50 = vld [vmem:[#allocation5 + $0x360] sm:$0xff]  ;;  %v1832_v53 = vld [vmem:[#allocation2 + $0x408] sm:$0xff]  ;;  %v1833_v58 = vld [vmem:[#allocation2 + $0xf8] sm:$0xff]  ;;  %v164_v42 = vadd.f32 %v163_v3, %v3035_v14 }
 0x11c   :  { %v1831_v29 = vld [vmem:[#allocation2 + $0x400] sm:$0xff]  ;;  %v615_v46 = vmul.f32 %v1832_v53, %v2734_v39  ;;  %v3095_v51 = vmul.f32 %v1833_v58, %v3073_v0  ;;  %v1834_v8 = vld [vmem:[#allocation2 + $0x1d8] sm:$0xff]  ;;  %v3100_v57 = vld [vmem:[#allocation5 + $0x1e8] sm:$0xff]  ;;  %v549_v53 = vadd.f32 %v548_v19, %v518_v17  ;;  %v298_v0 = vadd.f32 %v297_v41, %v267_v36 }
 0x11d   :  { %v614_v61 = vmul.f32 %v1831_v29, %v2732_v26  ;;  %v268_v34 = vmul.f32 %v1834_v8, %v3075_v7  ;;  %v1835_v52 = vld [vmem:[#allocation2 + $0x2a0] sm:$0xff]  ;;  %3805 = vst [vmem:[#allocation83_spill] sm:$0xff] %v3100_v57  ;;  %v3102_v45 = vld [vmem:[#allocation5 + $0x2b0] sm:$0xff]  ;;  %v424_v26 = vadd.f32 %v423_v27, %v393_v49  ;;  %v3104_v11 = vld [vmem:[#allocation5 + $0x368] sm:$0xff]  ;;  %v165_v41 = vadd.f32 %v164_v42, %v3049_v5 }
 0x11e   :  { %v395_v35 = vmul.f32 %v1835_v52, %v3077_v9  ;;  %3806 = vst [vmem:[#allocation84_spill] sm:$0xff] %v3102_v45  ;;  %3807 = vst [vmem:[#allocation73_spill] sm:$0xff] %v3104_v11  ;;  %v1836_v39 = vld [vmem:[#allocation2 + $0x358] sm:$0xff]  ;;  %v1837_v58 = vld [vmem:[#allocation2 + $0x410] sm:$0xff]  ;;  %v550_v17 = vadd.f32 %v549_v53, %v519_v48 }
 0x11f   :  { %v520_v29 = vmul.f32 %v1836_v39, %v3083_v25  ;;  %v616_v14 = vmul.f32 %v1837_v58, %v2745_v15  ;;  %v1838_v3 = vld [vmem:[#allocation2 + $0x1e0] sm:$0xff]  ;;  %v1839_v7 = vld [vmem:[#allocation2 + $0x2a8] sm:$0xff]  ;;  %v3111_v49 = vld [vmem:[#allocation5 + $0x1f0] sm:$0xff]  ;;  %v425_v1 = vadd.f32 %v424_v26, %v394_v32  ;;  %v646_v58 = vadd.f32 %v615_v46, %v614_v61 }
 0x120   :  { %v269_v8 = vmul.f32 %v1838_v3, %v3086_v62  ;;  %v396_v52 = vmul.f32 %v1839_v7, %v3088_v10  ;;  %v1840_v9 = vld [vmem:[#allocation2 + $0x360] sm:$0xff]  ;;  %3808 = vst [vmem:[#allocation74_spill] sm:$0xff] %v3111_v49  ;;  %v3113_v27 = vld [vmem:[#allocation5 + $0x2b8] sm:$0xff]  ;;  %v3115_v39 = vld [vmem:[#allocation5 + $0x370] sm:$0xff] }
 0x121   :  { %v521_v47 = vmul.f32 %v1840_v9, %v3090_v50  ;;  %v1841_v19 = vld [vmem:[#allocation2 + $0x418] sm:$0xff]  ;;  %v1842_v36 = vld [vmem:[#allocation2 + $0x1e8] sm:$0xff]  ;;  %v1843_v3 = vld [vmem:[#allocation2 + $0x2b0] sm:$0xff]  ;;  %v426_v48 = vadd.f32 %v425_v1, %v395_v35  ;;  %v647_v46 = vadd.f32 %v646_v58, %v616_v14 }
 0x122   :  { %v617_v15 = vmul.f32 %v1841_v19, %v2752_v56  ;;  %v3120_v7 = vmul.f32 %v1842_v36, %v3100_v57  ;;  %v397_v9 = vmul.f32 %v1843_v3, %v3102_v45  ;;  %v1844_v62 = vld [vmem:[#allocation2 + $0x368] sm:$0xff]  ;;  %v3124_v32 = vld [vmem:[#allocation5 + $0x1f8] sm:$0xff]  ;;  %v3126_v26 = vld [vmem:[#allocation5 + $0x2c0] sm:$0xff]  ;;  %v551_v56 = vadd.f32 %v550_v17, %v520_v29 }
 0x123   :  { %v522_v10 = vmul.f32 %v1844_v62, %v3104_v11  ;;  %3809 = vst [vmem:[#allocation85_spill] sm:$0xff] %v3124_v32  ;;  %3810 = vst [vmem:[#allocation88_spill] sm:$0xff] %v3126_v26  ;;  %v3128_v53 = vld [vmem:[#allocation5 + $0x378] sm:$0xff]  ;;  %v1845_v61 = vld [vmem:[#allocation2 + $0x420] sm:$0xff]  ;;  %v299_v36 = vadd.f32 %v298_v0, %v268_v34  ;;  %v427_v35 = vadd.f32 %v426_v48, %v396_v52 }
 0x124   :  { %3811 = vst [vmem:[#allocation77_spill] sm:$0xff] %v3128_v53  ;;  %v618_v5 = vmul.f32 %v1845_v61, %v2759_v28  ;;  %v1846_v42 = vld [vmem:[#allocation2 + $0x1f0] sm:$0xff]  ;;  %v1847_v3 = vld [vmem:[#allocation2 + $0x2b8] sm:$0xff]  ;;  %v3136_v11 = vld [vmem:[#allocation5 + $0x2c8] sm:$0xff]  ;;  %v552_v28 = vadd.f32 %v551_v56, %v521_v47  ;;  %v648_v58 = vadd.f32 %v647_v46, %v617_v15  ;;  %v166_v0 = vadd.f32 %v165_v41, %v3052_v31 }
 0x125   :  { %v3132_v19 = vmul.f32 %v1846_v42, %v3111_v49  ;;  %v398_v62 = vmul.f32 %v1847_v3, %v3113_v27  ;;  %v1848_v57 = vld [vmem:[#allocation2 + $0x370] sm:$0xff]  ;;  %3812 = vst [vmem:[#allocation78_spill] sm:$0xff] %v3136_v11  ;;  %v3140_v29 = vld [vmem:[#allocation5 + $0x380] sm:$0xff]  ;;  %v1849_v14 = vld [vmem:[#allocation2 + $0x428] sm:$0xff]  ;;  %v428_v47 = vadd.f32 %v427_v35, %v397_v9  ;;  %v300_v46 = vadd.f32 %v299_v36, %v269_v8 }
 0x126   :  { %v523_v45 = vmul.f32 %v1848_v57, %v3115_v39  ;;  %v3138_v1 = vld [vmem:[#allocation5 + $0x2d0] sm:$0xff]  ;;  %v619_v17 = vmul.f32 %v1849_v14, %v2767_v63  ;;  %v1850_v34 = vld [vmem:[#allocation2 + $0x1f8] sm:$0xff]  ;;  %v1851_v42 = vld [vmem:[#allocation2 + $0x2c0] sm:$0xff]  ;;  %v553_v63 = vadd.f32 %v552_v28, %v522_v10  ;;  %v649_v41 = vadd.f32 %v648_v58, %v618_v5 }
 0x127   :  { %3813 = vst [vmem:[#allocation86_spill] sm:$0xff] %v3138_v1  ;;  %v3145_v61 = vmul.f32 %v1850_v34, %v3124_v32  ;;  %v399_v57 = vmul.f32 %v1851_v42, %v3126_v26  ;;  %v1852_v3 = vld [vmem:[#allocation2 + $0x378] sm:$0xff]  ;;  %v3151_v48 = vld [vmem:[#allocation5 + $0x2e0] sm:$0xff]  ;;  %v3153_v56 = vld [vmem:[#allocation5 + $0x388] sm:$0xff]  ;;  %v429_v35 = vadd.f32 %v428_v47, %v398_v62  ;;  %v167_v36 = vadd.f32 %v166_v0, %v3068_v37 }
 0x128   :  { %v524_v49 = vmul.f32 %v1852_v3, %v3128_v53  ;;  %v3149_v52 = vld [vmem:[#allocation5 + $0x2d8] sm:$0xff]  ;;  %v1853_v15 = vld [vmem:[#allocation2 + $0x430] sm:$0xff]  ;;  %v1854_v14 = vld [vmem:[#allocation2 + $0x2c8] sm:$0xff]  ;;  %v554_v28 = vadd.f32 %v553_v63, %v523_v45  ;;  %v650_v5 = vadd.f32 %v649_v41, %v619_v17  ;;  %v301_v17 = vadd.f32 %v300_v46, %v3120_v7 }
 0x129   :  { %v620_v31 = vmul.f32 %v1853_v15, %v2774_v54  ;;  %v400_v34 = vmul.f32 %v1854_v14, %v3136_v11  ;;  %v1855_v42 = vld [vmem:[#allocation2 + $0x2d0] sm:$0xff]  ;;  %v1856_v3 = vld [vmem:[#allocation2 + $0x380] sm:$0xff]  ;;  %v3159_v53 = vld [vmem:[#allocation5 + $0x2e8] sm:$0xff]  ;;  %v430_v11 = vadd.f32 %v429_v35, %v399_v57  ;;  %v168_v46 = vadd.f32 %v167_v36, %v3071_v4 }
 0x12a   :  { %v401_v32 = vmul.f32 %v1855_v42, %v3138_v1  ;;  %v525_v26 = vmul.f32 %v1856_v3, %v3140_v29  ;;  %v3161_v9 = vld [vmem:[#allocation5 + $0x2f0] sm:$0xff]  ;;  %v1857_v54 = vld [vmem:[#allocation2 + $0x438] sm:$0xff]  ;;  %v1859_v14 = vld [vmem:[#allocation2 + $0x2e0] sm:$0xff]  ;;  %v555_v47 = vadd.f32 %v554_v28, %v524_v49 }
 0x12b   :  { %3814 = vst [vmem:[#allocation87_spill] sm:$0xff] %v3161_v9  ;;  %v3163_v10 = vld [vmem:[#allocation5 + $0x390] sm:$0xff]  ;;  %v621_v8 = vmul.f32 %v1857_v54, %v2785_v33  ;;  %v1858_v58 = vld [vmem:[#allocation2 + $0x2d8] sm:$0xff]  ;;  %v403_v42 = vmul.f32 %v1859_v14, %v3151_v48  ;;  %v1860_v3 = vld [vmem:[#allocation2 + $0x388] sm:$0xff]  ;;  %v651_v33 = vadd.f32 %v650_v5, %v620_v31  ;;  %v431_v35 = vadd.f32 %v430_v11, %v400_v34 }
 0x12c   :  { %v402_v15 = vmul.f32 %v1858_v58, %v3149_v52  ;;  %v526_v1 = vmul.f32 %v1860_v3, %v3153_v56  ;;  %v3170_v62 = vld [vmem:[#allocation5 + $0x398] sm:$0xff]  ;;  %v1861_v45 = vld [vmem:[#allocation2 + $0x440] sm:$0xff]  ;;  %v1862_v37 = vld [vmem:[#allocation2 + $0x2e8] sm:$0xff]  ;;  %v556_v28 = vadd.f32 %v555_v47, %v525_v26 }
 0x12d   :  { %v622_v63 = vmul.f32 %v1861_v45, %v2793_v44  ;;  %v404_v0 = vmul.f32 %v1862_v37, %v3159_v53  ;;  %v1863_v41 = vld [vmem:[#allocation2 + $0x2f0] sm:$0xff]  ;;  %v3179_v57 = vld [vmem:[#allocation5 + $0x2f8] sm:$0xff]  ;;  %v3181_v49 = vld [vmem:[#allocation5 + $0x3a0] sm:$0xff]  ;;  %v652_v7 = vadd.f32 %v651_v33, %v621_v8  ;;  %v302_v8 = vadd.f32 %v301_v17, %v3132_v19 }
 0x12e   :  { %v3176_v54 = vmul.f32 %v1863_v41, %v3161_v9  ;;  %v1864_v58 = vld [vmem:[#allocation2 + $0x390] sm:$0xff]  ;;  %v1865_v44 = vld [vmem:[#allocation2 + $0x448] sm:$0xff]  ;;  %v1866_v5 = vld [vmem:[#allocation2 + $0x398] sm:$0xff]  ;;  %v432_v9 = vadd.f32 %v431_v35, %v401_v32  ;;  %v557_v34 = vadd.f32 %v556_v28, %v526_v1 }
 0x12f   :  { %v527_v14 = vmul.f32 %v1864_v58, %v3163_v10  ;;  %v623_v31 = vmul.f32 %v1865_v44, %v2798_v55  ;;  %v528_v3 = vmul.f32 %v1866_v5, %v3170_v62  ;;  %v1867_v45 = vld [vmem:[#allocation2 + $0x500] sm:$0xff]  ;;  %v1868_v41 = vld [vmem:[#allocation2 + $0x508] sm:$0xff]  ;;  %v1869_v26 = vld [vmem:[#allocation2 + $0x450] sm:$0xff]  ;;  %v653_v55 = vadd.f32 %v652_v7, %v622_v63 }
 0x130   :  { %v716_v37 = vmul.f32 %v1867_v45, %v2805_v18  ;;  %v717_v58 = vmul.f32 %v1868_v41, %v2807_v12  ;;  %v3188_v11 = vld [vmem:[#allocation5 + $0x3a8] sm:$0xff]  ;;  %v624_v47 = vmul.f32 %v1869_v26, %v2812_v38  ;;  %v1870_v4 = vld [vmem:[#allocation2 + $0x2f8] sm:$0xff]  ;;  %v1871_v33 = vld [vmem:[#allocation2 + $0x3a0] sm:$0xff]  ;;  %v433_v12 = vadd.f32 %v432_v9, %v402_v15 }
 0x131   :  { %v406_v36 = vmul.f32 %v1870_v4, %v3179_v57  ;;  %v529_v44 = vmul.f32 %v1871_v33, %v3181_v49  ;;  %v1872_v18 = vld [vmem:[#allocation2 + $0x510] sm:$0xff]  ;;  %v558_v35 = vadd.f32 %v557_v34, %v527_v14  ;;  %v1873_v1 = vld [vmem:[#allocation2 + $0x458] sm:$0xff]  ;;  %v654_v38 = vadd.f32 %v653_v55, %v623_v31  ;;  %v1874_v63 = vld [vmem:[#allocation2 + $0x3a8] sm:$0xff] }
 0x132   :  { %v718_v5 = vmul.f32 %v1872_v18, %v2815_v22  ;;  %v3195_v32 = vld [vmem:[#allocation5 + $0x3b0] sm:$0xff]  ;;  %v625_v28 = vmul.f32 %v1873_v1, %v2817_v6  ;;  %v530_v19 = vmul.f32 %v1874_v63, %v3188_v11  ;;  %v1875_v17 = vld [vmem:[#allocation2 + $0x460] sm:$0xff]  ;;  %v1876_v45 = vld [vmem:[#allocation2 + $0x518] sm:$0xff]  ;;  %v748_v26 = vadd.f32 %v717_v58, %v716_v37 }
 0x133   :  { %v626_v7 = vmul.f32 %v1875_v17, %v2826_v21  ;;  %v719_v41 = vmul.f32 %v1876_v45, %v2824_v60  ;;  %v169_v22 = vadd.f32 %v168_v46, %v3095_v51  ;;  %v434_v9 = vadd.f32 %v433_v12, %v403_v42  ;;  %v3202_v15 = vld [vmem:[#allocation5 + $0x3b8] sm:$0xff]  ;;  %v1877_v31 = vld [vmem:[#allocation2 + $0x3b0] sm:$0xff]  ;;  %v1878_v4 = vld [vmem:[#allocation2 + $0x520] sm:$0xff] }
 0x134   :  { %v559_v14 = vadd.f32 %v558_v35, %v528_v3  ;;  %v655_v34 = vadd.f32 %v654_v38, %v624_v47  ;;  %v303_v6 = vadd.f32 %v302_v8, %v3145_v61  ;;  %v531_v55 = vmul.f32 %v1877_v31, %v3195_v32  ;;  %v3207_v1 = vld [vmem:[#allocation5 + $0x3c0] sm:$0xff]  ;;  %v1879_v37 = vld [vmem:[#allocation2 + $0x468] sm:$0xff]  ;;  %v1880_v46 = vld [vmem:[#allocation2 + $0x3b8] sm:$0xff] }
 0x135   :  { %v720_v33 = vmul.f32 %v1878_v4, %v2832_v59  ;;  %v749_v21 = vadd.f32 %v748_v26, %v718_v5  ;;  %v435_v18 = vadd.f32 %v434_v9, %v404_v0  ;;  %v627_v51 = vmul.f32 %v1879_v37, %v2834_v30  ;;  %v1881_v58 = vld [vmem:[#allocation2 + $0x470] sm:$0xff]  ;;  %v1882_v47 = vld [vmem:[#allocation2 + $0x528] sm:$0xff]  ;;  %v1883_v30 = vld [vmem:[#allocation2 + $0x3c0] sm:$0xff] }
 0x136   :  { %v560_v60 = vadd.f32 %v559_v14, %v529_v44  ;;  %v656_v42 = vadd.f32 %v655_v34, %v625_v28  ;;  %v532_v3 = vmul.f32 %v1880_v46, %v3202_v15  ;;  %v628_v61 = vmul.f32 %v1881_v58, %v2845_v23  ;;  %v3214_v5 = vld [vmem:[#allocation5 + $0x3c8] sm:$0xff]  ;;  %v1884_v63 = vld [vmem:[#allocation2 + $0x530] sm:$0xff]  ;;  %v3221_v14 = vld [vmem:[#allocation5 + $0x3d8] sm:$0xff] }
 0x137   :  { %v721_v8 = vmul.f32 %v1882_v47, %v2840_v40  ;;  %v750_v12 = vadd.f32 %v749_v21, %v719_v41  ;;  %v170_v59 = vrot.slane %v169_v22, 4  ;;  %v436_v0 = vadd.f32 %v435_v18, %v3176_v54  ;;  %v3218_v26 = vld [vmem:[#allocation5 + $0x3d0] sm:$0xff]  ;;  %v1885_v41 = vld [vmem:[#allocation2 + $0x478] sm:$0xff] }
 0x138   :  { %v561_v44 = vadd.f32 %v560_v60, %v530_v19  ;;  %v657_v35 = vadd.f32 %v656_v42, %v626_v7  ;;  %v304_v38 = vrot.slane %v303_v6, 4  ;;  %v533_v28 = vmul.f32 %v1883_v30, %v3207_v1  ;;  %v1886_v19 = vld [vmem:[#allocation2 + $0x3c8] sm:$0xff]  ;;  %v1887_v34 = vld [vmem:[#allocation2 + $0x538] sm:$0xff] }
 0x139   :  { %v722_v17 = vmul.f32 %v1884_v63, %v2848_v20  ;;  %v751_v45 = vadd.f32 %v750_v12, %v720_v33  ;;  %v437_v23 = vadd.f32 %v436_v0, %v406_v36  ;;  %v629_v9 = vmul.f32 %v1885_v41, %v2855_v16  ;;  %v3225_v20 = vld [vmem:[#allocation5 + $0x3e0] sm:$0xff]  ;;  %v1889_v16 = vld [vmem:[#allocation2 + $0x3d0] sm:$0xff]  ;;  %v1891_v47 = vld [vmem:[#allocation2 + $0x3d8] sm:$0xff] }
 0x13a   :  { %v562_v40 = vadd.f32 %v561_v44, %v531_v55  ;;  %v658_v54 = vadd.f32 %v657_v35, %v627_v51  ;;  %v534_v7 = vmul.f32 %v1886_v19, %v3214_v5  ;;  %v723_v31 = vmul.f32 %v1887_v34, %v2857_v13  ;;  %v1888_v33 = vld [vmem:[#allocation2 + $0x480] sm:$0xff]  ;;  %v3231_v12 = vld [vmem:[#allocation5 + $0x3e8] sm:$0xff] }
 0x13b   :  { %v752_v4 = vadd.f32 %v751_v45, %v721_v8  ;;  %v171_v21 = vadd.f32 %v170_v59, %v169_v22  ;;  %v630_v55 = vmul.f32 %v1888_v33, %v2863_v24  ;;  %v305_v60 = vadd.f32 %v304_v38, %v303_v6  ;;  %v1890_v51 = vld [vmem:[#allocation2 + $0x540] sm:$0xff]  ;;  %v3815_v59 = vld [vmem:[#allocation53_spill] sm:$0xff]  ;;  %v1894_v44 = vld [vmem:[#allocation2 + $0x548] sm:$0xff] }
 0x13c   :  { %v563_v36 = vadd.f32 %v562_v40, %v532_v3  ;;  %v659_v18 = vadd.f32 %v658_v54, %v628_v61  ;;  %v535_v37 = vmul.f32 %v1889_v16, %v3218_v26  ;;  %v724_v42 = vmul.f32 %v1890_v51, %v2865_v2  ;;  %v3233_v3 = vld [vmem:[#allocation5 + $0x3f0] sm:$0xff]  ;;  %v1892_v24 = vld [vmem:[#allocation2 + $0x3e0] sm:$0xff]  ;;  %v1893_v61 = vld [vmem:[#allocation2 + $0x488] sm:$0xff] }
 0x13d   :  { %v753_v46 = vadd.f32 %v752_v4, %v722_v17  ;;  %v438_v58 = vrot.slane %v437_v23, 4  ;;  %v536_v13 = vmul.f32 %v1891_v47, %v3221_v14  ;;  %v537_v6 = vmul.f32 %v1892_v24, %v3225_v20  ;;  %v3816_v35 = vld [vmem:[#allocation16_spill] sm:$0xff]  ;;  %v1896_v54 = vld [vmem:[#allocation2 + $0x600] sm:$0xff] }
 0x13e   :  { %v564_v22 = vadd.f32 %v563_v36, %v533_v28  ;;  %v660_v8 = vadd.f32 %v659_v18, %v629_v9  ;;  %v631_v0 = vmul.f32 %v1893_v61, %v3815_v59  ;;  %v725_v2 = vmul.f32 %v1894_v44, %v3816_v35  ;;  %v1895_v45 = vld [vmem:[#allocation2 + $0x550] sm:$0xff]  ;;  %v1897_v4 = vld [vmem:[#allocation2 + $0x608] sm:$0xff]  ;;  %v3819_v36 = vld [vmem:[#allocation18_spill] sm:$0xff] }
 0x13f   :  { %v754_v38 = vadd.f32 %v753_v46, %v723_v31  ;;  %v172_v30 = vrot.slane %v171_v21, 2  ;;  %v3817_v28 = vld [vmem:[#allocation13_spill] sm:$0xff]  ;;  %v306_v41 = vrot.slane %v305_v60, 2  ;;  %v3818_v19 = vld [vmem:[#allocation80_spill] sm:$0xff]  ;;  %v819_v33 = vmul.f32 %v1897_v4, %v3819_v36  ;;  %v3822_v35 = vld [vmem:[#allocation59_spill] sm:$0xff] }
 0x140   :  { %v565_v63 = vadd.f32 %v564_v22, %v534_v7  ;;  %v661_v17 = vadd.f32 %v660_v8, %v630_v55  ;;  %v726_v40 = vmul.f32 %v1895_v45, %v3817_v28  ;;  %v818_v34 = vmul.f32 %v1896_v54, %v3818_v19  ;;  %v1898_v16 = vld [vmem:[#allocation2 + $0x3e8] sm:$0xff]  ;;  %v1899_v47 = vld [vmem:[#allocation2 + $0x3f0] sm:$0xff]  ;;  %v3243_v55 = vld [vmem:[#allocation5 + $0x3f8] sm:$0xff] }
 0x141   :  { %v755_v9 = vadd.f32 %v754_v38, %v724_v42  ;;  %v439_v18 = vadd.f32 %v438_v58, %v437_v23  ;;  %v538_v51 = vmul.f32 %v1898_v16, %v3231_v12  ;;  %v539_v31 = vmul.f32 %v1899_v47, %v3233_v3  ;;  %v1900_v46 = vld [vmem:[#allocation2 + $0x490] sm:$0xff]  ;;  %v1901_v42 = vld [vmem:[#allocation2 + $0x558] sm:$0xff]  ;;  %v1903_v28 = vld [vmem:[#allocation2 + $0x560] sm:$0xff] }
 0x142   :  { %v566_v7 = vadd.f32 %v565_v63, %v535_v37  ;;  %v3820_v22 = vld [vmem:[#allocation12_spill] sm:$0xff]  ;;  %v173_v23 = vadd.f32 %v172_v30, %v171_v21  ;;  %v662_v45 = vadd.f32 %v661_v17, %v631_v0  ;;  %v3823_v54 = vld [vmem:[#allocation15_spill] sm:$0xff]  ;;  %v307_v4 = vadd.f32 %v306_v41, %v305_v60  ;;  %v1904_v63 = vld [vmem:[#allocation2 + $0x618] sm:$0xff] }
 0x143   :  { %v632_v8 = vmul.f32 %v1900_v46, %v3820_v22  ;;  %v3821_v24 = vld [vmem:[#allocation20_spill] sm:$0xff]  ;;  %v756_v59 = vadd.f32 %v755_v9, %v725_v2  ;;  %v728_v19 = vmul.f32 %v1903_v28, %v3823_v54  ;;  %v3824_v36 = vld [vmem:[#allocation14_spill] sm:$0xff]  ;;  %v850_v47 = vadd.f32 %v819_v33, %v818_v34 }
 0x144   :  { %v727_v61 = vmul.f32 %v1901_v42, %v3821_v24  ;;  %v1902_v44 = vld [vmem:[#allocation2 + $0x610] sm:$0xff]  ;;  %v567_v58 = vadd.f32 %v566_v7, %v536_v13  ;;  %v821_v16 = vmul.f32 %v1904_v63, %v3824_v36  ;;  %v440_v46 = vrot.slane %v439_v18, 2  ;;  %v1905_v22 = vld [vmem:[#allocation2 + $0x3f8] sm:$0xff]  ;;  %v1907_v21 = vld [vmem:[#allocation2 + $0x568] sm:$0xff] }
 0x145   :  { %v820_v38 = vmul.f32 %v1902_v44, %v3822_v35  ;;  %v757_v37 = vadd.f32 %v756_v59, %v726_v40  ;;  %v540_v42 = vmul.f32 %v1905_v22, %v3243_v55  ;;  %v1906_v9 = vld [vmem:[#allocation2 + $0x498] sm:$0xff]  ;;  %v729_v13 = vmul.f32 %v1907_v21, %v2907_v43  ;;  %v1908_v30 = vld [vmem:[#allocation2 + $0x620] sm:$0xff]  ;;  %v3826_v17 = vld [vmem:[#allocation60_spill] sm:$0xff] }
 0x146   :  { %v568_v2 = vadd.f32 %v567_v58, %v537_v6  ;;  %v3825_v24 = vld [vmem:[#allocation22_spill] sm:$0xff]  ;;  %v822_v60 = vmul.f32 %v1908_v30, %v3826_v17  ;;  %v174_v41 = vrot.slane %v173_v23, 1  ;;  %v663_v59 = vadd.f32 %v662_v45, %v632_v8  ;;  %v1909_v34 = vld [vmem:[#allocation2 + $0x570] sm:$0xff]  ;;  %v1910_v6 = vld [vmem:[#allocation2 + $0x628] sm:$0xff] }
 0x147   :  { %v633_v44 = vmul.f32 %v1906_v9, %v3825_v24  ;;  %v758_v0 = vadd.f32 %v757_v37, %v727_v61  ;;  %v851_v40 = vadd.f32 %v850_v47, %v820_v38  ;;  %v3827_v33 = vld [vmem:[#allocation26_spill] sm:$0xff]  ;;  %v308_v28 = vrot.slane %v307_v4, 1  ;;  %v3828_v58 = vld [vmem:[#allocation24_spill] sm:$0xff]  ;;  %v3829_v61 = vld [vmem:[#allocation17_spill] sm:$0xff] }
 0x148   :  { %v569_v7 = vadd.f32 %v568_v2, %v538_v51  ;;  %v730_v35 = vmul.f32 %v1909_v34, %v3827_v33  ;;  %v823_v63 = vmul.f32 %v1910_v6, %v3828_v58  ;;  %v441_v22 = vadd.f32 %v440_v46, %v439_v18  ;;  %v1911_v43 = vld [vmem:[#allocation2 + $0x4a0] sm:$0xff]  ;;  %v1912_v24 = vld [vmem:[#allocation2 + $0x578] sm:$0xff]  ;;  %v3830_v21 = vld [vmem:[#allocation28_spill] sm:$0xff] }
 0x149   :  { %v759_v54 = vadd.f32 %v758_v0, %v728_v19  ;;  %v852_v36 = vadd.f32 %v851_v40, %v821_v16  ;;  %v634_v37 = vmul.f32 %v1911_v43, %v3829_v61  ;;  %v731_v38 = vmul.f32 %v1912_v24, %v3830_v21  ;;  %v1913_v51 = vld [vmem:[#allocation2 + $0x630] sm:$0xff]  ;;  %v3831_v8 = vld [vmem:[#allocation27_spill] sm:$0xff] }
 0x14a   :  { %v570_v9 = vadd.f32 %v569_v7, %v539_v31  ;;  %v824_v45 = vmul.f32 %v1913_v51, %v3831_v8  ;;  %v175_v30 = vadd.f32 %v174_v41, %v173_v23  ;;  %v664_v19 = vadd.f32 %v663_v59, %v633_v44  ;;  %v1914_v0 = vld [vmem:[#allocation2 + $0x580] sm:$0xff]  ;;  %v3832_v34 = vld [vmem:[#allocation21_spill] sm:$0xff]  ;;  %v1916_v43 = vld [vmem:[#allocation2 + $0x4a8] sm:$0xff] }
 0x14b   :  { %v760_v47 = vadd.f32 %v759_v54, %v729_v13  ;;  %v853_v2 = vadd.f32 %v852_v36, %v822_v60  ;;  %v732_v33 = vmul.f32 %v1914_v0, %v3832_v34  ;;  %v309_v16 = vadd.f32 %v308_v28, %v307_v4  ;;  %v1915_v31 = vld [vmem:[#allocation2 + $0x638] sm:$0xff]  ;;  %v3833_v46 = vld [vmem:[#allocation19_spill] sm:$0xff]  ;;  %v3835_v24 = vld [vmem:[#allocation32_spill] sm:$0xff] }
 0x14c   :  { %v571_v17 = vadd.f32 %v570_v9, %v540_v42  ;;  %v825_v40 = vmul.f32 %v1915_v31, %v3833_v46  ;;  %v442_v6 = vrot.slane %v441_v22, 1  ;;  %v3834_v13 = vld [vmem:[#allocation29_spill] sm:$0xff]  ;;  %v1917_v61 = vld [vmem:[#allocation2 + $0x588] sm:$0xff]  ;;  %v1918_v42 = vld [vmem:[#allocation2 + $0x640] sm:$0xff]  ;;  %v665_v9 = vadd.f32 %v664_v19, %v634_v37 }
 0x14d   :  { %v761_v18 = vadd.f32 %v760_v47, %v730_v35  ;;  %v854_v7 = vadd.f32 %v853_v2, %v823_v63  ;;  %v635_v54 = vmul.f32 %v1916_v43, %v3834_v13  ;;  %v733_v60 = vmul.f32 %v1917_v61, %v3835_v24  ;;  %v3836_v44 = vld [vmem:[#allocation31_spill] sm:$0xff]  ;;  %v1919_v4 = vld [vmem:[#allocation2 + $0x4b0] sm:$0xff]  ;;  %v3842_v61 = vld [vmem:[#allocation42_spill] sm:$0xff] }
 0x14e   :  { %v572_v58 = vrot.slane %v571_v17, 4  ;;  %v826_v41 = vmul.f32 %v1918_v42, %v3836_v44  ;;  %v3837_v35 = vld [vmem:[#allocation33_spill] sm:$0xff]  ;;  %v3838_v63 = vld [vmem:[#allocation36_spill] sm:$0xff]  ;;  %v310_v51 = vadd.f32 %v309_v16, %v175_v30  ;;  %v3839_v0 = vld [vmem:[#allocation23_spill] sm:$0xff]  ;;  %v443_v46 = vadd.f32 %v442_v6, %v441_v22 }
 0x14f   :  { %v762_v23 = vadd.f32 %v761_v18, %v731_v38  ;;  %v855_v59 = vadd.f32 %v854_v7, %v824_v45  ;;  %v636_v28 = vmul.f32 %v1919_v4, %v3837_v35  ;;  %v1920_v21 = vld [vmem:[#allocation2 + $0x590] sm:$0xff]  ;;  %v1921_v2 = vld [vmem:[#allocation2 + $0x648] sm:$0xff]  ;;  %v1922_v18 = vld [vmem:[#allocation2 + $0x700] sm:$0xff]  ;;  %v666_v22 = vadd.f32 %v665_v9, %v635_v54 }
 0x150   :  { %v573_v36 = vadd.f32 %v572_v58, %v571_v17  ;;  %v734_v47 = vmul.f32 %v1920_v21, %v3838_v63  ;;  %v827_v34 = vmul.f32 %v1921_v2, %v3839_v0  ;;  %v3840_v43 = vld [vmem:[#allocation37_spill] sm:$0xff]  ;;  %v1923_v45 = vld [vmem:[#allocation2 + $0x708] sm:$0xff]  ;;  %v3841_v17 = vld [vmem:[#allocation38_spill] sm:$0xff] }
 0x151   :  { %v763_v8 = vadd.f32 %v762_v23, %v732_v33  ;;  %v856_v31 = vadd.f32 %v855_v59, %v825_v40  ;;  %v920_v13 = vmul.f32 %v1922_v18, %v3840_v43  ;;  %v921_v7 = vmul.f32 %v1923_v45, %v3841_v17  ;;  %v1924_v58 = vld [vmem:[#allocation2 + $0x598] sm:$0xff]  ;;  %v1925_v24 = vld [vmem:[#allocation2 + $0x650] sm:$0xff]  ;;  %v1928_v35 = vld [vmem:[#allocation2 + $0x5a0] sm:$0xff] }
 0x152   :  { %v574_v38 = vrot.slane %v573_v36, 2  ;;  %v735_v37 = vmul.f32 %v1924_v58, %v3842_v61  ;;  %v3843_v42 = vld [vmem:[#allocation25_spill] sm:$0xff]  ;;  %v3845_v59 = vld [vmem:[#allocation30_spill] sm:$0xff]  ;;  %v3847_v18 = vld [vmem:[#allocation43_spill] sm:$0xff] }
 0x153   :  { %v764_v19 = vadd.f32 %v763_v8, %v733_v60  ;;  %v828_v30 = vmul.f32 %v1925_v24, %v3843_v42  ;;  %v857_v33 = vadd.f32 %v856_v31, %v826_v41  ;;  %v1926_v23 = vld [vmem:[#allocation2 + $0x4b8] sm:$0xff]  ;;  %v1927_v6 = vld [vmem:[#allocation2 + $0x710] sm:$0xff]  ;;  %v444_v8 = vadd.f32 %v443_v46, %v310_v51  ;;  %v3848_v41 = vld [vmem:[#allocation35_spill] sm:$0xff] }
 0x154   :  { %v575_v16 = vadd.f32 %v574_v38, %v573_v36  ;;  %v3844_v44 = vld [vmem:[#allocation41_spill] sm:$0xff]  ;;  %v922_v4 = vmul.f32 %v1927_v6, %v3845_v59  ;;  %v3846_v21 = vld [vmem:[#allocation34_spill] sm:$0xff]  ;;  %v952_v31 = vadd.f32 %v921_v7, %v920_v13  ;;  %v1931_v38 = vld [vmem:[#allocation2 + $0x5a8] sm:$0xff] }
 0x155   :  { %v637_v40 = vmul.f32 %v1926_v23, %v3844_v44  ;;  %v736_v63 = vmul.f32 %v1928_v35, %v3846_v21  ;;  %v765_v2 = vadd.f32 %v764_v19, %v734_v47  ;;  %v1929_v0 = vld [vmem:[#allocation2 + $0x658] sm:$0xff]  ;;  %v858_v60 = vadd.f32 %v857_v33, %v827_v34  ;;  %v3849_v58 = vld [vmem:[#allocation44_spill] sm:$0xff]  ;;  %v1932_v61 = vld [vmem:[#allocation2 + $0x660] sm:$0xff] }
 0x156   :  { %v829_v43 = vmul.f32 %v1929_v0, %v3847_v18  ;;  %v576_v45 = vrot.slane %v575_v16, 1  ;;  %v1930_v17 = vld [vmem:[#allocation2 + $0x718] sm:$0xff]  ;;  %v737_v54 = vmul.f32 %v1931_v38, %v3849_v58  ;;  %v667_v47 = vadd.f32 %v666_v22, %v636_v28  ;;  %v1933_v19 = vld [vmem:[#allocation2 + $0x720] sm:$0xff]  ;;  %v1934_v51 = vld [vmem:[#allocation2 + $0x5b0] sm:$0xff] }
 0x157   :  { %v923_v36 = vmul.f32 %v1930_v17, %v3848_v41  ;;  %v766_v9 = vadd.f32 %v765_v2, %v735_v37  ;;  %v3850_v24 = vld [vmem:[#allocation46_spill] sm:$0xff]  ;;  %v859_v23 = vadd.f32 %v858_v60, %v828_v30  ;;  %v3851_v6 = vld [vmem:[#allocation47_spill] sm:$0xff]  ;;  %v953_v34 = vadd.f32 %v952_v31, %v922_v4  ;;  %v3852_v46 = vld [vmem:[#allocation45_spill] sm:$0xff] }
 0x158   :  { %v830_v42 = vmul.f32 %v1932_v61, %v3850_v24  ;;  %v577_v44 = vadd.f32 %v576_v45, %v575_v16  ;;  %v924_v59 = vmul.f32 %v1933_v19, %v3851_v6  ;;  %v738_v33 = vmul.f32 %v1934_v51, %v3852_v46  ;;  %v1935_v21 = vld [vmem:[#allocation2 + $0x668] sm:$0xff]  ;;  %v1937_v30 = vld [vmem:[#allocation2 + $0x5b8] sm:$0xff]  ;;  %v1938_v60 = vld [vmem:[#allocation2 + $0x670] sm:$0xff] }
 0x159   :  { %v767_v35 = vadd.f32 %v766_v9, %v736_v63  ;;  %v3853_v13 = vld [vmem:[#allocation40_spill] sm:$0xff]  ;;  %v860_v0 = vadd.f32 %v859_v23, %v829_v43  ;;  %v954_v41 = vadd.f32 %v953_v34, %v923_v36  ;;  %v3856_v45 = vld [vmem:[#allocation49_spill] sm:$0xff]  ;;  %v1939_v38 = vld [vmem:[#allocation2 + $0x4c0] sm:$0xff]  ;;  %v668_v9 = vadd.f32 %v667_v47, %v637_v40 }
 0x15a   :  { %v831_v7 = vmul.f32 %v1935_v21, %v3853_v13  ;;  %v578_v18 = vadd.f32 %v577_v44, %v444_v8  ;;  %v1936_v37 = vld [vmem:[#allocation2 + $0x728] sm:$0xff]  ;;  %v832_v4 = vmul.f32 %v1938_v60, %v3856_v45  ;;  %v1940_v61 = vld [vmem:[#allocation2 + $0x730] sm:$0xff]  ;;  %v1941_v23 = vld [vmem:[#allocation2 + $0x5c0] sm:$0xff] }
 0x15b   :  { %v3854_v2 = vld [vmem:[#allocation52_spill] sm:$0xff]  ;;  %v768_v22 = vadd.f32 %v767_v35, %v737_v54  ;;  %v861_v31 = vadd.f32 %v860_v0, %v830_v42  ;;  %v3857_v63 = vld [vmem:[#allocation39_spill] sm:$0xff]  ;;  %v955_v24 = vadd.f32 %v954_v41, %v924_v59  ;;  %v1942_v6 = vld [vmem:[#allocation2 + $0x678] sm:$0xff] }
 0x15c   :  { %v925_v17 = vmul.f32 %v1936_v37, %v3854_v2  ;;  %v3855_v16 = vld [vmem:[#allocation48_spill] sm:$0xff]  ;;  %579 = vadd.xlane.f32.xlu1 %v578_v18  ;;  %v638_v58 = vmul.f32 %v1939_v38, %v3857_v63  ;;  %v3858_v43 = vld [vmem:[#allocation51_spill] sm:$0xff]  ;;  %v1943_v46 = vld [vmem:[#allocation2 + $0x738] sm:$0xff] }
 0x15d   :  { %v739_v28 = vmul.f32 %v1937_v30, %v3855_v16  ;;  %v926_v8 = vmul.f32 %v1940_v61, %v3858_v43  ;;  %v3859_v44 = vld [vmem:[#allocation56_spill] sm:$0xff]  ;;  %v769_v19 = vadd.f32 %v768_v22, %v738_v33  ;;  %v3860_v34 = vld [vmem:[#allocation55_spill] sm:$0xff]  ;;  %v862_v51 = vadd.f32 %v861_v31, %v831_v7  ;;  %v3862_v0 = vld [vmem:[#allocation50_spill] sm:$0xff] }
 0x15e   :  { %v740_v36 = vmul.f32 %v1941_v23, %v3859_v44  ;;  %v833_v54 = vmul.f32 %v1942_v6, %v3860_v34  ;;  %v3861_v35 = vld [vmem:[#allocation67_spill] sm:$0xff]  ;;  %v956_v21 = vadd.f32 %v955_v24, %v925_v17  ;;  %v3863_v37 = vld [vmem:[#allocation62_spill] sm:$0xff]  ;;  %v669_v41 = vadd.f32 %v668_v9, %v638_v58  ;;  %v3864_v16 = vld [vmem:[#allocation57_spill] sm:$0xff] }
 0x15f   :  { %v927_v42 = vmul.f32 %v1943_v46, %v3861_v35  ;;  %v1944_v13 = vld [vmem:[#allocation2 + $0x4c8] sm:$0xff]  ;;  %v770_v40 = vadd.f32 %v769_v19, %v739_v28  ;;  %v1945_v47 = vld [vmem:[#allocation2 + $0x680] sm:$0xff]  ;;  %v863_v59 = vadd.f32 %v862_v51, %v832_v4  ;;  %v1950_v44 = vld [vmem:[#allocation2 + $0x4d0] sm:$0xff] }
 0x160   :  { %v639_v18 = vmul.f32 %v1944_v13, %v3862_v0  ;;  %v834_v2 = vmul.f32 %v1945_v47, %v3863_v37  ;;  %v1946_v30 = vld [vmem:[#allocation2 + $0x5c8] sm:$0xff]  ;;  %v1947_v22 = vld [vmem:[#allocation2 + $0x740] sm:$0xff]  ;;  %v957_v7 = vadd.f32 %v956_v21, %v926_v8  ;;  %v1951_v58 = vld [vmem:[#allocation2 + $0x5d0] sm:$0xff] }
 0x161   :  { %v741_v33 = vmul.f32 %v1946_v30, %v3864_v16  ;;  %v3865_v60 = vld [vmem:[#allocation63_spill] sm:$0xff]  ;;  %v771_v31 = vadd.f32 %v770_v40, %v740_v36  ;;  %v3866_v63 = vld [vmem:[#allocation58_spill] sm:$0xff]  ;;  %v864_v61 = vadd.f32 %v863_v59, %v833_v54  ;;  %v3867_v24 = vld [vmem:[#allocation76_spill] sm:$0xff] }
 0x162   :  { %v928_v45 = vmul.f32 %v1947_v22, %v3865_v60  ;;  %v1948_v38 = vld [vmem:[#allocation2 + $0x688] sm:$0xff]  ;;  %v958_v23 = vadd.f32 %v957_v7, %v927_v42  ;;  %v3868_v19 = vld [vmem:[#allocation54_spill] sm:$0xff]  ;;  %v3869_v9 = vld [vmem:[#allocation69_spill] sm:$0xff]  ;;  %v670_v8 = vadd.f32 %v669_v41, %v639_v18 }
 0x163   :  { %v835_v17 = vmul.f32 %v1948_v38, %v3866_v63  ;;  %v1949_v43 = vld [vmem:[#allocation2 + $0x748] sm:$0xff]  ;;  %v640_v4 = vmul.f32 %v1950_v44, %v3868_v19  ;;  %v742_v6 = vmul.f32 %v1951_v58, %v3869_v9  ;;  %v1952_v34 = vld [vmem:[#allocation2 + $0x690] sm:$0xff]  ;;  %v865_v35 = vadd.f32 %v864_v61, %v834_v2  ;;  %v1954_v40 = vld [vmem:[#allocation2 + $0x698] sm:$0xff] }
 0x164   :  { %v929_v28 = vmul.f32 %v1949_v43, %v3867_v24  ;;  %v3870_v51 = vld [vmem:[#allocation64_spill] sm:$0xff]  ;;  %v772_v36 = vadd.f32 %v771_v31, %v741_v33  ;;  %v3871_v13 = vld [vmem:[#allocation81_spill] sm:$0xff]  ;;  %v959_v54 = vadd.f32 %v958_v23, %v928_v45  ;;  %v3872_v47 = vld [vmem:[#allocation66_spill] sm:$0xff] }
 0x165   :  { %v836_v46 = vmul.f32 %v1952_v34, %v3870_v51  ;;  %v1953_v21 = vld [vmem:[#allocation2 + $0x750] sm:$0xff]  ;;  %v837_v37 = vmul.f32 %v1954_v40, %v3872_v47  ;;  %v866_v42 = vadd.f32 %v865_v35, %v835_v17  ;;  %v1955_v59 = vld [vmem:[#allocation2 + $0x758] sm:$0xff]  ;;  %v1958_v18 = vld [vmem:[#allocation2 + $0x6a0] sm:$0xff]  ;;  %v671_v61 = vadd.f32 %v670_v8, %v640_v4 }
 0x166   :  { %v930_v0 = vmul.f32 %v1953_v21, %v3871_v13  ;;  %v931_v30 = vmul.f32 %v1955_v59, %v3083_v25  ;;  %v960_v16 = vadd.f32 %v959_v54, %v929_v28  ;;  %v1956_v22 = vld [vmem:[#allocation2 + $0x4d8] sm:$0xff]  ;;  %v3874_v63 = vld [vmem:[#allocation68_spill] sm:$0xff]  ;;  %v773_v45 = vadd.f32 %v772_v36, %v742_v6  ;;  %v1959_v43 = vld [vmem:[#allocation2 + $0x760] sm:$0xff] }
 0x167   :  { %v3873_v60 = vld [vmem:[#allocation61_spill] sm:$0xff]  ;;  %v3875_v41 = vld [vmem:[#allocation82_spill] sm:$0xff]  ;;  %v867_v31 = vadd.f32 %v866_v42, %v836_v46  ;;  %v932_v24 = vmul.f32 %v1959_v43, %v3090_v50  ;;  %v1960_v23 = vld [vmem:[#allocation2 + $0x6a8] sm:$0xff] }
 0x168   :  { %v641_v7 = vmul.f32 %v1956_v22, %v3873_v60  ;;  %v1957_v38 = vld [vmem:[#allocation2 + $0x5d8] sm:$0xff]  ;;  %v838_v33 = vmul.f32 %v1958_v18, %v3875_v41  ;;  %v961_v17 = vadd.f32 %v960_v16, %v930_v0  ;;  %v3876_v44 = vld [vmem:[#allocation79_spill] sm:$0xff]  ;;  %v1964_v4 = vld [vmem:[#allocation2 + $0x6b0] sm:$0xff] }
 0x169   :  { %v743_v2 = vmul.f32 %v1957_v38, %v3874_v63  ;;  %v839_v25 = vmul.f32 %v1960_v23, %v3876_v44  ;;  %v868_v28 = vadd.f32 %v867_v31, %v837_v37  ;;  %v1961_v19 = vld [vmem:[#allocation2 + $0x768] sm:$0xff]  ;;  %v3877_v58 = vld [vmem:[#allocation73_spill] sm:$0xff]  ;;  %v1962_v51 = vld [vmem:[#allocation2 + $0x4e0] sm:$0xff] }
 0x16a   :  { %v933_v9 = vmul.f32 %v1961_v19, %v3877_v58  ;;  %v962_v34 = vadd.f32 %v961_v17, %v931_v30  ;;  %v3878_v35 = vld [vmem:[#allocation70_spill] sm:$0xff]  ;;  %v3879_v54 = vld [vmem:[#allocation75_spill] sm:$0xff]  ;;  %v3880_v6 = vld [vmem:[#allocation84_spill] sm:$0xff]  ;;  %v672_v50 = vadd.f32 %v671_v61, %v641_v7 }
 0x16b   :  { %v642_v21 = vmul.f32 %v1962_v51, %v3878_v35  ;;  %v1963_v13 = vld [vmem:[#allocation2 + $0x5e0] sm:$0xff]  ;;  %v840_v8 = vmul.f32 %v1964_v4, %v3880_v6  ;;  %v869_v36 = vadd.f32 %v868_v28, %v838_v33  ;;  %v774_v0 = vadd.f32 %v773_v45, %v743_v2  ;;  %v1965_v40 = vld [vmem:[#allocation2 + $0x770] sm:$0xff]  ;;  %v1966_v42 = vld [vmem:[#allocation2 + $0x6b8] sm:$0xff] }
 0x16c   :  { %v744_v46 = vmul.f32 %v1963_v13, %v3879_v54  ;;  %v934_v47 = vmul.f32 %v1965_v40, %v3115_v39  ;;  %v963_v37 = vadd.f32 %v962_v34, %v932_v24  ;;  %v841_v59 = vmul.f32 %v1966_v42, %v3113_v27  ;;  %v1967_v16 = vld [vmem:[#allocation2 + $0x778] sm:$0xff]  ;;  %v1968_v63 = vld [vmem:[#allocation2 + $0x4e8] sm:$0xff]  ;;  %v1970_v7 = vld [vmem:[#allocation2 + $0x6c0] sm:$0xff] }
 0x16d   :  { %v870_v30 = vadd.f32 %v869_v36, %v839_v25  ;;  %v3881_v22 = vld [vmem:[#allocation77_spill] sm:$0xff]  ;;  %v3882_v18 = vld [vmem:[#allocation72_spill] sm:$0xff]  ;;  %v3883_v43 = vld [vmem:[#allocation83_spill] sm:$0xff]  ;;  %v673_v39 = vadd.f32 %v672_v50, %v642_v21 }
 0x16e   :  { %v935_v60 = vmul.f32 %v1967_v16, %v3881_v22  ;;  %v964_v38 = vadd.f32 %v963_v37, %v933_v9  ;;  %v643_v41 = vmul.f32 %v1968_v63, %v3882_v18  ;;  %v1969_v31 = vld [vmem:[#allocation2 + $0x5e8] sm:$0xff]  ;;  %v775_v24 = vadd.f32 %v774_v0, %v744_v46  ;;  %v1971_v17 = vld [vmem:[#allocation2 + $0x780] sm:$0xff]  ;;  %v1974_v51 = vld [vmem:[#allocation2 + $0x4f0] sm:$0xff] }
 0x16f   :  { %v745_v33 = vmul.f32 %v1969_v31, %v3883_v43  ;;  %v3884_v2 = vld [vmem:[#allocation88_spill] sm:$0xff]  ;;  %v871_v45 = vadd.f32 %v870_v30, %v840_v8  ;;  %v936_v27 = vmul.f32 %v1971_v17, %v3140_v29  ;;  %v3885_v25 = vld [vmem:[#allocation78_spill] sm:$0xff]  ;;  %v3886_v35 = vld [vmem:[#allocation65_spill] sm:$0xff] }
 0x170   :  { %v842_v61 = vmul.f32 %v1970_v7, %v3884_v2  ;;  %v965_v23 = vadd.f32 %v964_v38, %v934_v47  ;;  %v1972_v44 = vld [vmem:[#allocation2 + $0x6c8] sm:$0xff]  ;;  %v644_v13 = vmul.f32 %v1974_v51, %v3886_v35  ;;  %v1975_v54 = vld [vmem:[#allocation2 + $0x5f0] sm:$0xff]  ;;  %v3887_v4 = vld [vmem:[#allocation74_spill] sm:$0xff]  ;;  %v674_v29 = vadd.f32 %v673_v39, %v643_v41 }
 0x171   :  { %v843_v28 = vmul.f32 %v1972_v44, %v3885_v25  ;;  %v872_v19 = vadd.f32 %v871_v45, %v841_v59  ;;  %v1973_v58 = vld [vmem:[#allocation2 + $0x788] sm:$0xff]  ;;  %v746_v6 = vmul.f32 %v1975_v54, %v3887_v4  ;;  %v1976_v21 = vld [vmem:[#allocation2 + $0x6d0] sm:$0xff]  ;;  %v3888_v46 = vld [vmem:[#allocation86_spill] sm:$0xff]  ;;  %v776_v50 = vadd.f32 %v775_v24, %v745_v33 }
 0x172   :  { %v937_v9 = vmul.f32 %v1973_v58, %v3153_v56  ;;  %v966_v34 = vadd.f32 %v965_v23, %v935_v60  ;;  %v844_v8 = vmul.f32 %v1976_v21, %v3888_v46  ;;  %v1977_v0 = vld [vmem:[#allocation2 + $0x790] sm:$0xff]  ;;  %v1978_v37 = vld [vmem:[#allocation2 + $0x6d8] sm:$0xff]  ;;  %v3889_v60 = vld [vmem:[#allocation71_spill] sm:$0xff] }
 0x173   :  { %v873_v36 = vadd.f32 %v872_v19, %v842_v61  ;;  %v938_v40 = vmul.f32 %v1977_v0, %v3163_v10  ;;  %v845_v56 = vmul.f32 %v1978_v37, %v3149_v52  ;;  %v1979_v59 = vld [vmem:[#allocation2 + $0x798] sm:$0xff]  ;;  %v1982_v41 = vld [vmem:[#allocation2 + $0x6e0] sm:$0xff]  ;;  %v675_v10 = vadd.f32 %v674_v29, %v644_v13  ;;  %v1984_v45 = vld [vmem:[#allocation2 + $0x6e8] sm:$0xff] }
 0x174   :  { %v967_v47 = vadd.f32 %v966_v34, %v936_v27  ;;  %v939_v30 = vmul.f32 %v1979_v59, %v3170_v62  ;;  %v1980_v22 = vld [vmem:[#allocation2 + $0x4f8] sm:$0xff]  ;;  %v846_v43 = vmul.f32 %v1982_v41, %v3151_v48  ;;  %v777_v7 = vadd.f32 %v776_v50, %v746_v6  ;;  %v1983_v2 = vld [vmem:[#allocation2 + $0x7a0] sm:$0xff]  ;;  %v1985_v24 = vld [vmem:[#allocation2 + $0x7a8] sm:$0xff] }
 0x175   :  { %v874_v42 = vadd.f32 %v873_v36, %v843_v28  ;;  %v645_v38 = vmul.f32 %v1980_v22, %v3889_v60  ;;  %v1981_v63 = vld [vmem:[#allocation2 + $0x5f8] sm:$0xff]  ;;  %v940_v52 = vmul.f32 %v1983_v2, %v3181_v49  ;;  %v847_v62 = vmul.f32 %v1984_v45, %v3159_v53  ;;  %v1986_v23 = vld [vmem:[#allocation2 + $0x6f0] sm:$0xff]  ;;  %v3891_v44 = vld [vmem:[#allocation87_spill] sm:$0xff] }
 0x176   :  { %v968_v16 = vadd.f32 %v967_v47, %v937_v9  ;;  %v3890_v18 = vld [vmem:[#allocation85_spill] sm:$0xff]  ;;  %v941_v17 = vmul.f32 %v1985_v24, %v3188_v11  ;;  %v848_v25 = vmul.f32 %v1986_v23, %v3891_v44  ;;  %v1990_v21 = vld [vmem:[#allocation2 + $0x7c0] sm:$0xff]  ;;  %v1991_v29 = vld [vmem:[#allocation2 + $0x7c8] sm:$0xff] }
 0x177   :  { %v747_v31 = vmul.f32 %v1981_v63, %v3890_v18  ;;  %v875_v33 = vadd.f32 %v874_v42, %v844_v8  ;;  %v676_v48 = vadd.f32 %v675_v10, %v645_v38  ;;  %v1987_v58 = vld [vmem:[#allocation2 + $0x7b0] sm:$0xff]  ;;  %v1988_v49 = vld [vmem:[#allocation2 + $0x6f8] sm:$0xff]  ;;  %v944_v46 = vmul.f32 %v1990_v21, %v3207_v1 }
 0x178   :  { %v969_v61 = vadd.f32 %v968_v16, %v938_v40  ;;  %v942_v9 = vmul.f32 %v1987_v58, %v3195_v32  ;;  %v849_v51 = vmul.f32 %v1988_v49, %v3179_v57  ;;  %v1989_v53 = vld [vmem:[#allocation2 + $0x7b8] sm:$0xff]  ;;  %v945_v32 = vmul.f32 %v1991_v29, %v3214_v5  ;;  %v1992_v0 = vld [vmem:[#allocation2 + $0x7d0] sm:$0xff]  ;;  %v1995_v5 = vld [vmem:[#allocation2 + $0x7e8] sm:$0xff]  ;;  %v1404_v58 = vpop.xlane.xlu0 %1403 }
 0x179   :  { %v876_v39 = vadd.f32 %v875_v33, %v845_v56  ;;  %v778_v19 = vadd.f32 %v777_v7, %v747_v31  ;;  %v943_v13 = vmul.f32 %v1989_v53, %v3202_v15  ;;  %v677_v4 = vrot.slane %v676_v48, 4  ;;  %v1993_v56 = vld [vmem:[#allocation2 + $0x7d8] sm:$0xff]  ;;  %v1720_v53 = vld [vmem:[%s3360_s2] ss:$0 sm:$0xff] }
 0x17a   :  { %v970_v27 = vadd.f32 %v969_v61, %v939_v30  ;;  %v946_v57 = vmul.f32 %v1992_v0, %v3218_v26  ;;  %v947_v42 = vmul.f32 %v1993_v56, %v3221_v14  ;;  %v1994_v30 = vld [vmem:[#allocation2 + $0x7e0] sm:$0xff]  ;;  %v949_v63 = vmul.f32 %v1995_v5, %v3231_v12  ;;  %v1996_v26 = vld [vmem:[#allocation2 + $0x7f0] sm:$0xff]  ;;  %v1997_v14 = vld [vmem:[#allocation2 + $0x7f8] sm:$0xff] }
 0x17b   :  { %v877_v28 = vadd.f32 %v876_v39, %v846_v43  ;;  %v779_v6 = vrot.slane %v778_v19, 4  ;;  %v678_v40 = vadd.f32 %v677_v4, %v676_v48  ;;  %v948_v1 = vmul.f32 %v1994_v30, %v3225_v20 }
 0x17c   :  { %v971_v34 = vadd.f32 %v970_v27, %v940_v52  ;;  %v950_v31 = vmul.f32 %v1996_v26, %v3233_v3  ;;  %v951_v7 = vmul.f32 %v1997_v14, %v3243_v55 }
 0x17d   :  { %v878_v35 = vadd.f32 %v877_v28, %v847_v62  ;;  %v780_v47 = vadd.f32 %v779_v6, %v778_v19  ;;  %v679_v16 = vrot.slane %v678_v40, 2 }
 0x17e   :  { %v972_v54 = vadd.f32 %v971_v34, %v941_v17 }
 0x17f   :  { %v879_v11 = vadd.f32 %v878_v35, %v848_v25  ;;  %v781_v22 = vrot.slane %v780_v47, 2  ;;  %v680_v41 = vadd.f32 %v679_v16, %v678_v40 }
 0x180   :  { %v973_v8 = vadd.f32 %v972_v54, %v942_v9 }
 0x181   :  { %v880_v36 = vadd.f32 %v879_v11, %v849_v51  ;;  %v782_v43 = vadd.f32 %v781_v22, %v780_v47  ;;  %v681_v20 = vrot.slane %v680_v41, 1 }
 0x182   :  { %v974_v50 = vadd.f32 %v973_v8, %v943_v13 }
 0x183   :  { %v881_v37 = vrot.slane %v880_v36, 4  ;;  %v783_v52 = vrot.slane %v782_v43, 1  ;;  %v682_v39 = vadd.f32 %v681_v20, %v680_v41 }
 0x184   :  { %v975_v15 = vadd.f32 %v974_v50, %v944_v46 }
 0x185   :  { %v882_v60 = vadd.f32 %v881_v37, %v880_v36  ;;  %v784_v24 = vadd.f32 %v783_v52, %v782_v43 }
 0x186   :  { %v976_v59 = vadd.f32 %v975_v15, %v945_v32 }
 0x187   :  { %v883_v33 = vrot.slane %v882_v60, 2  ;;  %v785_v23 = vadd.f32 %v784_v24, %v682_v39 }
 0x188   :  { %v977_v38 = vadd.f32 %v976_v59, %v946_v57 }
 0x189   :  { %v884_v61 = vadd.f32 %v883_v33, %v882_v60 }
 0x18a   :  { %v978_v18 = vadd.f32 %v977_v38, %v947_v42 }
 0x18b   :  { %v885_v12 = vrot.slane %v884_v61, 1 }
 0x18c   :  { %v979_v10 = vadd.f32 %v978_v18, %v948_v1 }
 0x18d   :  { %v886_v3 = vadd.f32 %v885_v12, %v884_v61 }
 0x18e   :  { %v980_v2 = vadd.f32 %v979_v10, %v949_v63 }
 0x18f   :  { %v887_v28 = vadd.f32 %v886_v3, %v785_v23 }
 0x190   :  { %v981_v45 = vadd.f32 %v980_v2, %v950_v31 }
 0x192   :  { %v982_v62 = vadd.f32 %v981_v45, %v951_v7 }
 0x194   :  { %v983_v17 = vrot.slane %v982_v62, 4 }
 0x196   :  { %v984_v27 = vadd.f32 %v983_v17, %v982_v62 }
 0x198   :  { %v985_v44 = vrot.slane %v984_v27, 2 }
 0x199   :  { %v1686_v9 = vpop.xlane.xlu0 %1685 }
 0x19a   :  { %v986_v25 = vadd.f32 %v985_v44, %v984_v27  ;;  %v1687_v34 = vsel %vm992_vm0, %v1404_v58, %v1686_v9 }
 0x19b   :  { %1689 = vrot.lane.b32.xlu0 %v1687_v34, %s2074_s1 }
 0x19c   :  { %v987_v48 = vrot.slane %v986_v25, 1 }
 0x19e   :  { %v988_v19 = vadd.f32 %v987_v48, %v986_v25 }
 0x1a0   :  { %v989_v55 = vadd.f32 %v988_v19, %v887_v28 }
 0x1a2   :  { %990 = vadd.xlane.f32.xlu1 %v989_v55 }
 0x1e9   :  { %v580_v49 = vpop.xlane.xlu1 %579 }
 0x20d   :  { %v1690_v51 = vpop.permute.xlu0 %1689 }
 0x22f   :  { %v991_v35 = vpop.xlane.xlu1 %990 }
 0x230   :  { %v993_v13 = vsel %vm992_vm0, %v580_v49, %v991_v35 }
 0x231   :  { %v1693_v54 = vsel %vm1692_vm1, %v993_v13, %v1690_v51 }
 0x232   :  { %v1701_v11 = vadd.f32 %v1720_v53, %v1693_v54 }
 0x234   :  { %1703 = vst.msk [vmem:[#allocation7] sm:$0x3] %vm1702_vm2, %v1701_v11 }
 0x235   :  { %2053 = shalt.err (!%p2050_p6)
}
 0x236   :  { %s2054_s17 = scalar_lea.hbm %s3361_s3, 32 }
 0x237   :  { %p2055_p7 = scmp.ne.s32.totalorder %s3361_s3, %s2054_s17  ;;  %p2058_p8 = scmp.lt.u32.totalorder %s2054_s17, %s3361_s3 }
 0x239   :  { %p2060_p9 = pnand %p2058_p8, %p2055_p7 }
 0x23b   :  { %2063 = shalt.err (!%p2060_p9)
}
 0x23c   :  { %1713 = dma.vmem_to_hbm [thread:$0]  %s1711_s13, 32, %s3361_s3, [#allocation4]  }
 0x23d   :  { %2068 = dma.done.wait [#allocation4], 32  }
 0x23e   :  { %2069 = vsyncadd [#allocation4], 4294967264 }
 0x23f   :  { %1717 = vsyncpa [#allocation3], 1 }
 0x240   :  { %1718 = vsyncpa [#allocation6], 1 }
 0x241   :  { %1719 = vsyncpa [#allocation4], 1 }

</bundles_post_ra>
